<compile_context>
chip_gen: v6e
topology: v6e:2x2x1
jax: 0.10.0
libtpu: 0.0.40
codegen_flags: <defaults>
</compile_context>

<pallas_src>
import jax
import jax.numpy as jnp
from jax.experimental import pallas as pl
from jax.experimental.pallas import tpu as pltpu


# ------------------------------ helpers ------------------------------------
def _full_spec(shape):
    nd = len(shape)
    return pl.BlockSpec(shape, lambda i, _nd=nd: (0,) * _nd)


def _interp_matrix(out_size, in_size):
    # bilinear, align_corners=True:  src = i * (in-1)/(out-1)
    i = jnp.arange(out_size, dtype=jnp.float32)
    src = i * (in_size - 1) / (out_size - 1)
    i0 = jnp.clip(jnp.floor(src).astype(jnp.int32), 0, in_size - 1)
    i1 = jnp.clip(i0 + 1, 0, in_size - 1)
    frac = src - i0.astype(jnp.float32)
    cols = jnp.arange(in_size)
    M = ((cols[None, :] == i0[:, None]).astype(jnp.float32) * (1.0 - frac)[:, None]
         + (cols[None, :] == i1[:, None]).astype(jnp.float32) * frac[:, None])
    return M


def _band_conv_weight(w, W):
    """(3,3,Ci,Co) HWIO -> (3, W*Ci, W*Co) banded matrices.

    B[dy][x_src*Ci + ci, x_out*Co + co] = w[dy, dx, ci, co] with
    x_src = x_out + dx - 1; out-of-range x_src entries are absent, which
    implements the x zero-padding for free (no lane halo needed)."""
    _, _, Ci, Co = w.shape
    xs = jnp.arange(W)
    B = jnp.zeros((3, W, Ci, W, Co), jnp.float32)
    for dx in range(3):
        sel = (xs[:, None] == xs[None, :] + (dx - 1)).astype(jnp.float32)  # [src, out]
        B = B + sel[None, :, None, :, None] * w[:, dx][:, None, :, None, :]
    return B.reshape(3, W * Ci, W * Co)


# ------------------------------ fused kernel -------------------------------
def _make_ffm_kernel(N, H, W, Cin, Cmid, Cout, H2, W2):
    NH = N * H
    inv_cnt = 1.0 / float(N * H * W)

    def conv3x3(pad_ref, wb_ref, bl_ref):
        # 3 banded matmuls (one per dy); dx shift + x padding live in wb_ref.
        WCi = pad_ref.shape[2]
        out = None
        for dy in range(3):
            rows = pad_ref[:, dy:dy + H, :].reshape(NH, WCi)       # (NH, W*Ci)
            p = jnp.dot(rows, wb_ref[dy], preferred_element_type=jnp.float32)
            out = p if out is None else out + p
        return out + bl_ref[...]                                    # (NH, W*Co)

    def write_interior(pad_ref, slab):
        # interior rows fully overwritten; the two zero halo rows stay zero.
        pad_ref[:, 1:H + 1, :] = slab.reshape(N, H, pad_ref.shape[2])

    def ftb(pad_x, pad_mid, wb1, bl1, wb2, bl2, g, be, wb3, bl3, S, ST):
        y1 = conv3x3(pad_x, wb1, bl1)                               # (NH, W*Co)
        write_interior(pad_mid, jnp.maximum(y1, 0.0))
        y2 = conv3x3(pad_mid, wb2, bl2)
        # BatchNorm (training-mode batch stats, biased var), two-pass.
        # Channel fold / broadcast across the x lane-blocks via tiny matmuls.
        rsum = jnp.sum(y2, axis=0, keepdims=True)                   # (1, W*Co)
        mean_c = jnp.dot(rsum, S[...],
                         preferred_element_type=jnp.float32) * inv_cnt   # (1, Co)
        mean_l = jnp.dot(mean_c, ST[...],
                         preferred_element_type=jnp.float32)              # (1, W*Co)
        d = y2 - mean_l
        vsum = jnp.sum(d * d, axis=0, keepdims=True)
        var_c = jnp.dot(vsum, S[...],
                        preferred_element_type=jnp.float32) * inv_cnt
        scale_c = g[...] * jax.lax.rsqrt(var_c + 1e-5)              # (1, Co)
        scale_l = jnp.dot(scale_c, ST[...], preferred_element_type=jnp.float32)
        beta_l = jnp.dot(be[...], ST[...], preferred_element_type=jnp.float32)
        y2n = d * scale_l + beta_l
        write_interior(pad_mid, jnp.maximum(y2n, 0.0))
        y3 = conv3x3(pad_mid, wb3, bl3)
        return jnp.maximum(y1 + y3, 0.0)                            # (NH, W*Co)

    def kernel(lowx_ref, high_ref,
               wb11, bl11, wb12, bl12, g1, be1, wb13, bl13, S1, S1T,
               wb21, bl21, wb22, bl22, g2, be2, wb23, bl23, S2, S2T,
               mh_ref, uw_ref, out_ref,
               pad_in, pad_m1, pad_m2):
        # zero ONLY the halo (the two dy pad rows per image, per scratch).
        for pad_ref, C in ((pad_in, Cin), (pad_m1, Cmid), (pad_m2, Cout)):
            z = jnp.zeros((N, 1, W * C), jnp.float32)
            pad_ref[:, 0:1, :] = z
            pad_ref[:, H + 1:H + 2, :] = z

        # in-kernel row-halo padding of the input (lane-dense slab).
        write_interior(pad_in, lowx_ref[...])

        # ---- FTB1, skip add fused:  s = ftb1(low_x) + high_x ----
        s = ftb(pad_in, pad_m1, wb11, bl11, wb12, bl12, g1, be1, wb13, bl13,
                S1, S1T)
        s = s + high_ref[...].reshape(NH, W * Cmid)

        # ---- FTB2 (no skip -> no zero tensor DMA'd from HBM) ----
        write_interior(pad_m1, s)
        y = ftb(pad_m1, pad_m2, wb21, bl21, wb22, bl22, g2, be2, wb23, bl23,
                S2, S2T)
        # y is already the lane-dense (N*H, W*Cout) slab -> no concats needed.

        # ---- bilinear upsample (align_corners=True), separable ----
        mh = mh_ref[...]                     # (H2, H)   per-image, no kron(I_N,Mh)
        uw = uw_ref[...]                     # (W*Cout, W2*Cout) banded lane op
        for n in range(N):                   # static; N is small
            t = jnp.dot(mh, y[n * H:(n + 1) * H, :],
                        preferred_element_type=jnp.float32)          # (H2, W*Co)
            out_ref[n * H2:(n + 1) * H2, :] = jnp.dot(
                t, uw, preferred_element_type=jnp.float32)            # (H2, W2*Co)

    return kernel


# ------------------------------- wrapper ------------------------------------
def ffm_forward(low_x, high_x, params, upfactor=2):
    """low_x: (N,H,W,Cin), high_x: (N,H,W,Cmid) NHWC -> (N, up*H, up*W, Cout)."""
    N, H, W, Cin = low_x.shape
    Cmid = params["ftb1"]["w1"].shape[-1]
    Cout = params["ftb2"]["w1"].shape[-1]
    H2, W2 = upfactor * H, upfactor * W

    p1, p2 = params["ftb1"], params["ftb2"]

    def tile_b(b):          # (1,C) -> (1, W*C), lane layout x*C + c
        return jnp.tile(b, (1, W))

    def chan_fold(C):       # per-channel sum over x lane-blocks; S.T broadcasts back
        S = jnp.tile(jnp.eye(C, dtype=jnp.float32), (W, 1))     # (W*C, C)
        return S, S.T

    S1, S1T = chan_fold(Cmid)
    S2, S2T = chan_fold(Cout)

    # separable interpolation operators (computed once, wrapper-side XLA)
    Mh = _interp_matrix(H2, H)                                   # (H2, H)
    Mw = _interp_matrix(W2, W)                                   # (W2, W)
    # width-upsample operator on the lane axis: UwT[x*C+c, x2*C+c] = Mw[x2, x]
    UwT = (Mw.T[:, None, :, None]
           * jnp.eye(Cout, dtype=jnp.float32)[None, :, None, :]
           ).reshape(W * Cout, W2 * Cout)

    args = (
        low_x.reshape(N, H, W * Cin), high_x.reshape(N, H, W * Cmid),
        _band_conv_weight(p1["w1"], W), tile_b(p1["b1"]),
        _band_conv_weight(p1["w2"], W), tile_b(p1["b2"]),
        p1["gamma"], p1["beta"],
        _band_conv_weight(p1["w3"], W), tile_b(p1["b3"]),
        S1, S1T,
        _band_conv_weight(p2["w1"], W), tile_b(p2["b1"]),
        _band_conv_weight(p2["w2"], W), tile_b(p2["b2"]),
        p2["gamma"], p2["beta"],
        _band_conv_weight(p2["w3"], W), tile_b(p2["b3"]),
        S2, S2T,
        Mh, UwT,
    )

    kernel = _make_ffm_kernel(N, H, W, Cin, Cmid, Cout, H2, W2)

    out2d = pl.pallas_call(
        kernel,
        out_shape=jax.ShapeDtypeStruct((N * H2, W2 * Cout), jnp.float32),
        grid=(1,),
        in_specs=[_full_spec(a.shape) for a in args],
        out_specs=_full_spec((N * H2, W2 * Cout)),
        scratch_shapes=[
            # row-halo scratches only (x padding folded into banded weights)
            pltpu.VMEM((N, H + 2, W * Cin), jnp.float32),
            pltpu.VMEM((N, H + 2, W * Cmid), jnp.float32),
            pltpu.VMEM((N, H + 2, W * Cout), jnp.float32),
        ],
        compiler_params=pltpu.CompilerParams(
            # batch-statistic BN couples all pixels -> single grid step.
            dimension_semantics=("arbitrary",),
            vmem_limit_bytes=32 * 1024 * 1024,   # explicit; safe on v5e/v6e/v7x
        ),
    )(*args)
    return out2d.reshape(N, H2, W2, Cout)


# ----------------------------- parameters -----------------------------------
def init_ftb_params(key, cin, cmid):
    k1, k2, k3 = jax.random.split(key, 3)
    std = 0.01
    return dict(
        w1=std * jax.random.normal(k1, (3, 3, cin, cmid), jnp.float32),
        b1=jnp.zeros((1, cmid), jnp.float32),
        w2=std * jax.random.normal(k2, (3, 3, cmid, cmid), jnp.float32),
        b2=jnp.zeros((1, cmid), jnp.float32),
        gamma=jnp.ones((1, cmid), jnp.float32),
        beta=jnp.zeros((1, cmid), jnp.float32),
        w3=std * jax.random.normal(k3, (3, 3, cmid, cmid), jnp.float32),
        b3=jnp.zeros((1, cmid), jnp.float32),
    )


# -------------------------- pure-JAX reference ------------------------------
def _conv3x3_ref(x, w, b):
    y = jax.lax.conv_general_dilated(x, w, (1, 1), "SAME",
                                     dimension_numbers=("NHWC", "HWIO", "NHWC"))
    return y + b.reshape(1, 1, 1, -1)


def _ftb_ref(x, p):
    y1 = _conv3x3_ref(x, p["w1"], p["b1"])
    y2 = _conv3x3_ref(jax.nn.relu(y1), p["w2"], p["b2"])
    mean = jnp.mean(y2, axis=(0, 1, 2), keepdims=True)
    var = jnp.mean(jnp.square(y2 - mean), axis=(0, 1, 2), keepdims=True)
    y2n = (y2 - mean) * jax.lax.rsqrt(var + 1e-5)
    y2n = y2n * p["gamma"].reshape(1, 1, 1, -1) + p["beta"].reshape(1, 1, 1, -1)
    y3 = _conv3x3_ref(jax.nn.relu(y2n), p["w3"], p["b3"])
    return jax.nn.relu(y1 + y3)


def ffm_ref(low_x, high_x, params, upfactor=2):
    s = _ftb_ref(low_x, params["ftb1"]) + high_x
    y = _ftb_ref(s, params["ftb2"])
    N, H, W, Cout = y.shape
    H2, W2 = upfactor * H, upfactor * W
    U = jnp.kron(_interp_matrix(H2, H), _interp_matrix(W2, W))   # (H2*W2, H*W)
    return jnp.einsum("pq,nqc->npc", U,
                      y.reshape(N, H * W, Cout)).reshape(N, H2, W2, Cout)


if __name__ == "__main__":
    key = jax.random.PRNGKey(0)
    k_p1, k_p2, k_low, k_high = jax.random.split(key, 4)

    N, H, W = 2, 16, 16
    inC, midC, outC, upfactor = 4, 8, 8, 2

    params = dict(ftb1=init_ftb_params(k_p1, inC, midC),
                  ftb2=init_ftb_params(k_p2, midC, outC))

    # NHWC inputs (NCHW equivalents: low_x (2,4,16,16), high_x (2,8,16,16))
    low_x = jax.random.normal(k_low, (N, H, W, inC), jnp.float32)
    high_x = jax.random.normal(k_high, (N, H, W, midC), jnp.float32)

    out = jax.block_until_ready(ffm_forward(low_x, high_x, params,
                                            upfactor=upfactor))
    ref = ffm_ref(low_x, high_x, params, upfactor=upfactor)

    assert out.shape == (N, upfactor * H, upfactor * W, outC), out.shape
    max_err = float(jnp.max(jnp.abs(out - ref)))
    assert jnp.allclose(out, ref, atol=1e-4, rtol=1e-4), max_err
    print("KERNEL_OK")
</pallas_src>

<mosaic_0001>
module attributes {stable_mosaic.version = 11 : i64} {
  func.func @kernel(%arg0: i32, %arg1: memref<2x16x64xf32, #tpu.memory_space<vmem>>, %arg2: memref<2x16x128xf32, #tpu.memory_space<vmem>>, %arg3: memref<3x64x128xf32, #tpu.memory_space<vmem>>, %arg4: memref<1x128xf32, #tpu.memory_space<vmem>>, %arg5: memref<3x128x128xf32, #tpu.memory_space<vmem>>, %arg6: memref<1x128xf32, #tpu.memory_space<vmem>>, %arg7: memref<1x8xf32, #tpu.memory_space<vmem>>, %arg8: memref<1x8xf32, #tpu.memory_space<vmem>>, %arg9: memref<3x128x128xf32, #tpu.memory_space<vmem>>, %arg10: memref<1x128xf32, #tpu.memory_space<vmem>>, %arg11: memref<128x8xf32, #tpu.memory_space<vmem>>, %arg12: memref<8x128xf32, #tpu.memory_space<vmem>>, %arg13: memref<3x128x128xf32, #tpu.memory_space<vmem>>, %arg14: memref<1x128xf32, #tpu.memory_space<vmem>>, %arg15: memref<3x128x128xf32, #tpu.memory_space<vmem>>, %arg16: memref<1x128xf32, #tpu.memory_space<vmem>>, %arg17: memref<1x8xf32, #tpu.memory_space<vmem>>, %arg18: memref<1x8xf32, #tpu.memory_space<vmem>>, %arg19: memref<3x128x128xf32, #tpu.memory_space<vmem>>, %arg20: memref<1x128xf32, #tpu.memory_space<vmem>>, %arg21: memref<128x8xf32, #tpu.memory_space<vmem>>, %arg22: memref<8x128xf32, #tpu.memory_space<vmem>>, %arg23: memref<32x16xf32, #tpu.memory_space<vmem>>, %arg24: memref<128x256xf32, #tpu.memory_space<vmem>>, %arg25: memref<64x256xf32, #tpu.memory_space<vmem>>, %arg26: memref<2x18x64xf32, #tpu.memory_space<vmem>>, %arg27: memref<2x18x128xf32, #tpu.memory_space<vmem>>, %arg28: memref<2x18x128xf32, #tpu.memory_space<vmem>>) attributes {dimension_semantics = [#tpu.dimension_semantics<arbitrary>], iteration_bounds = array<i64: 1>, scalar_prefetch = 0 : i64, scratch_operands = 3 : i64, tpu.core_type = #tpu.core_type<tc>, window_params = [{pipeline_mode = #tpu.pipeline_mode<synchronous>, transform_indices = @transform_0, window_bounds = array<i64: 2, 16, 64>}, {pipeline_mode = #tpu.pipeline_mode<synchronous>, transform_indices = @transform_1, window_bounds = array<i64: 2, 16, 128>}, {pipeline_mode = #tpu.pipeline_mode<synchronous>, transform_indices = @transform_2, window_bounds = array<i64: 3, 64, 128>}, {pipeline_mode = #tpu.pipeline_mode<synchronous>, transform_indices = @transform_3, window_bounds = array<i64: 1, 128>}, {pipeline_mode = #tpu.pipeline_mode<synchronous>, transform_indices = @transform_4, window_bounds = array<i64: 3, 128, 128>}, {pipeline_mode = #tpu.pipeline_mode<synchronous>, transform_indices = @transform_5, window_bounds = array<i64: 1, 128>}, {pipeline_mode = #tpu.pipeline_mode<synchronous>, transform_indices = @transform_6, window_bounds = array<i64: 1, 8>}, {pipeline_mode = #tpu.pipeline_mode<synchronous>, transform_indices = @transform_7, window_bounds = array<i64: 1, 8>}, {pipeline_mode = #tpu.pipeline_mode<synchronous>, transform_indices = @transform_8, window_bounds = array<i64: 3, 128, 128>}, {pipeline_mode = #tpu.pipeline_mode<synchronous>, transform_indices = @transform_9, window_bounds = array<i64: 1, 128>}, {pipeline_mode = #tpu.pipeline_mode<synchronous>, transform_indices = @transform_10, window_bounds = array<i64: 128, 8>}, {pipeline_mode = #tpu.pipeline_mode<synchronous>, transform_indices = @transform_11, window_bounds = array<i64: 8, 128>}, {pipeline_mode = #tpu.pipeline_mode<synchronous>, transform_indices = @transform_12, window_bounds = array<i64: 3, 128, 128>}, {pipeline_mode = #tpu.pipeline_mode<synchronous>, transform_indices = @transform_13, window_bounds = array<i64: 1, 128>}, {pipeline_mode = #tpu.pipeline_mode<synchronous>, transform_indices = @transform_14, window_bounds = array<i64: 3, 128, 128>}, {pipeline_mode = #tpu.pipeline_mode<synchronous>, transform_indices = @transform_15, window_bounds = array<i64: 1, 128>}, {pipeline_mode = #tpu.pipeline_mode<synchronous>, transform_indices = @transform_16, window_bounds = array<i64: 1, 8>}, {pipeline_mode = #tpu.pipeline_mode<synchronous>, transform_indices = @transform_17, window_bounds = array<i64: 1, 8>}, {pipeline_mode = #tpu.pipeline_mode<synchronous>, transform_indices = @transform_18, window_bounds = array<i64: 3, 128, 128>}, {pipeline_mode = #tpu.pipeline_mode<synchronous>, transform_indices = @transform_19, window_bounds = array<i64: 1, 128>}, {pipeline_mode = #tpu.pipeline_mode<synchronous>, transform_indices = @transform_20, window_bounds = array<i64: 128, 8>}, {pipeline_mode = #tpu.pipeline_mode<synchronous>, transform_indices = @transform_21, window_bounds = array<i64: 8, 128>}, {pipeline_mode = #tpu.pipeline_mode<synchronous>, transform_indices = @transform_22, window_bounds = array<i64: 32, 16>}, {pipeline_mode = #tpu.pipeline_mode<synchronous>, transform_indices = @transform_23, window_bounds = array<i64: 128, 256>}, {pipeline_mode = #tpu.pipeline_mode<synchronous>, transform_indices = @transform_24, window_bounds = array<i64: 64, 256>}]} {
    %cst = arith.constant 0.000000e+00 : f32
    %0 = vector.broadcast %cst : f32 to vector<2x1x64xf32>
    %c0 = arith.constant 0 : index
    %c0_0 = arith.constant 0 : index
    %c0_1 = arith.constant 0 : index
    %1 = vector.load %arg26[%c0, %c0_0, %c0_1] : memref<2x18x64xf32, #tpu.memory_space<vmem>>, vector<2x1x64xf32>
    tpu.vector_store %arg26[%c0, %c0_0, %c0_1], %0 {strides = array<i32>} : memref<2x18x64xf32, #tpu.memory_space<vmem>>, vector<2x1x64xf32>,
    %c0_2 = arith.constant 0 : index
    %c17 = arith.constant 17 : index
    %c0_3 = arith.constant 0 : index
    %2 = vector.load %arg26[%c0_2, %c17, %c0_3] : memref<2x18x64xf32, #tpu.memory_space<vmem>>, vector<2x1x64xf32>
    tpu.vector_store %arg26[%c0_2, %c17, %c0_3], %0 {strides = array<i32>} : memref<2x18x64xf32, #tpu.memory_space<vmem>>, vector<2x1x64xf32>,
    %cst_4 = arith.constant 0.000000e+00 : f32
    %3 = vector.broadcast %cst_4 : f32 to vector<2x1x128xf32>
    %c0_5 = arith.constant 0 : index
    %c0_6 = arith.constant 0 : index
    %c0_7 = arith.constant 0 : index
    %4 = vector.load %arg27[%c0_5, %c0_6, %c0_7] : memref<2x18x128xf32, #tpu.memory_space<vmem>>, vector<2x1x128xf32>
    tpu.vector_store %arg27[%c0_5, %c0_6, %c0_7], %3 {strides = array<i32>} : memref<2x18x128xf32, #tpu.memory_space<vmem>>, vector<2x1x128xf32>,
    %c0_8 = arith.constant 0 : index
    %c17_9 = arith.constant 17 : index
    %c0_10 = arith.constant 0 : index
    %5 = vector.load %arg27[%c0_8, %c17_9, %c0_10] : memref<2x18x128xf32, #tpu.memory_space<vmem>>, vector<2x1x128xf32>
    tpu.vector_store %arg27[%c0_8, %c17_9, %c0_10], %3 {strides = array<i32>} : memref<2x18x128xf32, #tpu.memory_space<vmem>>, vector<2x1x128xf32>,
    %cst_11 = arith.constant 0.000000e+00 : f32
    %6 = vector.broadcast %cst_11 : f32 to vector<2x1x128xf32>
    %c0_12 = arith.constant 0 : index
    %c0_13 = arith.constant 0 : index
    %c0_14 = arith.constant 0 : index
    %7 = vector.load %arg28[%c0_12, %c0_13, %c0_14] : memref<2x18x128xf32, #tpu.memory_space<vmem>>, vector<2x1x128xf32>
    tpu.vector_store %arg28[%c0_12, %c0_13, %c0_14], %6 {strides = array<i32>} : memref<2x18x128xf32, #tpu.memory_space<vmem>>, vector<2x1x128xf32>,
    %c0_15 = arith.constant 0 : index
    %c17_16 = arith.constant 17 : index
    %c0_17 = arith.constant 0 : index
    %8 = vector.load %arg28[%c0_15, %c17_16, %c0_17] : memref<2x18x128xf32, #tpu.memory_space<vmem>>, vector<2x1x128xf32>
    tpu.vector_store %arg28[%c0_15, %c17_16, %c0_17], %6 {strides = array<i32>} : memref<2x18x128xf32, #tpu.memory_space<vmem>>, vector<2x1x128xf32>,
    %c0_18 = arith.constant 0 : index
    %c0_19 = arith.constant 0 : index
    %c0_20 = arith.constant 0 : index
    %9 = vector.load %arg1[%c0_18, %c0_19, %c0_20] : memref<2x16x64xf32, #tpu.memory_space<vmem>>, vector<2x16x64xf32>
    %c0_21 = arith.constant 0 : index
    %c1 = arith.constant 1 : index
    %c0_22 = arith.constant 0 : index
    %10 = vector.load %arg26[%c0_21, %c1, %c0_22] : memref<2x18x64xf32, #tpu.memory_space<vmem>>, vector<2x16x64xf32>
    tpu.vector_store %arg26[%c0_21, %c1, %c0_22], %9 {strides = array<i32>} : memref<2x18x64xf32, #tpu.memory_space<vmem>>, vector<2x16x64xf32>,
    %c0_23 = arith.constant 0 : index
    %c0_24 = arith.constant 0 : index
    %c0_25 = arith.constant 0 : index
    %11 = vector.load %arg26[%c0_23, %c0_24, %c0_25] : memref<2x18x64xf32, #tpu.memory_space<vmem>>, vector<2x16x64xf32>
    %12 = vector.shape_cast %11 : vector<2x16x64xf32> to vector<32x64xf32>
    %c0_26 = arith.constant 0 : index
    %c0_27 = arith.constant 0 : index
    %c0_28 = arith.constant 0 : index
    %13 = vector.load %arg3[%c0_26, %c0_27, %c0_28] : memref<3x64x128xf32, #tpu.memory_space<vmem>>, vector<1x64x128xf32>
    %14 = vector.shape_cast %13 : vector<1x64x128xf32> to vector<64x128xf32>
    %cst_29 = arith.constant dense<0.000000e+00> : vector<32x128xf32>
    %15 = tpu.matmul %12, %14, %cst_29 {dimension_numbers = #tpu.dot_dimension_numbers<[1], [0], [0], [1], [0, 0, 1, 1], [], []>} : vector<32x64xf32>, vector<64x128xf32>, vector<32x128xf32> -> vector<32x128xf32>
    %c0_30 = arith.constant 0 : index
    %c1_31 = arith.constant 1 : index
    %c0_32 = arith.constant 0 : index
    %16 = vector.load %arg26[%c0_30, %c1_31, %c0_32] : memref<2x18x64xf32, #tpu.memory_space<vmem>>, vector<2x16x64xf32>
    %17 = vector.shape_cast %16 : vector<2x16x64xf32> to vector<32x64xf32>
    %c1_33 = arith.constant 1 : index
    %c0_34 = arith.constant 0 : index
    %c0_35 = arith.constant 0 : index
    %18 = vector.load %arg3[%c1_33, %c0_34, %c0_35] : memref<3x64x128xf32, #tpu.memory_space<vmem>>, vector<1x64x128xf32>
    %19 = vector.shape_cast %18 : vector<1x64x128xf32> to vector<64x128xf32>
    %cst_36 = arith.constant dense<0.000000e+00> : vector<32x128xf32>
    %20 = tpu.matmul %17, %19, %cst_36 {dimension_numbers = #tpu.dot_dimension_numbers<[1], [0], [0], [1], [0, 0, 1, 1], [], []>} : vector<32x64xf32>, vector<64x128xf32>, vector<32x128xf32> -> vector<32x128xf32>
    %21 = arith.addf %15, %20 : vector<32x128xf32>
    %c0_37 = arith.constant 0 : index
    %c2 = arith.constant 2 : index
    %c0_38 = arith.constant 0 : index
    %22 = vector.load %arg26[%c0_37, %c2, %c0_38] : memref<2x18x64xf32, #tpu.memory_space<vmem>>, vector<2x16x64xf32>
    %23 = vector.shape_cast %22 : vector<2x16x64xf32> to vector<32x64xf32>
    %c2_39 = arith.constant 2 : index
    %c0_40 = arith.constant 0 : index
    %c0_41 = arith.constant 0 : index
    %24 = vector.load %arg3[%c2_39, %c0_40, %c0_41] : memref<3x64x128xf32, #tpu.memory_space<vmem>>, vector<1x64x128xf32>
    %25 = vector.shape_cast %24 : vector<1x64x128xf32> to vector<64x128xf32>
    %cst_42 = arith.constant dense<0.000000e+00> : vector<32x128xf32>
    %26 = tpu.matmul %23, %25, %cst_42 {dimension_numbers = #tpu.dot_dimension_numbers<[1], [0], [0], [1], [0, 0, 1, 1], [], []>} : vector<32x64xf32>, vector<64x128xf32>, vector<32x128xf32> -> vector<32x128xf32>
    %27 = arith.addf %21, %26 : vector<32x128xf32>
    %c0_43 = arith.constant 0 : index
    %c0_44 = arith.constant 0 : index
    %28 = vector.load %arg4[%c0_43, %c0_44] : memref<1x128xf32, #tpu.memory_space<vmem>>, vector<1x128xf32>
    %29 = vector.broadcast %28 : vector<1x128xf32> to vector<32x128xf32>
    %30 = arith.addf %27, %29 : vector<32x128xf32>
    %cst_45 = arith.constant 0.000000e+00 : f32
    %31 = vector.broadcast %cst_45 : f32 to vector<32x128xf32>
    %32 = arith.maximumf %30, %31 : vector<32x128xf32>
    %33 = vector.shape_cast %32 : vector<32x128xf32> to vector<2x16x128xf32>
    %c0_46 = arith.constant 0 : index
    %c1_47 = arith.constant 1 : index
    %c0_48 = arith.constant 0 : index
    %34 = vector.load %arg27[%c0_46, %c1_47, %c0_48] : memref<2x18x128xf32, #tpu.memory_space<vmem>>, vector<2x16x128xf32>
    tpu.vector_store %arg27[%c0_46, %c1_47, %c0_48], %33 {strides = array<i32>} : memref<2x18x128xf32, #tpu.memory_space<vmem>>, vector<2x16x128xf32>,
    %c0_49 = arith.constant 0 : index
    %c0_50 = arith.constant 0 : index
    %c0_51 = arith.constant 0 : index
    %35 = vector.load %arg27[%c0_49, %c0_50, %c0_51] : memref<2x18x128xf32, #tpu.memory_space<vmem>>, vector<2x16x128xf32>
    %36 = vector.shape_cast %35 : vector<2x16x128xf32> to vector<32x128xf32>
    %c0_52 = arith.constant 0 : index
    %c0_53 = arith.constant 0 : index
    %c0_54 = arith.constant 0 : index
    %37 = vector.load %arg5[%c0_52, %c0_53, %c0_54] : memref<3x128x128xf32, #tpu.memory_space<vmem>>, vector<1x128x128xf32>
    %38 = vector.shape_cast %37 : vector<1x128x128xf32> to vector<128x128xf32>
    %cst_55 = arith.constant dense<0.000000e+00> : vector<32x128xf32>
    %39 = tpu.matmul %36, %38, %cst_55 {dimension_numbers = #tpu.dot_dimension_numbers<[1], [0], [0], [1], [0, 0, 1, 1], [], []>} : vector<32x128xf32>, vector<128x128xf32>, vector<32x128xf32> -> vector<32x128xf32>
    %c0_56 = arith.constant 0 : index
    %c1_57 = arith.constant 1 : index
    %c0_58 = arith.constant 0 : index
    %40 = vector.load %arg27[%c0_56, %c1_57, %c0_58] : memref<2x18x128xf32, #tpu.memory_space<vmem>>, vector<2x16x128xf32>
    %41 = vector.shape_cast %40 : vector<2x16x128xf32> to vector<32x128xf32>
    %c1_59 = arith.constant 1 : index
    %c0_60 = arith.constant 0 : index
    %c0_61 = arith.constant 0 : index
    %42 = vector.load %arg5[%c1_59, %c0_60, %c0_61] : memref<3x128x128xf32, #tpu.memory_space<vmem>>, vector<1x128x128xf32>
    %43 = vector.shape_cast %42 : vector<1x128x128xf32> to vector<128x128xf32>
    %cst_62 = arith.constant dense<0.000000e+00> : vector<32x128xf32>
    %44 = tpu.matmul %41, %43, %cst_62 {dimension_numbers = #tpu.dot_dimension_numbers<[1], [0], [0], [1], [0, 0, 1, 1], [], []>} : vector<32x128xf32>, vector<128x128xf32>, vector<32x128xf32> -> vector<32x128xf32>
    %45 = arith.addf %39, %44 : vector<32x128xf32>
    %c0_63 = arith.constant 0 : index
    %c2_64 = arith.constant 2 : index
    %c0_65 = arith.constant 0 : index
    %46 = vector.load %arg27[%c0_63, %c2_64, %c0_65] : memref<2x18x128xf32, #tpu.memory_space<vmem>>, vector<2x16x128xf32>
    %47 = vector.shape_cast %46 : vector<2x16x128xf32> to vector<32x128xf32>
    %c2_66 = arith.constant 2 : index
    %c0_67 = arith.constant 0 : index
    %c0_68 = arith.constant 0 : index
    %48 = vector.load %arg5[%c2_66, %c0_67, %c0_68] : memref<3x128x128xf32, #tpu.memory_space<vmem>>, vector<1x128x128xf32>
    %49 = vector.shape_cast %48 : vector<1x128x128xf32> to vector<128x128xf32>
    %cst_69 = arith.constant dense<0.000000e+00> : vector<32x128xf32>
    %50 = tpu.matmul %47, %49, %cst_69 {dimension_numbers = #tpu.dot_dimension_numbers<[1], [0], [0], [1], [0, 0, 1, 1], [], []>} : vector<32x128xf32>, vector<128x128xf32>, vector<32x128xf32> -> vector<32x128xf32>
    %51 = arith.addf %45, %50 : vector<32x128xf32>
    %c0_70 = arith.constant 0 : index
    %c0_71 = arith.constant 0 : index
    %52 = vector.load %arg6[%c0_70, %c0_71] : memref<1x128xf32, #tpu.memory_space<vmem>>, vector<1x128xf32>
    %53 = vector.broadcast %52 : vector<1x128xf32> to vector<32x128xf32>
    %54 = arith.addf %51, %53 : vector<32x128xf32>
    %cst_72 = arith.constant dense<0.000000e+00> : vector<128xf32>
    %55 = vector.multi_reduction <add>, %54, %cst_72 [0] : vector<32x128xf32> to vector<128xf32>
    %56 = vector.shape_cast %55 : vector<128xf32> to vector<1x128xf32>
    %c0_73 = arith.constant 0 : index
    %c0_74 = arith.constant 0 : index
    %57 = vector.load %arg11[%c0_73, %c0_74] : memref<128x8xf32, #tpu.memory_space<vmem>>, vector<128x8xf32>
    %cst_75 = arith.constant dense<0.000000e+00> : vector<1x8xf32>
    %58 = tpu.matmul %56, %57, %cst_75 {dimension_numbers = #tpu.dot_dimension_numbers<[1], [0], [0], [1], [0, 0, 1, 1], [], []>} : vector<1x128xf32>, vector<128x8xf32>, vector<1x8xf32> -> vector<1x8xf32>
    %cst_76 = arith.constant 0.001953125 : f32
    %59 = vector.broadcast %cst_76 : f32 to vector<1x8xf32>
    %60 = arith.mulf %58, %59 : vector<1x8xf32>
    %c0_77 = arith.constant 0 : index
    %c0_78 = arith.constant 0 : index
    %61 = vector.load %arg12[%c0_77, %c0_78] : memref<8x128xf32, #tpu.memory_space<vmem>>, vector<8x128xf32>
    %cst_79 = arith.constant dense<0.000000e+00> : vector<1x128xf32>
    %62 = tpu.matmul %60, %61, %cst_79 {dimension_numbers = #tpu.dot_dimension_numbers<[1], [0], [0], [1], [0, 0, 1, 1], [], []>} : vector<1x8xf32>, vector<8x128xf32>, vector<1x128xf32> -> vector<1x128xf32>
    %63 = vector.broadcast %62 : vector<1x128xf32> to vector<32x128xf32>
    %64 = arith.subf %54, %63 : vector<32x128xf32>
    %65 = arith.mulf %64, %64 : vector<32x128xf32>
    %cst_80 = arith.constant dense<0.000000e+00> : vector<128xf32>
    %66 = vector.multi_reduction <add>, %65, %cst_80 [0] : vector<32x128xf32> to vector<128xf32>
    %67 = vector.shape_cast %66 : vector<128xf32> to vector<1x128xf32>
    %c0_81 = arith.constant 0 : index
    %c0_82 = arith.constant 0 : index
    %68 = vector.load %arg11[%c0_81, %c0_82] : memref<128x8xf32, #tpu.memory_space<vmem>>, vector<128x8xf32>
    %cst_83 = arith.constant dense<0.000000e+00> : vector<1x8xf32>
    %69 = tpu.matmul %67, %68, %cst_83 {dimension_numbers = #tpu.dot_dimension_numbers<[1], [0], [0], [1], [0, 0, 1, 1], [], []>} : vector<1x128xf32>, vector<128x8xf32>, vector<1x8xf32> -> vector<1x8xf32>
    %cst_84 = arith.constant 0.001953125 : f32
    %70 = vector.broadcast %cst_84 : f32 to vector<1x8xf32>
    %71 = arith.mulf %69, %70 : vector<1x8xf32>
    %c0_85 = arith.constant 0 : index
    %c0_86 = arith.constant 0 : index
    %72 = vector.load %arg7[%c0_85, %c0_86] : memref<1x8xf32, #tpu.memory_space<vmem>>, vector<1x8xf32>
    %cst_87 = arith.constant 9.99999974E-6 : f32
    %73 = vector.broadcast %cst_87 : f32 to vector<1x8xf32>
    %74 = arith.addf %71, %73 : vector<1x8xf32>
    %75 = math.rsqrt %74 : vector<1x8xf32>
    %76 = arith.mulf %72, %75 : vector<1x8xf32>
    %c0_88 = arith.constant 0 : index
    %c0_89 = arith.constant 0 : index
    %77 = vector.load %arg12[%c0_88, %c0_89] : memref<8x128xf32, #tpu.memory_space<vmem>>, vector<8x128xf32>
    %cst_90 = arith.constant dense<0.000000e+00> : vector<1x128xf32>
    %78 = tpu.matmul %76, %77, %cst_90 {dimension_numbers = #tpu.dot_dimension_numbers<[1], [0], [0], [1], [0, 0, 1, 1], [], []>} : vector<1x8xf32>, vector<8x128xf32>, vector<1x128xf32> -> vector<1x128xf32>
    %c0_91 = arith.constant 0 : index
    %c0_92 = arith.constant 0 : index
    %79 = vector.load %arg8[%c0_91, %c0_92] : memref<1x8xf32, #tpu.memory_space<vmem>>, vector<1x8xf32>
    %c0_93 = arith.constant 0 : index
    %c0_94 = arith.constant 0 : index
    %80 = vector.load %arg12[%c0_93, %c0_94] : memref<8x128xf32, #tpu.memory_space<vmem>>, vector<8x128xf32>
    %cst_95 = arith.constant dense<0.000000e+00> : vector<1x128xf32>
    %81 = tpu.matmul %79, %80, %cst_95 {dimension_numbers = #tpu.dot_dimension_numbers<[1], [0], [0], [1], [0, 0, 1, 1], [], []>} : vector<1x8xf32>, vector<8x128xf32>, vector<1x128xf32> -> vector<1x128xf32>
    %82 = vector.broadcast %78 : vector<1x128xf32> to vector<32x128xf32>
    %83 = arith.mulf %64, %82 : vector<32x128xf32>
    %84 = vector.broadcast %81 : vector<1x128xf32> to vector<32x128xf32>
    %85 = arith.addf %83, %84 : vector<32x128xf32>
    %cst_96 = arith.constant 0.000000e+00 : f32
    %86 = vector.broadcast %cst_96 : f32 to vector<32x128xf32>
    %87 = arith.maximumf %85, %86 : vector<32x128xf32>
    %88 = vector.shape_cast %87 : vector<32x128xf32> to vector<2x16x128xf32>
    %c0_97 = arith.constant 0 : index
    %c1_98 = arith.constant 1 : index
    %c0_99 = arith.constant 0 : index
    %89 = vector.load %arg27[%c0_97, %c1_98, %c0_99] : memref<2x18x128xf32, #tpu.memory_space<vmem>>, vector<2x16x128xf32>
    tpu.vector_store %arg27[%c0_97, %c1_98, %c0_99], %88 {strides = array<i32>} : memref<2x18x128xf32, #tpu.memory_space<vmem>>, vector<2x16x128xf32>,
    %c0_100 = arith.constant 0 : index
    %c0_101 = arith.constant 0 : index
    %c0_102 = arith.constant 0 : index
    %90 = vector.load %arg27[%c0_100, %c0_101, %c0_102] : memref<2x18x128xf32, #tpu.memory_space<vmem>>, vector<2x16x128xf32>
    %91 = vector.shape_cast %90 : vector<2x16x128xf32> to vector<32x128xf32>
    %c0_103 = arith.constant 0 : index
    %c0_104 = arith.constant 0 : index
    %c0_105 = arith.constant 0 : index
    %92 = vector.load %arg9[%c0_103, %c0_104, %c0_105] : memref<3x128x128xf32, #tpu.memory_space<vmem>>, vector<1x128x128xf32>
    %93 = vector.shape_cast %92 : vector<1x128x128xf32> to vector<128x128xf32>
    %cst_106 = arith.constant dense<0.000000e+00> : vector<32x128xf32>
    %94 = tpu.matmul %91, %93, %cst_106 {dimension_numbers = #tpu.dot_dimension_numbers<[1], [0], [0], [1], [0, 0, 1, 1], [], []>} : vector<32x128xf32>, vector<128x128xf32>, vector<32x128xf32> -> vector<32x128xf32>
    %c0_107 = arith.constant 0 : index
    %c1_108 = arith.constant 1 : index
    %c0_109 = arith.constant 0 : index
    %95 = vector.load %arg27[%c0_107, %c1_108, %c0_109] : memref<2x18x128xf32, #tpu.memory_space<vmem>>, vector<2x16x128xf32>
    %96 = vector.shape_cast %95 : vector<2x16x128xf32> to vector<32x128xf32>
    %c1_110 = arith.constant 1 : index
    %c0_111 = arith.constant 0 : index
    %c0_112 = arith.constant 0 : index
    %97 = vector.load %arg9[%c1_110, %c0_111, %c0_112] : memref<3x128x128xf32, #tpu.memory_space<vmem>>, vector<1x128x128xf32>
    %98 = vector.shape_cast %97 : vector<1x128x128xf32> to vector<128x128xf32>
    %cst_113 = arith.constant dense<0.000000e+00> : vector<32x128xf32>
    %99 = tpu.matmul %96, %98, %cst_113 {dimension_numbers = #tpu.dot_dimension_numbers<[1], [0], [0], [1], [0, 0, 1, 1], [], []>} : vector<32x128xf32>, vector<128x128xf32>, vector<32x128xf32> -> vector<32x128xf32>
    %100 = arith.addf %94, %99 : vector<32x128xf32>
    %c0_114 = arith.constant 0 : index
    %c2_115 = arith.constant 2 : index
    %c0_116 = arith.constant 0 : index
    %101 = vector.load %arg27[%c0_114, %c2_115, %c0_116] : memref<2x18x128xf32, #tpu.memory_space<vmem>>, vector<2x16x128xf32>
    %102 = vector.shape_cast %101 : vector<2x16x128xf32> to vector<32x128xf32>
    %c2_117 = arith.constant 2 : index
    %c0_118 = arith.constant 0 : index
    %c0_119 = arith.constant 0 : index
    %103 = vector.load %arg9[%c2_117, %c0_118, %c0_119] : memref<3x128x128xf32, #tpu.memory_space<vmem>>, vector<1x128x128xf32>
    %104 = vector.shape_cast %103 : vector<1x128x128xf32> to vector<128x128xf32>
    %cst_120 = arith.constant dense<0.000000e+00> : vector<32x128xf32>
    %105 = tpu.matmul %102, %104, %cst_120 {dimension_numbers = #tpu.dot_dimension_numbers<[1], [0], [0], [1], [0, 0, 1, 1], [], []>} : vector<32x128xf32>, vector<128x128xf32>, vector<32x128xf32> -> vector<32x128xf32>
    %106 = arith.addf %100, %105 : vector<32x128xf32>
    %c0_121 = arith.constant 0 : index
    %c0_122 = arith.constant 0 : index
    %107 = vector.load %arg10[%c0_121, %c0_122] : memref<1x128xf32, #tpu.memory_space<vmem>>, vector<1x128xf32>
    %108 = vector.broadcast %107 : vector<1x128xf32> to vector<32x128xf32>
    %109 = arith.addf %106, %108 : vector<32x128xf32>
    %110 = arith.addf %30, %109 : vector<32x128xf32>
    %cst_123 = arith.constant 0.000000e+00 : f32
    %111 = vector.broadcast %cst_123 : f32 to vector<32x128xf32>
    %112 = arith.maximumf %110, %111 : vector<32x128xf32>
    %c0_124 = arith.constant 0 : index
    %c0_125 = arith.constant 0 : index
    %c0_126 = arith.constant 0 : index
    %113 = vector.load %arg2[%c0_124, %c0_125, %c0_126] : memref<2x16x128xf32, #tpu.memory_space<vmem>>, vector<2x16x128xf32>
    %114 = vector.shape_cast %113 : vector<2x16x128xf32> to vector<32x128xf32>
    %115 = arith.addf %112, %114 : vector<32x128xf32>
    %116 = vector.shape_cast %115 : vector<32x128xf32> to vector<2x16x128xf32>
    %c0_127 = arith.constant 0 : index
    %c1_128 = arith.constant 1 : index
    %c0_129 = arith.constant 0 : index
    %117 = vector.load %arg27[%c0_127, %c1_128, %c0_129] : memref<2x18x128xf32, #tpu.memory_space<vmem>>, vector<2x16x128xf32>
    tpu.vector_store %arg27[%c0_127, %c1_128, %c0_129], %116 {strides = array<i32>} : memref<2x18x128xf32, #tpu.memory_space<vmem>>, vector<2x16x128xf32>,
    %c0_130 = arith.constant 0 : index
    %c0_131 = arith.constant 0 : index
    %c0_132 = arith.constant 0 : index
    %118 = vector.load %arg27[%c0_130, %c0_131, %c0_132] : memref<2x18x128xf32, #tpu.memory_space<vmem>>, vector<2x16x128xf32>
    %119 = vector.shape_cast %118 : vector<2x16x128xf32> to vector<32x128xf32>
    %c0_133 = arith.constant 0 : index
    %c0_134 = arith.constant 0 : index
    %c0_135 = arith.constant 0 : index
    %120 = vector.load %arg13[%c0_133, %c0_134, %c0_135] : memref<3x128x128xf32, #tpu.memory_space<vmem>>, vector<1x128x128xf32>
    %121 = vector.shape_cast %120 : vector<1x128x128xf32> to vector<128x128xf32>
    %cst_136 = arith.constant dense<0.000000e+00> : vector<32x128xf32>
    %122 = tpu.matmul %119, %121, %cst_136 {dimension_numbers = #tpu.dot_dimension_numbers<[1], [0], [0], [1], [0, 0, 1, 1], [], []>} : vector<32x128xf32>, vector<128x128xf32>, vector<32x128xf32> -> vector<32x128xf32>
    %c0_137 = arith.constant 0 : index
    %c1_138 = arith.constant 1 : index
    %c0_139 = arith.constant 0 : index
    %123 = vector.load %arg27[%c0_137, %c1_138, %c0_139] : memref<2x18x128xf32, #tpu.memory_space<vmem>>, vector<2x16x128xf32>
    %124 = vector.shape_cast %123 : vector<2x16x128xf32> to vector<32x128xf32>
    %c1_140 = arith.constant 1 : index
    %c0_141 = arith.constant 0 : index
    %c0_142 = arith.constant 0 : index
    %125 = vector.load %arg13[%c1_140, %c0_141, %c0_142] : memref<3x128x128xf32, #tpu.memory_space<vmem>>, vector<1x128x128xf32>
    %126 = vector.shape_cast %125 : vector<1x128x128xf32> to vector<128x128xf32>
    %cst_143 = arith.constant dense<0.000000e+00> : vector<32x128xf32>
    %127 = tpu.matmul %124, %126, %cst_143 {dimension_numbers = #tpu.dot_dimension_numbers<[1], [0], [0], [1], [0, 0, 1, 1], [], []>} : vector<32x128xf32>, vector<128x128xf32>, vector<32x128xf32> -> vector<32x128xf32>
    %128 = arith.addf %122, %127 : vector<32x128xf32>
    %c0_144 = arith.constant 0 : index
    %c2_145 = arith.constant 2 : index
    %c0_146 = arith.constant 0 : index
    %129 = vector.load %arg27[%c0_144, %c2_145, %c0_146] : memref<2x18x128xf32, #tpu.memory_space<vmem>>, vector<2x16x128xf32>
    %130 = vector.shape_cast %129 : vector<2x16x128xf32> to vector<32x128xf32>
    %c2_147 = arith.constant 2 : index
    %c0_148 = arith.constant 0 : index
    %c0_149 = arith.constant 0 : index
    %131 = vector.load %arg13[%c2_147, %c0_148, %c0_149] : memref<3x128x128xf32, #tpu.memory_space<vmem>>, vector<1x128x128xf32>
    %132 = vector.shape_cast %131 : vector<1x128x128xf32> to vector<128x128xf32>
    %cst_150 = arith.constant dense<0.000000e+00> : vector<32x128xf32>
    %133 = tpu.matmul %130, %132, %cst_150 {dimension_numbers = #tpu.dot_dimension_numbers<[1], [0], [0], [1], [0, 0, 1, 1], [], []>} : vector<32x128xf32>, vector<128x128xf32>, vector<32x128xf32> -> vector<32x128xf32>
    %134 = arith.addf %128, %133 : vector<32x128xf32>
    %c0_151 = arith.constant 0 : index
    %c0_152 = arith.constant 0 : index
    %135 = vector.load %arg14[%c0_151, %c0_152] : memref<1x128xf32, #tpu.memory_space<vmem>>, vector<1x128xf32>
    %136 = vector.broadcast %135 : vector<1x128xf32> to vector<32x128xf32>
    %137 = arith.addf %134, %136 : vector<32x128xf32>
    %cst_153 = arith.constant 0.000000e+00 : f32
    %138 = vector.broadcast %cst_153 : f32 to vector<32x128xf32>
    %139 = arith.maximumf %137, %138 : vector<32x128xf32>
    %140 = vector.shape_cast %139 : vector<32x128xf32> to vector<2x16x128xf32>
    %c0_154 = arith.constant 0 : index
    %c1_155 = arith.constant 1 : index
    %c0_156 = arith.constant 0 : index
    %141 = vector.load %arg28[%c0_154, %c1_155, %c0_156] : memref<2x18x128xf32, #tpu.memory_space<vmem>>, vector<2x16x128xf32>
    tpu.vector_store %arg28[%c0_154, %c1_155, %c0_156], %140 {strides = array<i32>} : memref<2x18x128xf32, #tpu.memory_space<vmem>>, vector<2x16x128xf32>,
    %c0_157 = arith.constant 0 : index
    %c0_158 = arith.constant 0 : index
    %c0_159 = arith.constant 0 : index
    %142 = vector.load %arg28[%c0_157, %c0_158, %c0_159] : memref<2x18x128xf32, #tpu.memory_space<vmem>>, vector<2x16x128xf32>
    %143 = vector.shape_cast %142 : vector<2x16x128xf32> to vector<32x128xf32>
    %c0_160 = arith.constant 0 : index
    %c0_161 = arith.constant 0 : index
    %c0_162 = arith.constant 0 : index
    %144 = vector.load %arg15[%c0_160, %c0_161, %c0_162] : memref<3x128x128xf32, #tpu.memory_space<vmem>>, vector<1x128x128xf32>
    %145 = vector.shape_cast %144 : vector<1x128x128xf32> to vector<128x128xf32>
    %cst_163 = arith.constant dense<0.000000e+00> : vector<32x128xf32>
    %146 = tpu.matmul %143, %145, %cst_163 {dimension_numbers = #tpu.dot_dimension_numbers<[1], [0], [0], [1], [0, 0, 1, 1], [], []>} : vector<32x128xf32>, vector<128x128xf32>, vector<32x128xf32> -> vector<32x128xf32>
    %c0_164 = arith.constant 0 : index
    %c1_165 = arith.constant 1 : index
    %c0_166 = arith.constant 0 : index
    %147 = vector.load %arg28[%c0_164, %c1_165, %c0_166] : memref<2x18x128xf32, #tpu.memory_space<vmem>>, vector<2x16x128xf32>
    %148 = vector.shape_cast %147 : vector<2x16x128xf32> to vector<32x128xf32>
    %c1_167 = arith.constant 1 : index
    %c0_168 = arith.constant 0 : index
    %c0_169 = arith.constant 0 : index
    %149 = vector.load %arg15[%c1_167, %c0_168, %c0_169] : memref<3x128x128xf32, #tpu.memory_space<vmem>>, vector<1x128x128xf32>
    %150 = vector.shape_cast %149 : vector<1x128x128xf32> to vector<128x128xf32>
    %cst_170 = arith.constant dense<0.000000e+00> : vector<32x128xf32>
    %151 = tpu.matmul %148, %150, %cst_170 {dimension_numbers = #tpu.dot_dimension_numbers<[1], [0], [0], [1], [0, 0, 1, 1], [], []>} : vector<32x128xf32>, vector<128x128xf32>, vector<32x128xf32> -> vector<32x128xf32>
    %152 = arith.addf %146, %151 : vector<32x128xf32>
    %c0_171 = arith.constant 0 : index
    %c2_172 = arith.constant 2 : index
    %c0_173 = arith.constant 0 : index
    %153 = vector.load %arg28[%c0_171, %c2_172, %c0_173] : memref<2x18x128xf32, #tpu.memory_space<vmem>>, vector<2x16x128xf32>
    %154 = vector.shape_cast %153 : vector<2x16x128xf32> to vector<32x128xf32>
    %c2_174 = arith.constant 2 : index
    %c0_175 = arith.constant 0 : index
    %c0_176 = arith.constant 0 : index
    %155 = vector.load %arg15[%c2_174, %c0_175, %c0_176] : memref<3x128x128xf32, #tpu.memory_space<vmem>>, vector<1x128x128xf32>
    %156 = vector.shape_cast %155 : vector<1x128x128xf32> to vector<128x128xf32>
    %cst_177 = arith.constant dense<0.000000e+00> : vector<32x128xf32>
    %157 = tpu.matmul %154, %156, %cst_177 {dimension_numbers = #tpu.dot_dimension_numbers<[1], [0], [0], [1], [0, 0, 1, 1], [], []>} : vector<32x128xf32>, vector<128x128xf32>, vector<32x128xf32> -> vector<32x128xf32>
    %158 = arith.addf %152, %157 : vector<32x128xf32>
    %c0_178 = arith.constant 0 : index
    %c0_179 = arith.constant 0 : index
    %159 = vector.load %arg16[%c0_178, %c0_179] : memref<1x128xf32, #tpu.memory_space<vmem>>, vector<1x128xf32>
    %160 = vector.broadcast %159 : vector<1x128xf32> to vector<32x128xf32>
    %161 = arith.addf %158, %160 : vector<32x128xf32>
    %cst_180 = arith.constant dense<0.000000e+00> : vector<128xf32>
    %162 = vector.multi_reduction <add>, %161, %cst_180 [0] : vector<32x128xf32> to vector<128xf32>
    %163 = vector.shape_cast %162 : vector<128xf32> to vector<1x128xf32>
    %c0_181 = arith.constant 0 : index
    %c0_182 = arith.constant 0 : index
    %164 = vector.load %arg21[%c0_181, %c0_182] : memref<128x8xf32, #tpu.memory_space<vmem>>, vector<128x8xf32>
    %cst_183 = arith.constant dense<0.000000e+00> : vector<1x8xf32>
    %165 = tpu.matmul %163, %164, %cst_183 {dimension_numbers = #tpu.dot_dimension_numbers<[1], [0], [0], [1], [0, 0, 1, 1], [], []>} : vector<1x128xf32>, vector<128x8xf32>, vector<1x8xf32> -> vector<1x8xf32>
    %cst_184 = arith.constant 0.001953125 : f32
    %166 = vector.broadcast %cst_184 : f32 to vector<1x8xf32>
    %167 = arith.mulf %165, %166 : vector<1x8xf32>
    %c0_185 = arith.constant 0 : index
    %c0_186 = arith.constant 0 : index
    %168 = vector.load %arg22[%c0_185, %c0_186] : memref<8x128xf32, #tpu.memory_space<vmem>>, vector<8x128xf32>
    %cst_187 = arith.constant dense<0.000000e+00> : vector<1x128xf32>
    %169 = tpu.matmul %167, %168, %cst_187 {dimension_numbers = #tpu.dot_dimension_numbers<[1], [0], [0], [1], [0, 0, 1, 1], [], []>} : vector<1x8xf32>, vector<8x128xf32>, vector<1x128xf32> -> vector<1x128xf32>
    %170 = vector.broadcast %169 : vector<1x128xf32> to vector<32x128xf32>
    %171 = arith.subf %161, %170 : vector<32x128xf32>
    %172 = arith.mulf %171, %171 : vector<32x128xf32>
    %cst_188 = arith.constant dense<0.000000e+00> : vector<128xf32>
    %173 = vector.multi_reduction <add>, %172, %cst_188 [0] : vector<32x128xf32> to vector<128xf32>
    %174 = vector.shape_cast %173 : vector<128xf32> to vector<1x128xf32>
    %c0_189 = arith.constant 0 : index
    %c0_190 = arith.constant 0 : index
    %175 = vector.load %arg21[%c0_189, %c0_190] : memref<128x8xf32, #tpu.memory_space<vmem>>, vector<128x8xf32>
    %cst_191 = arith.constant dense<0.000000e+00> : vector<1x8xf32>
    %176 = tpu.matmul %174, %175, %cst_191 {dimension_numbers = #tpu.dot_dimension_numbers<[1], [0], [0], [1], [0, 0, 1, 1], [], []>} : vector<1x128xf32>, vector<128x8xf32>, vector<1x8xf32> -> vector<1x8xf32>
    %cst_192 = arith.constant 0.001953125 : f32
    %177 = vector.broadcast %cst_192 : f32 to vector<1x8xf32>
    %178 = arith.mulf %176, %177 : vector<1x8xf32>
    %c0_193 = arith.constant 0 : index
    %c0_194 = arith.constant 0 : index
    %179 = vector.load %arg17[%c0_193, %c0_194] : memref<1x8xf32, #tpu.memory_space<vmem>>, vector<1x8xf32>
    %cst_195 = arith.constant 9.99999974E-6 : f32
    %180 = vector.broadcast %cst_195 : f32 to vector<1x8xf32>
    %181 = arith.addf %178, %180 : vector<1x8xf32>
    %182 = math.rsqrt %181 : vector<1x8xf32>
    %183 = arith.mulf %179, %182 : vector<1x8xf32>
    %c0_196 = arith.constant 0 : index
    %c0_197 = arith.constant 0 : index
    %184 = vector.load %arg22[%c0_196, %c0_197] : memref<8x128xf32, #tpu.memory_space<vmem>>, vector<8x128xf32>
    %cst_198 = arith.constant dense<0.000000e+00> : vector<1x128xf32>
    %185 = tpu.matmul %183, %184, %cst_198 {dimension_numbers = #tpu.dot_dimension_numbers<[1], [0], [0], [1], [0, 0, 1, 1], [], []>} : vector<1x8xf32>, vector<8x128xf32>, vector<1x128xf32> -> vector<1x128xf32>
    %c0_199 = arith.constant 0 : index
    %c0_200 = arith.constant 0 : index
    %186 = vector.load %arg18[%c0_199, %c0_200] : memref<1x8xf32, #tpu.memory_space<vmem>>, vector<1x8xf32>
    %c0_201 = arith.constant 0 : index
    %c0_202 = arith.constant 0 : index
    %187 = vector.load %arg22[%c0_201, %c0_202] : memref<8x128xf32, #tpu.memory_space<vmem>>, vector<8x128xf32>
    %cst_203 = arith.constant dense<0.000000e+00> : vector<1x128xf32>
    %188 = tpu.matmul %186, %187, %cst_203 {dimension_numbers = #tpu.dot_dimension_numbers<[1], [0], [0], [1], [0, 0, 1, 1], [], []>} : vector<1x8xf32>, vector<8x128xf32>, vector<1x128xf32> -> vector<1x128xf32>
    %189 = vector.broadcast %185 : vector<1x128xf32> to vector<32x128xf32>
    %190 = arith.mulf %171, %189 : vector<32x128xf32>
    %191 = vector.broadcast %188 : vector<1x128xf32> to vector<32x128xf32>
    %192 = arith.addf %190, %191 : vector<32x128xf32>
    %cst_204 = arith.constant 0.000000e+00 : f32
    %193 = vector.broadcast %cst_204 : f32 to vector<32x128xf32>
    %194 = arith.maximumf %192, %193 : vector<32x128xf32>
    %195 = vector.shape_cast %194 : vector<32x128xf32> to vector<2x16x128xf32>
    %c0_205 = arith.constant 0 : index
    %c1_206 = arith.constant 1 : index
    %c0_207 = arith.constant 0 : index
    %196 = vector.load %arg28[%c0_205, %c1_206, %c0_207] : memref<2x18x128xf32, #tpu.memory_space<vmem>>, vector<2x16x128xf32>
    tpu.vector_store %arg28[%c0_205, %c1_206, %c0_207], %195 {strides = array<i32>} : memref<2x18x128xf32, #tpu.memory_space<vmem>>, vector<2x16x128xf32>,
    %c0_208 = arith.constant 0 : index
    %c0_209 = arith.constant 0 : index
    %c0_210 = arith.constant 0 : index
    %197 = vector.load %arg28[%c0_208, %c0_209, %c0_210] : memref<2x18x128xf32, #tpu.memory_space<vmem>>, vector<2x16x128xf32>
    %198 = vector.shape_cast %197 : vector<2x16x128xf32> to vector<32x128xf32>
    %c0_211 = arith.constant 0 : index
    %c0_212 = arith.constant 0 : index
    %c0_213 = arith.constant 0 : index
    %199 = vector.load %arg19[%c0_211, %c0_212, %c0_213] : memref<3x128x128xf32, #tpu.memory_space<vmem>>, vector<1x128x128xf32>
    %200 = vector.shape_cast %199 : vector<1x128x128xf32> to vector<128x128xf32>
    %cst_214 = arith.constant dense<0.000000e+00> : vector<32x128xf32>
    %201 = tpu.matmul %198, %200, %cst_214 {dimension_numbers = #tpu.dot_dimension_numbers<[1], [0], [0], [1], [0, 0, 1, 1], [], []>} : vector<32x128xf32>, vector<128x128xf32>, vector<32x128xf32> -> vector<32x128xf32>
    %c0_215 = arith.constant 0 : index
    %c1_216 = arith.constant 1 : index
    %c0_217 = arith.constant 0 : index
    %202 = vector.load %arg28[%c0_215, %c1_216, %c0_217] : memref<2x18x128xf32, #tpu.memory_space<vmem>>, vector<2x16x128xf32>
    %203 = vector.shape_cast %202 : vector<2x16x128xf32> to vector<32x128xf32>
    %c1_218 = arith.constant 1 : index
    %c0_219 = arith.constant 0 : index
    %c0_220 = arith.constant 0 : index
    %204 = vector.load %arg19[%c1_218, %c0_219, %c0_220] : memref<3x128x128xf32, #tpu.memory_space<vmem>>, vector<1x128x128xf32>
    %205 = vector.shape_cast %204 : vector<1x128x128xf32> to vector<128x128xf32>
    %cst_221 = arith.constant dense<0.000000e+00> : vector<32x128xf32>
    %206 = tpu.matmul %203, %205, %cst_221 {dimension_numbers = #tpu.dot_dimension_numbers<[1], [0], [0], [1], [0, 0, 1, 1], [], []>} : vector<32x128xf32>, vector<128x128xf32>, vector<32x128xf32> -> vector<32x128xf32>
    %207 = arith.addf %201, %206 : vector<32x128xf32>
    %c0_222 = arith.constant 0 : index
    %c2_223 = arith.constant 2 : index
    %c0_224 = arith.constant 0 : index
    %208 = vector.load %arg28[%c0_222, %c2_223, %c0_224] : memref<2x18x128xf32, #tpu.memory_space<vmem>>, vector<2x16x128xf32>
    %209 = vector.shape_cast %208 : vector<2x16x128xf32> to vector<32x128xf32>
    %c2_225 = arith.constant 2 : index
    %c0_226 = arith.constant 0 : index
    %c0_227 = arith.constant 0 : index
    %210 = vector.load %arg19[%c2_225, %c0_226, %c0_227] : memref<3x128x128xf32, #tpu.memory_space<vmem>>, vector<1x128x128xf32>
    %211 = vector.shape_cast %210 : vector<1x128x128xf32> to vector<128x128xf32>
    %cst_228 = arith.constant dense<0.000000e+00> : vector<32x128xf32>
    %212 = tpu.matmul %209, %211, %cst_228 {dimension_numbers = #tpu.dot_dimension_numbers<[1], [0], [0], [1], [0, 0, 1, 1], [], []>} : vector<32x128xf32>, vector<128x128xf32>, vector<32x128xf32> -> vector<32x128xf32>
    %213 = arith.addf %207, %212 : vector<32x128xf32>
    %c0_229 = arith.constant 0 : index
    %c0_230 = arith.constant 0 : index
    %214 = vector.load %arg20[%c0_229, %c0_230] : memref<1x128xf32, #tpu.memory_space<vmem>>, vector<1x128xf32>
    %215 = vector.broadcast %214 : vector<1x128xf32> to vector<32x128xf32>
    %216 = arith.addf %213, %215 : vector<32x128xf32>
    %217 = arith.addf %137, %216 : vector<32x128xf32>
    %cst_231 = arith.constant 0.000000e+00 : f32
    %218 = vector.broadcast %cst_231 : f32 to vector<32x128xf32>
    %219 = arith.maximumf %217, %218 : vector<32x128xf32>
    %c0_232 = arith.constant 0 : index
    %c0_233 = arith.constant 0 : index
    %220 = vector.load %arg23[%c0_232, %c0_233] : memref<32x16xf32, #tpu.memory_space<vmem>>, vector<32x16xf32>
    %c0_234 = arith.constant 0 : index
    %c0_235 = arith.constant 0 : index
    %221 = vector.load %arg24[%c0_234, %c0_235] : memref<128x256xf32, #tpu.memory_space<vmem>>, vector<128x256xf32>
    %222 = vector.extract_strided_slice %219 {offsets = [0, 0], sizes = [16, 128], strides = [1, 1]} : vector<32x128xf32> to vector<16x128xf32>
    %cst_236 = arith.constant dense<0.000000e+00> : vector<32x128xf32>
    %223 = tpu.matmul %220, %222, %cst_236 {dimension_numbers = #tpu.dot_dimension_numbers<[1], [0], [0], [1], [0, 0, 1, 1], [], []>} : vector<32x16xf32>, vector<16x128xf32>, vector<32x128xf32> -> vector<32x128xf32>
    %cst_237 = arith.constant dense<0.000000e+00> : vector<32x256xf32>
    %224 = tpu.matmul %223, %221, %cst_237 {dimension_numbers = #tpu.dot_dimension_numbers<[1], [0], [0], [1], [0, 0, 1, 1], [], []>} : vector<32x128xf32>, vector<128x256xf32>, vector<32x256xf32> -> vector<32x256xf32>
    %c0_238 = arith.constant 0 : index
    %c0_239 = arith.constant 0 : index
    %225 = vector.load %arg25[%c0_238, %c0_239] : memref<64x256xf32, #tpu.memory_space<vmem>>, vector<32x256xf32>
    tpu.vector_store %arg25[%c0_238, %c0_239], %224 {strides = array<i32>} : memref<64x256xf32, #tpu.memory_space<vmem>>, vector<32x256xf32>,
    %226 = vector.extract_strided_slice %219 {offsets = [16, 0], sizes = [16, 128], strides = [1, 1]} : vector<32x128xf32> to vector<16x128xf32>
    %cst_240 = arith.constant dense<0.000000e+00> : vector<32x128xf32>
    %227 = tpu.matmul %220, %226, %cst_240 {dimension_numbers = #tpu.dot_dimension_numbers<[1], [0], [0], [1], [0, 0, 1, 1], [], []>} : vector<32x16xf32>, vector<16x128xf32>, vector<32x128xf32> -> vector<32x128xf32>
    %cst_241 = arith.constant dense<0.000000e+00> : vector<32x256xf32>
    %228 = tpu.matmul %227, %221, %cst_241 {dimension_numbers = #tpu.dot_dimension_numbers<[1], [0], [0], [1], [0, 0, 1, 1], [], []>} : vector<32x128xf32>, vector<128x256xf32>, vector<32x256xf32> -> vector<32x256xf32>
    %c32 = arith.constant 32 : index
    %c0_242 = arith.constant 0 : index
    %229 = vector.load %arg25[%c32, %c0_242] : memref<64x256xf32, #tpu.memory_space<vmem>>, vector<32x256xf32>
    tpu.vector_store %arg25[%c32, %c0_242], %228 {strides = array<i32>} : memref<64x256xf32, #tpu.memory_space<vmem>>, vector<32x256xf32>,
    return
  }
  func.func @transform_0(%arg0: i32) -> (i32, i32, i32) {
    %c0_i32 = arith.constant 0 : i32
    %c0_i32_0 = arith.constant 0 : i32
    %c0_i32_1 = arith.constant 0 : i32
    %c0_i32_2 = arith.constant 0 : i32
    return %c0_i32, %c0_i32_0, %c0_i32_1 : i32, i32, i32
  }
  func.func @transform_1(%arg0: i32) -> (i32, i32, i32) {
    %c0_i32 = arith.constant 0 : i32
    %c0_i32_0 = arith.constant 0 : i32
    %c0_i32_1 = arith.constant 0 : i32
    %c0_i32_2 = arith.constant 0 : i32
    return %c0_i32, %c0_i32_0, %c0_i32_1 : i32, i32, i32
  }
  func.func @transform_2(%arg0: i32) -> (i32, i32, i32) {
    %c0_i32 = arith.constant 0 : i32
    %c0_i32_0 = arith.constant 0 : i32
    %c0_i32_1 = arith.constant 0 : i32
    %c0_i32_2 = arith.constant 0 : i32
    return %c0_i32, %c0_i32_0, %c0_i32_1 : i32, i32, i32
  }
  func.func @transform_3(%arg0: i32) -> (i32, i32) {
    %c0_i32 = arith.constant 0 : i32
    %c0_i32_0 = arith.constant 0 : i32
    %c0_i32_1 = arith.constant 0 : i32
    return %c0_i32, %c0_i32_0 : i32, i32
  }
  func.func @transform_4(%arg0: i32) -> (i32, i32, i32) {
    %c0_i32 = arith.constant 0 : i32
    %c0_i32_0 = arith.constant 0 : i32
    %c0_i32_1 = arith.constant 0 : i32
    %c0_i32_2 = arith.constant 0 : i32
    return %c0_i32, %c0_i32_0, %c0_i32_1 : i32, i32, i32
  }
  func.func @transform_5(%arg0: i32) -> (i32, i32) {
    %c0_i32 = arith.constant 0 : i32
    %c0_i32_0 = arith.constant 0 : i32
    %c0_i32_1 = arith.constant 0 : i32
    return %c0_i32, %c0_i32_0 : i32, i32
  }
  func.func @transform_6(%arg0: i32) -> (i32, i32) {
    %c0_i32 = arith.constant 0 : i32
    %c0_i32_0 = arith.constant 0 : i32
    %c0_i32_1 = arith.constant 0 : i32
    return %c0_i32, %c0_i32_0 : i32, i32
  }
  func.func @transform_7(%arg0: i32) -> (i32, i32) {
    %c0_i32 = arith.constant 0 : i32
    %c0_i32_0 = arith.constant 0 : i32
    %c0_i32_1 = arith.constant 0 : i32
    return %c0_i32, %c0_i32_0 : i32, i32
  }
  func.func @transform_8(%arg0: i32) -> (i32, i32, i32) {
    %c0_i32 = arith.constant 0 : i32
    %c0_i32_0 = arith.constant 0 : i32
    %c0_i32_1 = arith.constant 0 : i32
    %c0_i32_2 = arith.constant 0 : i32
    return %c0_i32, %c0_i32_0, %c0_i32_1 : i32, i32, i32
  }
  func.func @transform_9(%arg0: i32) -> (i32, i32) {
    %c0_i32 = arith.constant 0 : i32
    %c0_i32_0 = arith.constant 0 : i32
    %c0_i32_1 = arith.constant 0 : i32
    return %c0_i32, %c0_i32_0 : i32, i32
  }
  func.func @transform_10(%arg0: i32) -> (i32, i32) {
    %c0_i32 = arith.constant 0 : i32
    %c0_i32_0 = arith.constant 0 : i32
    %c0_i32_1 = arith.constant 0 : i32
    return %c0_i32, %c0_i32_0 : i32, i32
  }
  func.func @transform_11(%arg0: i32) -> (i32, i32) {
    %c0_i32 = arith.constant 0 : i32
    %c0_i32_0 = arith.constant 0 : i32
    %c0_i32_1 = arith.constant 0 : i32
    return %c0_i32, %c0_i32_0 : i32, i32
  }
  func.func @transform_12(%arg0: i32) -> (i32, i32, i32) {
    %c0_i32 = arith.constant 0 : i32
    %c0_i32_0 = arith.constant 0 : i32
    %c0_i32_1 = arith.constant 0 : i32
    %c0_i32_2 = arith.constant 0 : i32
    return %c0_i32, %c0_i32_0, %c0_i32_1 : i32, i32, i32
  }
  func.func @transform_13(%arg0: i32) -> (i32, i32) {
    %c0_i32 = arith.constant 0 : i32
    %c0_i32_0 = arith.constant 0 : i32
    %c0_i32_1 = arith.constant 0 : i32
    return %c0_i32, %c0_i32_0 : i32, i32
  }
  func.func @transform_14(%arg0: i32) -> (i32, i32, i32) {
    %c0_i32 = arith.constant 0 : i32
    %c0_i32_0 = arith.constant 0 : i32
    %c0_i32_1 = arith.constant 0 : i32
    %c0_i32_2 = arith.constant 0 : i32
    return %c0_i32, %c0_i32_0, %c0_i32_1 : i32, i32, i32
  }
  func.func @transform_15(%arg0: i32) -> (i32, i32) {
    %c0_i32 = arith.constant 0 : i32
    %c0_i32_0 = arith.constant 0 : i32
    %c0_i32_1 = arith.constant 0 : i32
    return %c0_i32, %c0_i32_0 : i32, i32
  }
  func.func @transform_16(%arg0: i32) -> (i32, i32) {
    %c0_i32 = arith.constant 0 : i32
    %c0_i32_0 = arith.constant 0 : i32
    %c0_i32_1 = arith.constant 0 : i32
    return %c0_i32, %c0_i32_0 : i32, i32
  }
  func.func @transform_17(%arg0: i32) -> (i32, i32) {
    %c0_i32 = arith.constant 0 : i32
    %c0_i32_0 = arith.constant 0 : i32
    %c0_i32_1 = arith.constant 0 : i32
    return %c0_i32, %c0_i32_0 : i32, i32
  }
  func.func @transform_18(%arg0: i32) -> (i32, i32, i32) {
    %c0_i32 = arith.constant 0 : i32
    %c0_i32_0 = arith.constant 0 : i32
    %c0_i32_1 = arith.constant 0 : i32
    %c0_i32_2 = arith.constant 0 : i32
    return %c0_i32, %c0_i32_0, %c0_i32_1 : i32, i32, i32
  }
  func.func @transform_19(%arg0: i32) -> (i32, i32) {
    %c0_i32 = arith.constant 0 : i32
    %c0_i32_0 = arith.constant 0 : i32
    %c0_i32_1 = arith.constant 0 : i32
    return %c0_i32, %c0_i32_0 : i32, i32
  }
  func.func @transform_20(%arg0: i32) -> (i32, i32) {
    %c0_i32 = arith.constant 0 : i32
    %c0_i32_0 = arith.constant 0 : i32
    %c0_i32_1 = arith.constant 0 : i32
    return %c0_i32, %c0_i32_0 : i32, i32
  }
  func.func @transform_21(%arg0: i32) -> (i32, i32) {
    %c0_i32 = arith.constant 0 : i32
    %c0_i32_0 = arith.constant 0 : i32
    %c0_i32_1 = arith.constant 0 : i32
    return %c0_i32, %c0_i32_0 : i32, i32
  }
  func.func @transform_22(%arg0: i32) -> (i32, i32) {
    %c0_i32 = arith.constant 0 : i32
    %c0_i32_0 = arith.constant 0 : i32
    %c0_i32_1 = arith.constant 0 : i32
    return %c0_i32, %c0_i32_0 : i32, i32
  }
  func.func @transform_23(%arg0: i32) -> (i32, i32) {
    %c0_i32 = arith.constant 0 : i32
    %c0_i32_0 = arith.constant 0 : i32
    %c0_i32_1 = arith.constant 0 : i32
    return %c0_i32, %c0_i32_0 : i32, i32
  }
  func.func @transform_24(%arg0: i32) -> (i32, i32) {
    %c0_i32 = arith.constant 0 : i32
    %c0_i32_0 = arith.constant 0 : i32
    %c0_i32_1 = arith.constant 0 : i32
    return %c0_i32, %c0_i32_0 : i32, i32
  }
}

</mosaic_0001>

<bundles_post_ra>
// kernel: tpu_custom_call.1
= control target key start
LH: loop header
LB: loop body
LE: loop exit
PB: predicated region body
PF: predicated region fallthrough
CT: control target
= control target key end

     0   :  { %s5726_s0 = inlined_call_operand.vmem [shape: f32[2,16,64], index: 0, kind: input, shape index: {}]   ;;  %s5727_s1 = inlined_call_operand.vmem [shape: f32[2,16,128], index: 1, kind: input, shape index: {}]   ;;  %s5728_s2 = inlined_call_operand.hbm [shape: f32[3,64,128], index: 2, kind: input, shape index: {}]   ;;  %s5729_s3 = inlined_call_operand.vmem [shape: f32[1,128], index: 3, kind: input, shape index: {}]   ;;  %s5730_s4 = inlined_call_operand.hbm [shape: f32[3,128,128], index: 4, kind: input, shape index: {}]   ;;  %s5731_s5 = inlined_call_operand.vmem [shape: f32[1,128], index: 5, kind: input, shape index: {}]   ;;  %s5732_s6 = inlined_call_operand.vmem [shape: f32[1,8], index: 6, kind: input, shape index: {}]   ;;  %s5733_s7 = inlined_call_operand.vmem [shape: f32[1,8], index: 7, kind: input, shape index: {}]   ;;  %s5734_s8 = inlined_call_operand.hbm [shape: f32[3,128,128], index: 8, kind: input, shape index: {}]   ;;  %s5735_s9 = inlined_call_operand.vmem [shape: f32[1,128], index: 9, kind: input, shape index: {}]   ;;  %s5736_s10 = inlined_call_operand.vmem [shape: f32[128,8], index: 10, kind: input, shape index: {}]   ;;  %s5737_s11 = inlined_call_operand.vmem [shape: f32[8,128], index: 11, kind: input, shape index: {}]   ;;  %s5738_s12 = inlined_call_operand.hbm [shape: f32[3,128,128], index: 12, kind: input, shape index: {}]   ;;  %s5739_s13 = inlined_call_operand.vmem [shape: f32[1,128], index: 13, kind: input, shape index: {}]   ;;  %s5740_s14 = inlined_call_operand.hbm [shape: f32[3,128,128], index: 14, kind: input, shape index: {}]   ;;  %s5741_s15 = inlined_call_operand.vmem [shape: f32[1,128], index: 15, kind: input, shape index: {}]   ;;  %s5742_s16 = inlined_call_operand.vmem [shape: f32[1,8], index: 16, kind: input, shape index: {}]   ;;  %s5743_s17 = inlined_call_operand.vmem [shape: f32[1,8], index: 17, kind: input, shape index: {}]   ;;  %s5744_s18 = inlined_call_operand.hbm [shape: f32[3,128,128], index: 18, kind: input, shape index: {}]   ;;  %s5745_s19 = inlined_call_operand.vmem [shape: f32[1,128], index: 19, kind: input, shape index: {}]   ;;  %s5746_s20 = inlined_call_operand.vmem [shape: f32[128,8], index: 20, kind: input, shape index: {}]   ;;  %s5747_s21 = inlined_call_operand.vmem [shape: f32[8,128], index: 21, kind: input, shape index: {}]   ;;  %s5748_s22 = inlined_call_operand.vmem [shape: f32[32,16], index: 22, kind: input, shape index: {}]   ;;  %s5749_s23 = inlined_call_operand.vmem [shape: f32[128,256], index: 23, kind: input, shape index: {}]   ;;  %s5750_s24 = inlined_call_operand.hbm [shape: f32[64,256], index: 24, kind: output, shape index: {}]  }
   0x1   :  { %5753 = sst [smem:[#allocation22_spill]] %s5726_s0 }
   0x2   :  { %5754 = sst [smem:[#allocation23_spill]] %s5727_s1 }
   0x3   :  { %5755 = sst [smem:[#allocation24_spill]] %s5728_s2 }
   0x4   :  { %5756 = sst [smem:[#allocation25_spill]] %s5729_s3 }
   0x5   :  { %5757 = sst [smem:[#allocation26_spill]] %s5730_s4 }
   0x6   :  { %5758 = sst [smem:[#allocation27_spill]] %s5731_s5 }
   0x7   :  { %5759 = sst [smem:[#allocation28_spill]] %s5732_s6 }
   0x8   :  { %5760 = sst [smem:[#allocation29_spill]] %s5733_s7 }
   0x9   :  { %5761 = sst [smem:[#allocation30_spill]] %s5734_s8 }
   0xa   :  { %29 = vsyncpa [#allocation6], 0 }
   0xb   :  { %30 = vsyncpa [#allocation9], 0 }
   0xc   :  { %31 = vsyncpa [#allocation12], 0 }
   0xd   :  { %32 = vsyncpa [#allocation15], 0 }
   0xe   :  { %33 = vsyncpa [#allocation7], 0  ;;  %s4991_s5 = smov [#allocation8]   ;;  %s4992_s27 = smov [#allocation11]  }
   0xf   :  { %s57_s26 = sshll.u32 %s4991_s5, 4  ;;  %s93_s28 = sshll.u32 %s4992_s27, 4  ;;  %s58_s26 = int_to_ptr.vmem [resolvable:$true] %s57_s26  ;;  %s94_s28 = int_to_ptr.vmem [resolvable:$true] %s93_s28 }
  0x10   :  { %s4849_s6 = scalar_lea.vmem %s58_s26, 6144  ;;  %p4854_p1 = scmp.lt.s32.totalorder %s58_s26, %s58_s26 }
  0x11   :  { %p4850_p0 = scmp.ne.s32.totalorder %s58_s26, %s4849_s6  ;;  %p4855_p2 = scmp.lt.s32.totalorder %s4849_s6, %s4849_s6 }
  0x13   :  { %p4856_p3 = por %p4855_p2, %p4854_p1 }
  0x15   :  { %p4857_p4 = pnand %p4856_p3, %p4850_p0 }
  0x17   :  { %4860 = shalt.err (!%p4857_p4)
}
  0x18   :  { %s4993_s2 = smov 128   ;;  %s4994_s29 = smov 8  }
  0x19   :  { %s5762_s30 = sld [smem:[#allocation26_spill]]  ;;  %s4869_s3 = scalar_lea.vmem %s94_s28, 6144 }
  0x1a   :  { %p4870_p5 = scmp.ne.s32.totalorder %s94_s28, %s4869_s3  ;;  %p4874_p6 = scmp.lt.s32.totalorder %s94_s28, %s94_s28 }
  0x1b   :  { %p4875_p7 = scmp.lt.s32.totalorder %s4869_s3, %s4869_s3 }
  0x1d   :  { %p4876_p8 = por %p4875_p7, %p4874_p6 }
  0x1f   :  { %63 = dma.hbm_to_vmem [thread:$0]  %s5762_s30, 6144, %s58_s26, [#allocation9], %s4993_s2, %s4993_s2, %s4994_s29  }
  0x20   :  { %p4877_p9 = pnand %p4876_p8, %p4870_p5 }
  0x22   :  { %4880 = shalt.err (!%p4877_p9)
}
  0x23   :  { %99 = dma.hbm_to_vmem [thread:$0]  %s5738_s12, 6144, %s94_s28, [#allocation12], %s4993_s2, %s4993_s2, %s4994_s29  }
  0x24   :  { %s4995_s4 = smov [#allocation5]   ;;  %s4996_s5 = smov [#allocation10]  }
  0x25   :  { %s43_s1 = sshll.u32 %s4995_s4, 4  ;;  %s75_s27 = sshll.u32 %s4996_s5, 4  ;;  %s44_s1 = int_to_ptr.vmem [resolvable:$true] %s43_s1  ;;  %s76_s27 = int_to_ptr.vmem [resolvable:$true] %s75_s27 }
  0x26   :  { %s4889_s26 = scalar_lea.vmem %s44_s1, 3072  ;;  %p4894_p11 = scmp.lt.s32.totalorder %s44_s1, %s44_s1 }
  0x27   :  { %p4890_p10 = scmp.ne.s32.totalorder %s44_s1, %s4889_s26  ;;  %p4895_p12 = scmp.lt.s32.totalorder %s4889_s26, %s4889_s26 }
  0x29   :  { %p4896_p13 = por %p4895_p12, %p4894_p11 }
  0x2b   :  { %p4897_p0 = pnand %p4896_p13, %p4890_p10 }
  0x2d   :  { %4900 = shalt.err (!%p4897_p0)
}
  0x2e   :  { %s5763_s7 = sld [smem:[#allocation24_spill]]  ;;  %s4909_s12 = scalar_lea.vmem %s76_s27, 6144 }
  0x2f   :  { %p4910_p1 = scmp.ne.s32.totalorder %s76_s27, %s4909_s12  ;;  %p4914_p2 = scmp.lt.s32.totalorder %s76_s27, %s76_s27 }
  0x30   :  { %p4915_p3 = scmp.lt.s32.totalorder %s4909_s12, %s4909_s12 }
  0x32   :  { %p4916_p4 = por %p4915_p3, %p4914_p2 }
  0x34   :  { %49 = dma.hbm_to_vmem [thread:$0]  %s5763_s7, 3072, %s44_s1, [#allocation6], %s4993_s2, %s4993_s2, %s4994_s29  }
  0x35   :  { %p4917_p5 = pnand %p4916_p4, %p4910_p1 }
  0x37   :  { %4920 = shalt.err (!%p4917_p5)
}
  0x38   :  { %s5764_s3 = sld [smem:[#allocation30_spill]]  ;;  %s4997_s25 = smov [#allocation13]  }
  0x39   :  { %s107_s8 = sshll.u32 %s4997_s25, 4  ;;  %s4998_s4 = smov [#allocation14]   ;;  %s108_s8 = int_to_ptr.vmem [resolvable:$true] %s107_s8 }
  0x3a   :  { %s125_s5 = sshll.u32 %s4998_s4, 4  ;;  %s4929_s1 = scalar_lea.vmem %s108_s8, 6144  ;;  %s126_s5 = int_to_ptr.vmem [resolvable:$true] %s125_s5 }
  0x3b   :  { %p4930_p6 = scmp.ne.s32.totalorder %s108_s8, %s4929_s1  ;;  %p4934_p7 = scmp.lt.s32.totalorder %s108_s8, %s108_s8 }
  0x3c   :  { %p4935_p8 = scmp.lt.s32.totalorder %s4929_s1, %s4929_s1 }
  0x3e   :  { %81 = dma.hbm_to_vmem [thread:$0]  %s5764_s3, 6144, %s76_s27, [#allocation9], %s4993_s2, %s4993_s2, %s4994_s29  }
  0x3f   :  { %p4936_p9 = por %p4935_p8, %p4934_p7 }
  0x41   :  { %p4937_p10 = pnand %p4936_p9, %p4930_p6 }
  0x43   :  { %4940 = shalt.err (!%p4937_p10)
}
  0x44   :  { %113 = dma.hbm_to_vmem [thread:$0]  %s5740_s14, 6144, %s108_s8, [#allocation12], %s4993_s2, %s4993_s2, %s4994_s29  }
  0x45   :  { %s4949_s27 = scalar_lea.vmem %s126_s5, 6144  ;;  %p4954_p12 = scmp.lt.s32.totalorder %s126_s5, %s126_s5 }
  0x46   :  { %p4950_p11 = scmp.ne.s32.totalorder %s126_s5, %s4949_s27  ;;  %p4955_p13 = scmp.lt.s32.totalorder %s4949_s27, %s4949_s27 }
  0x48   :  { %p4956_p0 = por %p4955_p13, %p4954_p12 }
  0x4a   :  { %p4957_p1 = pnand %p4956_p0, %p4950_p11 }
  0x4c   :  { %4960 = shalt.err (!%p4957_p1)
}
  0x4d   :  { %131 = dma.hbm_to_vmem [thread:$0]  %s5744_s18, 6144, %s126_s5, [#allocation15], %s4993_s2, %s4993_s2, %s4994_s29  }
  0x4e   :  { %4981 = dma.done.wait [#allocation6], 3072  }
  0x4f   :  { %4982 = vsyncadd [#allocation6], 4294964224 }
  0x50   :  { %4983 = dma.done.wait [#allocation9], 12288  }
  0x51   :  { %4984 = vsyncadd [#allocation9], 4294955008 }
  0x52   :  { %4985 = dma.done.wait [#allocation12], 12288  }
  0x53   :  { %4986 = vsyncadd [#allocation12], 4294955008 }
  0x54   :  { %4987 = dma.done.wait [#allocation15], 6144  }
  0x55   :  { %4988 = vsyncadd [#allocation15], 4294961152  ;;  %vm160_vm0 = vcmask 516096   ;;  %v4999_v0 = vmov 0.0   ;;  %v206_v1 = vld [vmem:[#allocation5 + $0x78] sm:$0xff]  ;;  %v205_v3 = vld [vmem:[#allocation5 + $0x70] sm:$0xff] }
  0x56   :  { %161 = vst.msk [vmem:[#allocation2] sm:$0x1] %vm160_vm0, %v4999_v0  ;;  %162 = vst.msk [vmem:[#allocation2 + $0x18] sm:$0x1] %vm160_vm0, %v4999_v0  ;;  %v193_v2 = vld [vmem:[#allocation5 + $0x38] sm:$0xff]  ;;  %3998 = vmatprep.subr.mxu0 %v206_v1  ;;  %v192_v4 = vld [vmem:[#allocation5 + $0x30] sm:$0xff] }
  0x57   :  { %163 = vst.msk [vmem:[#allocation2 + $0x11] sm:$0x1] %vm160_vm0, %v4999_v0  ;;  %164 = vst.msk [vmem:[#allocation2 + $0x29] sm:$0x1] %vm160_vm0, %v4999_v0  ;;  %4020 = vmatprep.subr.mxu1 %v193_v2  ;;  %3999 = vmatpush3.msra.mxu0 %v206_v1  ;;  %v204_v5 = vld [vmem:[#allocation5 + $0x68] sm:$0xff]  ;;  %vm177_vm1 = vcmask 523264  }
  0x58   :  { %165 = vst [vmem:[#allocation3] sm:$0x1] %v4999_v0  ;;  %166 = vst [vmem:[#allocation3 + $0x18] sm:$0x1] %v4999_v0  ;;  %4021 = vmatpush3.msra.mxu1 %v193_v2  ;;  %v191_v6 = vld [vmem:[#allocation5 + $0x28] sm:$0xff]  ;;  %4000 = vmatprep.subr.mxu0 %v205_v3  ;;  %v203_v7 = vld [vmem:[#allocation5 + $0x60] sm:$0xff] }
  0x59   :  { %167 = vst [vmem:[#allocation3 + $0x11] sm:$0x1] %v4999_v0  ;;  %168 = vst [vmem:[#allocation3 + $0x29] sm:$0x1] %v4999_v0  ;;  %4022 = vmatprep.subr.mxu1 %v192_v4  ;;  %4001 = vmatpush3.msra.mxu0 %v205_v3  ;;  %v190_v8 = vld [vmem:[#allocation5 + $0x20] sm:$0xff]  ;;  %s5765_s2 = sld [smem:[#allocation22_spill]] }
  0x5a   :  { %169 = vst [vmem:[#allocation4] sm:$0x1] %v4999_v0  ;;  %170 = vst [vmem:[#allocation4 + $0x18] sm:$0x1] %v4999_v0  ;;  %4023 = vmatpush3.msra.mxu1 %v192_v4  ;;  %4002 = vmatprep.subr.mxu0 %v204_v5  ;;  %v202_v11 = vld [vmem:[#allocation5 + $0x58] sm:$0xff]  ;;  %v201_v14 = vld [vmem:[#allocation5 + $0x50] sm:$0xff] }
  0x5b   :  { %171 = vst [vmem:[#allocation4 + $0x11] sm:$0x1] %v4999_v0  ;;  %172 = vst [vmem:[#allocation4 + $0x29] sm:$0x1] %v4999_v0  ;;  %4024 = vmatprep.subr.mxu1 %v191_v6  ;;  %4003 = vmatpush3.msra.mxu0 %v204_v5  ;;  %v189_v12 = vld [vmem:[#allocation5 + $0x18] sm:$0xff]  ;;  %v188_v15 = vld [vmem:[#allocation5 + $0x10] sm:$0xff] }
  0x5c   :  { %4025 = vmatpush3.msra.mxu1 %v191_v6  ;;  %4004 = vmatprep.subr.mxu0 %v203_v7  ;;  %v200_v17 = vld [vmem:[#allocation5 + $0x48] sm:$0xff]  ;;  %v199_v19 = vld [vmem:[#allocation5 + $0x40] sm:$0xff]  ;;  %v413_v25 = vld [vmem:[#allocation5 + $0xb8] sm:$0xff]  ;;  %s5766_s5 = sld [smem:[#allocation25_spill]]  ;;  %vm5000_vm2 = vmmov 0   ;;  %vm963_vm3 = vcmask 64512  }
  0x5d   :  { %4026 = vmatprep.subr.mxu1 %v190_v8  ;;  %4005 = vmatpush3.msra.mxu0 %v203_v7  ;;  %v187_v18 = vld [vmem:[#allocation5 + $0x8] sm:$0xff]  ;;  %v186_v20 = vld [vmem:[#allocation5] sm:$0xff]  ;;  %v412_v28 = vld [vmem:[#allocation5 + $0xb0] sm:$0xff]  ;;  %s5767_s8 = sld [smem:[#allocation27_spill]]  ;;  %vm3141_vm4 = vcmask 130048  }
  0x5e   :  { %4027 = vmatpush3.msra.mxu1 %v190_v8  ;;  %4006 = vmatprep.subr.mxu0 %v202_v11  ;;  %v411_v30 = vld [vmem:[#allocation5 + $0xa8] sm:$0xff]  ;;  %v410_v33 = vld [vmem:[#allocation5 + $0xa0] sm:$0xff]  ;;  %v409_v34 = vld [vmem:[#allocation5 + $0x98] sm:$0xff]  ;;  %s5768_s26 = sld [smem:[#allocation28_spill]] }
  0x5f   :  { %v173_v9 = vld [vmem:[%s5765_s2] sm:$0xff]  ;;  %v174_v10 = vld [vmem:[%s5765_s2 + $0x8] sm:$0xff]  ;;  %v175_v13 = vld [vmem:[%s5765_s2 + $0x10] sm:$0xff]  ;;  %4028 = vmatprep.subr.mxu1 %v189_v12  ;;  %4007 = vmatpush3.msra.mxu0 %v202_v11  ;;  %s5769_s0 = sld [smem:[#allocation29_spill]] }
  0x60   :  { %178 = vst.msk [vmem:[#allocation2 + $0x1] sm:$0xff] %vm177_vm1, %v173_v9  ;;  %179 = vst.msk [vmem:[#allocation2 + $0x9] sm:$0xff] %vm177_vm1, %v174_v10  ;;  %v176_v16 = vld [vmem:[%s5765_s2 + $0x18] sm:$0xff]  ;;  %4029 = vmatpush3.msra.mxu1 %v189_v12  ;;  %4008 = vmatprep.subr.mxu0 %v201_v14  ;;  %v408_v35 = vld [vmem:[#allocation5 + $0x90] sm:$0xff]  ;;  %s5770_s29 = sld [smem:[#allocation23_spill]] }
  0x61   :  { %180 = vst.msk [vmem:[#allocation2 + $0x19] sm:$0xff] %vm177_vm1, %v175_v13  ;;  %181 = vst.msk [vmem:[#allocation2 + $0x21] sm:$0xff] %vm177_vm1, %v176_v16  ;;  %4030 = vmatprep.subr.mxu1 %v188_v15  ;;  %4009 = vmatpush3.msra.mxu0 %v201_v14  ;;  %v407_v36 = vld [vmem:[#allocation5 + $0x88] sm:$0xff]  ;;  %v406_v37 = vld [vmem:[#allocation5 + $0x80] sm:$0xff] }
  0x62   :  { %4031 = vmatpush3.msra.mxu1 %v188_v15  ;;  %4010 = vmatprep.subr.mxu0 %v200_v17  ;;  %v574_v41 = vld [vmem:[#allocation8 + $0xf8] sm:$0xff]  ;;  %v573_v42 = vld [vmem:[#allocation8 + $0xf0] sm:$0xff]  ;;  %v572_v43 = vld [vmem:[#allocation8 + $0xe8] sm:$0xff] }
  0x63   :  { %4032 = vmatprep.subr.mxu1 %v187_v18  ;;  %4011 = vmatpush3.msra.mxu0 %v200_v17  ;;  %v571_v44 = vld [vmem:[#allocation8 + $0xe0] sm:$0xff]  ;;  %v570_v45 = vld [vmem:[#allocation8 + $0xd8] sm:$0xff]  ;;  %v552_v47 = vld [vmem:[#allocation8 + $0x70] sm:$0xff] }
  0x64   :  { %4033 = vmatpush3.msra.mxu1 %v187_v18  ;;  %4012 = vmatprep.subr.mxu0 %v199_v19  ;;  %v553_v46 = vld [vmem:[#allocation8 + $0x78] sm:$0xff]  ;;  %v551_v48 = vld [vmem:[#allocation8 + $0x68] sm:$0xff]  ;;  %v569_v49 = vld [vmem:[#allocation8 + $0xd0] sm:$0xff] }
  0x65   :  { %4034 = vmatprep.subr.mxu1 %v186_v20  ;;  %4013 = vmatpush3.msra.mxu0 %v199_v19  ;;  %v568_v50 = vld [vmem:[#allocation8 + $0xc8] sm:$0xff]  ;;  %v550_v51 = vld [vmem:[#allocation8 + $0x60] sm:$0xff]  ;;  %v549_v53 = vld [vmem:[#allocation8 + $0x58] sm:$0xff] }
  0x66   :  { %4035 = vmatpush3.msra.mxu1 %v186_v20  ;;  %4042 = vmatprep.subr.mxu0 %v413_v25  ;;  %v567_v52 = vld [vmem:[#allocation8 + $0xc0] sm:$0xff]  ;;  %v566_v54 = vld [vmem:[#allocation8 + $0xb8] sm:$0xff]  ;;  %v548_v55 = vld [vmem:[#allocation8 + $0x50] sm:$0xff] }
  0x67   :  { %v194_v21 = vld [vmem:[#allocation2 + $0x1] sm:$0xff]  ;;  %v195_v23 = vld [vmem:[#allocation2 + $0x9] sm:$0xff]  ;;  %4064 = vmatprep.subr.mxu1 %v574_v41  ;;  %v547_v57 = vld [vmem:[#allocation8 + $0x48] sm:$0xff] }
  0x68   :  { %v182_v22 = vld [vmem:[#allocation2] sm:$0xff]  ;;  %v183_v24 = vld [vmem:[#allocation2 + $0x8] sm:$0xff]  ;;  %4014 = vmatprep.mubr.msk.f32.mxu0 %vm177_vm1, %v194_v21  ;;  %v184_v27 = vld [vmem:[#allocation2 + $0x18] sm:$0xff] }
  0x69   :  { %v196_v26 = vld [vmem:[#allocation2 + $0x19] sm:$0xff]  ;;  %4036 = vmatprep.mubr.msk.f32.mxu1 %vm177_vm1, %v182_v22  ;;  %4015 = vmatmul.mubr.msk.f32.vlgmr.msra.gmra.mxu0 %vm177_vm1, %v195_v23  ;;  %v197_v31 = vld [vmem:[#allocation2 + $0x21] sm:$0xff]  ;;  %v402_v38 = vld [vmem:[#allocation2 + $0xa] sm:$0xff] }
  0x6a   :  { %4037 = vmatmul.mubr.msk.f32.vlgmr.msra.gmra.mxu1 %vm177_vm1, %v183_v24  ;;  %4017 = vmatprep.mubr.msk.f32.mxu0 %vm177_vm1, %v196_v26  ;;  %v185_v29 = vld [vmem:[#allocation2 + $0x20] sm:$0xff]  ;;  %v564_v58 = vld [vmem:[#allocation8 + $0xa8] sm:$0xff]  ;;  %v563_v59 = vld [vmem:[#allocation8 + $0xa0] sm:$0xff] }
  0x6b   :  { %4043 = vmatpush3.msra.mxu0 %v413_v25  ;;  %4039 = vmatprep.mubr.msk.f32.mxu1 %vm177_vm1, %v184_v27  ;;  %v401_v32 = vld [vmem:[#allocation2 + $0x2] sm:$0xff]  ;;  %v403_v39 = vld [vmem:[#allocation2 + $0x1a] sm:$0xff]  ;;  %v546_v60 = vld [vmem:[#allocation8 + $0x40] sm:$0xff] }
  0x6c   :  { %4044 = vmatprep.subr.mxu0 %v412_v28  ;;  %v404_v40 = vld [vmem:[#allocation2 + $0x22] sm:$0xff]  ;;  %4065 = vmatpush3.msra.mxu1 %v574_v41  ;;  %v560_v2 = vld [vmem:[#allocation8 + $0x88] sm:$0xff]  ;;  %v559_v4 = vld [vmem:[#allocation8 + $0x80] sm:$0xff] }
  0x6d   :  { %4045 = vmatpush3.msra.mxu0 %v412_v28  ;;  %4066 = vmatprep.subr.mxu1 %v573_v42  ;;  %v565_v56 = vld [vmem:[#allocation8 + $0xb0] sm:$0xff]  ;;  %v562_v61 = vld [vmem:[#allocation8 + $0x98] sm:$0xff]  ;;  %v543_v3 = vld [vmem:[#allocation8 + $0x28] sm:$0xff] }
  0x6e   :  { %4040 = vmatmul.mubr.msk.f32.gmra.mxu1 %vm177_vm1, %v185_v29  ;;  %4046 = vmatprep.subr.mxu0 %v411_v30  ;;  %v545_v62 = vld [vmem:[#allocation8 + $0x38] sm:$0xff]  ;;  %v561_v63 = vld [vmem:[#allocation8 + $0x90] sm:$0xff]  ;;  %v542_v5 = vld [vmem:[#allocation8 + $0x20] sm:$0xff] }
  0x6f   :  { %4018 = vmatmul.mubr.msk.f32.gmra.mxu0 %vm177_vm1, %v197_v31  ;;  %4067 = vmatpush3.msra.mxu1 %v573_v42  ;;  %v544_v1 = vld [vmem:[#allocation8 + $0x30] sm:$0xff]  ;;  %v765_v6 = vld [vmem:[#allocation8 + $0x178] sm:$0xff]  ;;  %v539_v9 = vld [vmem:[#allocation8 + $0x8] sm:$0xff] }
  0x70   :  { %4047 = vmatpush3.msra.mxu0 %v411_v30  ;;  %4058 = vmatprep.mubr.msk.f32.mxu0 %vm177_vm1, %v401_v32  ;;  %v541_v7 = vld [vmem:[#allocation8 + $0x18] sm:$0xff]  ;;  %v540_v8 = vld [vmem:[#allocation8 + $0x10] sm:$0xff]  ;;  %v538_v10 = vld [vmem:[#allocation8] sm:$0xff] }
  0x71   :  { %4048 = vmatprep.subr.mxu0 %v410_v33  ;;  %4068 = vmatprep.subr.mxu1 %v572_v43  ;;  %v3550_v20 = vld [vmem:[%s5766_s5] ss:$0 sm:$0xff]  ;;  %v763_v41 = vld [vmem:[#allocation8 + $0x168] sm:$0xff]  ;;  %v762_v42 = vld [vmem:[#allocation8 + $0x160] sm:$0xff] }
  0x72   :  { %4049 = vmatpush3.msra.mxu0 %v410_v33  ;;  %4069 = vmatpush3.msra.mxu1 %v572_v43  ;;  %v761_v43 = vld [vmem:[#allocation8 + $0x158] sm:$0xff] }
  0x73   :  { %4050 = vmatprep.subr.mxu0 %v409_v34  ;;  %4070 = vmatprep.subr.mxu1 %v571_v44 }
  0x74   :  { %4051 = vmatpush3.msra.mxu0 %v409_v34  ;;  %4071 = vmatpush3.msra.mxu1 %v571_v44 }
  0x75   :  { %4052 = vmatprep.subr.mxu0 %v408_v35  ;;  %4072 = vmatprep.subr.mxu1 %v570_v45 }
  0x76   :  { %4053 = vmatpush3.msra.mxu0 %v408_v35  ;;  %4073 = vmatpush3.msra.mxu1 %v570_v45 }
  0x77   :  { %4054 = vmatprep.subr.mxu0 %v407_v36  ;;  %4074 = vmatprep.subr.mxu1 %v569_v49 }
  0x78   :  { %4055 = vmatpush3.msra.mxu0 %v407_v36  ;;  %4075 = vmatpush3.msra.mxu1 %v569_v49 }
  0x79   :  { %4056 = vmatprep.subr.mxu0 %v406_v37  ;;  %4076 = vmatprep.subr.mxu1 %v568_v50 }
  0x7a   :  { %4057 = vmatpush3.msra.mxu0 %v406_v37  ;;  %4077 = vmatpush3.msra.mxu1 %v568_v50  ;;  %v759_v50 = vld [vmem:[#allocation8 + $0x148] sm:$0xff] }
  0x7b   :  { %4059 = vmatmul.mubr.msk.f32.vlgmr.msra.gmra.mxu0 %vm177_vm1, %v402_v38  ;;  %4102 = vmatprep.subr.mxu0 %v553_v46 }
  0x7c   :  { %4061 = vmatprep.mubr.msk.f32.mxu0 %vm177_vm1, %v403_v39  ;;  %4103 = vmatpush3.msra.mxu0 %v553_v46  ;;  %v764_v39 = vld [vmem:[#allocation8 + $0x170] sm:$0xff] }
  0x7d   :  { %4104 = vmatprep.subr.mxu0 %v552_v47  ;;  %4078 = vmatprep.subr.mxu1 %v567_v52 }
  0x7e   :  { %4105 = vmatpush3.msra.mxu0 %v552_v47  ;;  %4079 = vmatpush3.msra.mxu1 %v567_v52  ;;  %v760_v47 = vld [vmem:[#allocation8 + $0x150] sm:$0xff]  ;;  %v757_v52 = vld [vmem:[#allocation8 + $0x138] sm:$0xff] }
  0x7f   :  { %4062 = vmatmul.mubr.msk.f32.gmra.mxu0 %vm177_vm1, %v404_v40  ;;  %4106 = vmatprep.subr.mxu0 %v551_v48 }
  0x80   :  { %4107 = vmatpush3.msra.mxu0 %v551_v48  ;;  %4080 = vmatprep.subr.mxu1 %v566_v54 }
  0x81   :  { %4108 = vmatprep.subr.mxu0 %v550_v51  ;;  %4081 = vmatpush3.msra.mxu1 %v566_v54  ;;  %v755_v54 = vld [vmem:[#allocation8 + $0x128] sm:$0xff] }
  0x82   :  { %4109 = vmatpush3.msra.mxu0 %v550_v51  ;;  %4082 = vmatprep.subr.mxu1 %v565_v56  ;;  %v758_v51 = vld [vmem:[#allocation8 + $0x140] sm:$0xff] }
  0x83   :  { %4110 = vmatprep.subr.mxu0 %v549_v53  ;;  %4083 = vmatpush3.msra.mxu1 %v565_v56  ;;  %v753_v56 = vld [vmem:[#allocation8 + $0x118] sm:$0xff] }
  0x84   :  { %4111 = vmatpush3.msra.mxu0 %v549_v53  ;;  %4084 = vmatprep.subr.mxu1 %v564_v58  ;;  %v756_v53 = vld [vmem:[#allocation8 + $0x130] sm:$0xff] }
  0x85   :  { %4112 = vmatprep.subr.mxu0 %v548_v55  ;;  %4085 = vmatpush3.msra.mxu1 %v564_v58  ;;  %v751_v58 = vld [vmem:[#allocation8 + $0x108] sm:$0xff] }
  0x86   :  { %4113 = vmatpush3.msra.mxu0 %v548_v55  ;;  %4086 = vmatprep.subr.mxu1 %v563_v59  ;;  %v754_v55 = vld [vmem:[#allocation8 + $0x120] sm:$0xff] }
  0x87   :  { %4114 = vmatprep.subr.mxu0 %v547_v57  ;;  %4087 = vmatpush3.msra.mxu1 %v563_v59  ;;  %v750_v59 = vld [vmem:[#allocation8 + $0x100] sm:$0xff] }
  0x88   :  { %4115 = vmatpush3.msra.mxu0 %v547_v57  ;;  %4088 = vmatprep.subr.mxu1 %v562_v61  ;;  %v752_v57 = vld [vmem:[#allocation8 + $0x110] sm:$0xff] }
  0x89   :  { %4116 = vmatprep.subr.mxu0 %v546_v60  ;;  %4089 = vmatpush3.msra.mxu1 %v562_v61 }
  0x8a   :  { %4117 = vmatpush3.msra.mxu0 %v546_v60  ;;  %4090 = vmatprep.subr.mxu1 %v561_v63 }
  0x8b   :  { %4118 = vmatprep.subr.mxu0 %v545_v62  ;;  %4091 = vmatpush3.msra.mxu1 %v561_v63  ;;  %v890_v63 = vld [vmem:[%s5736_s10 + $0x78] sm:$0xff] }
  0x8c   :  { %4119 = vmatpush3.msra.mxu0 %v545_v62  ;;  %4092 = vmatprep.subr.mxu1 %v560_v2 }
  0x8d   :  { %4120 = vmatprep.subr.mxu0 %v544_v1  ;;  %4093 = vmatpush3.msra.mxu1 %v560_v2  ;;  %v888_v2 = vld [vmem:[%s5736_s10 + $0x68] sm:$0xff] }
  0x8e   :  { %4121 = vmatpush3.msra.mxu0 %v544_v1  ;;  %4094 = vmatprep.subr.mxu1 %v559_v4  ;;  %v889_v1 = vld [vmem:[%s5736_s10 + $0x70] sm:$0xff] }
  0x8f   :  { %4122 = vmatprep.subr.mxu0 %v543_v3  ;;  %4095 = vmatpush3.msra.mxu1 %v559_v4  ;;  %v886_v4 = vld [vmem:[%s5736_s10 + $0x58] sm:$0xff] }
  0x90   :  { %4123 = vmatpush3.msra.mxu0 %v543_v3  ;;  %4140 = vmatprep.subr.mxu1 %v765_v6  ;;  %v887_v3 = vld [vmem:[%s5736_s10 + $0x60] sm:$0xff] }
  0x91   :  { %4124 = vmatprep.subr.mxu0 %v542_v5 }
  0x92   :  { %4125 = vmatpush3.msra.mxu0 %v542_v5  ;;  %v885_v5 = vld [vmem:[%s5736_s10 + $0x50] sm:$0xff] }
  0x93   :  { %4126 = vmatprep.subr.mxu0 %v541_v7 }
  0x94   :  { %4127 = vmatpush3.msra.mxu0 %v541_v7  ;;  %v883_v7 = vld [vmem:[%s5736_s10 + $0x40] sm:$0xff] }
  0x95   :  { %4128 = vmatprep.subr.mxu0 %v540_v8 }
  0x96   :  { %4129 = vmatpush3.msra.mxu0 %v540_v8  ;;  %v882_v8 = vld [vmem:[%s5736_s10 + $0x38] sm:$0xff] }
  0x97   :  { %4130 = vmatprep.subr.mxu0 %v539_v9 }
  0x98   :  { %4131 = vmatpush3.msra.mxu0 %v539_v9  ;;  %v881_v9 = vld [vmem:[%s5736_s10 + $0x30] sm:$0xff] }
  0x99   :  { %4132 = vmatprep.subr.mxu0 %v538_v10 }
  0x9a   :  { %4133 = vmatpush3.msra.mxu0 %v538_v10  ;;  %v880_v10 = vld [vmem:[%s5736_s10 + $0x28] sm:$0xff] }
  0x9b   :  { %4178 = vmatprep.subr.mxu0 %v4999_v0 }
 0x129   :  { %v4016_v11 = vpop.f32.mrf.mxu0 }
 0x12a   :  { %v4038_v12 = vpop.f32.mrf.mxu1 }
 0x12b   :  { %v285_v13 = vpop.f32.mrf.mxu0  ;;  %v388_v18 = vadd.f32 %v4038_v12, %v4016_v11  ;;  %v879_v11 = vld [vmem:[%s5736_s10 + $0x20] sm:$0xff]  ;;  %v878_v12 = vld [vmem:[%s5736_s10 + $0x18] sm:$0xff] }
 0x12c   :  { %v382_v15 = vpop.f32.mrf.mxu1 }
 0x12d   :  { %v383_v21 = vadd.f32 %v382_v15, %v285_v13  ;;  %v877_v13 = vld [vmem:[%s5736_s10 + $0x10] sm:$0xff]  ;;  %v875_v15 = vld [vmem:[%s5736_s10] sm:$0xff] }
 0x12e   :  { %v4041_v16 = vpop.f32.mrf.mxu1 }
 0x12f   :  { %v4019_v14 = vpop.f32.mrf.mxu0 }
 0x130   :  { %v392_v23 = vpop.f32.mrf.mxu1  ;;  %v398_v25 = vadd.f32 %v4041_v16, %v4019_v14  ;;  %v876_v14 = vld [vmem:[%s5736_s10 + $0x8] sm:$0xff] }
 0x131   :  { %v295_v17 = vpop.f32.mrf.mxu0 }
 0x132   :  { %v393_v29 = vadd.f32 %v392_v23, %v295_v17 }
 0x13b   :  { %v4060_v19 = vpop.f32.mrf.mxu0 }
 0x13c   :  { %v512_v22 = vadd.f32 %v4060_v19, %v388_v18 }
 0x13d   :  { %v492_v24 = vpop.f32.mrf.mxu0 }
 0x13e   :  { %v5209_v26 = vadd.f32 %v3550_v20, %v512_v22  ;;  %v511_v27 = vadd.f32 %v492_v24, %v383_v21 }
 0x13f   :  { %v4063_v28 = vpop.f32.mrf.mxu0 }
 0x140   :  { %v527_v30 = vmax.f32 %v5209_v26, 0.0  ;;  %v5212_v31 = vadd.f32 %v3550_v20, %v511_v27  ;;  %v514_v32 = vadd.f32 %v4063_v28, %v398_v25 }
 0x141   :  { %v502_v33 = vpop.f32.mrf.mxu0 }
 0x142   :  { %531 = vst [vmem:[#allocation3 + $0x9] sm:$0xff] %v527_v30  ;;  %v526_v34 = vmax.f32 %v5212_v31, 0.0  ;;  %v5215_v35 = vadd.f32 %v3550_v20, %v514_v32  ;;  %v513_v36 = vadd.f32 %v502_v33, %v393_v29  ;;  %v3551_v32 = vld [vmem:[%s5767_s8] ss:$0 sm:$0xff] }
 0x144   :  { %530 = vst [vmem:[#allocation3 + $0x1] sm:$0xff] %v526_v34  ;;  %v529_v37 = vmax.f32 %v5215_v35, 0.0  ;;  %v5218_v38 = vadd.f32 %v3550_v20, %v513_v36  ;;  %4096 = vmatprep.mubr.f32.mxu1 %v526_v34 }
 0x145   :  { %4097 = vmatmul.mubr.f32.vlgmr.msra.gmra.mxu1 %v527_v30 }
 0x146   :  { %533 = vst [vmem:[#allocation3 + $0x21] sm:$0xff] %v529_v37  ;;  %v528_v40 = vmax.f32 %v5218_v38, 0.0  ;;  %4141 = vmatpush3.msra.mxu1 %v765_v6  ;;  %v884_v6 = vld [vmem:[%s5736_s10 + $0x48] sm:$0xff] }
 0x147   :  { %4142 = vmatprep.subr.mxu1 %v764_v39 }
 0x148   :  { %532 = vst [vmem:[#allocation3 + $0x19] sm:$0xff] %v528_v40  ;;  %4143 = vmatpush3.msra.mxu1 %v764_v39  ;;  %4099 = vmatprep.mubr.f32.mxu1 %v528_v40 }
 0x149   :  { %4144 = vmatprep.subr.mxu1 %v763_v41  ;;  %4100 = vmatmul.mubr.f32.gmra.mxu1 %v529_v37  ;;  %v746_v60 = vld [vmem:[#allocation3 + $0xa] sm:$0xff] }
 0x14a   :  { %4145 = vmatpush3.msra.mxu1 %v763_v41 }
 0x14b   :  { %v534_v44 = vld [vmem:[#allocation3] sm:$0xff]  ;;  %v535_v45 = vld [vmem:[#allocation3 + $0x8] sm:$0xff]  ;;  %4146 = vmatprep.subr.mxu1 %v762_v42 }
 0x14c   :  { %v745_v46 = vld [vmem:[#allocation3 + $0x2] sm:$0xff]  ;;  %4134 = vmatprep.mubr.f32.mxu0 %v534_v44  ;;  %4147 = vmatpush3.msra.mxu1 %v762_v42 }
 0x14d   :  { %4172 = vmatprep.mubr.f32.mxu1 %v745_v46  ;;  %4135 = vmatmul.mubr.f32.vlgmr.msra.gmra.mxu0 %v535_v45  ;;  %v748_v62 = vld [vmem:[#allocation3 + $0x22] sm:$0xff] }
 0x14e   :  { %4148 = vmatprep.subr.mxu1 %v761_v43  ;;  %4179 = vmatpush3.msra.mxu0 %v890_v63 }
 0x14f   :  { %v536_v48 = vld [vmem:[#allocation3 + $0x18] sm:$0xff]  ;;  %v537_v49 = vld [vmem:[#allocation3 + $0x20] sm:$0xff]  ;;  %4149 = vmatpush3.msra.mxu1 %v761_v43  ;;  %4180 = vmatprep.subr.mxu0 %v4999_v0 }
 0x150   :  { %4137 = vmatprep.mubr.f32.mxu0 %v536_v48  ;;  %4150 = vmatprep.subr.mxu1 %v760_v47  ;;  %v747_v61 = vld [vmem:[#allocation3 + $0x1a] sm:$0xff] }
 0x151   :  { %4138 = vmatmul.mubr.f32.gmra.mxu0 %v537_v49  ;;  %4151 = vmatpush3.msra.mxu1 %v760_v47 }
 0x152   :  { %4152 = vmatprep.subr.mxu1 %v759_v50  ;;  %4181 = vmatpush3.msra.mxu0 %v889_v1 }
 0x153   :  { %4153 = vmatpush3.msra.mxu1 %v759_v50  ;;  %4182 = vmatprep.subr.mxu0 %v4999_v0 }
 0x154   :  { %4154 = vmatprep.subr.mxu1 %v758_v51  ;;  %4183 = vmatpush3.msra.mxu0 %v888_v2 }
 0x155   :  { %4155 = vmatpush3.msra.mxu1 %v758_v51  ;;  %4184 = vmatprep.subr.mxu0 %v4999_v0 }
 0x156   :  { %4156 = vmatprep.subr.mxu1 %v757_v52  ;;  %4185 = vmatpush3.msra.mxu0 %v887_v3 }
 0x157   :  { %4157 = vmatpush3.msra.mxu1 %v757_v52  ;;  %4186 = vmatprep.subr.mxu0 %v4999_v0 }
 0x158   :  { %4158 = vmatprep.subr.mxu1 %v756_v53  ;;  %4187 = vmatpush3.msra.mxu0 %v886_v4 }
 0x159   :  { %4159 = vmatpush3.msra.mxu1 %v756_v53  ;;  %4188 = vmatprep.subr.mxu0 %v4999_v0 }
 0x15a   :  { %4160 = vmatprep.subr.mxu1 %v755_v54  ;;  %4189 = vmatpush3.msra.mxu0 %v885_v5 }
 0x15b   :  { %4161 = vmatpush3.msra.mxu1 %v755_v54  ;;  %4190 = vmatprep.subr.mxu0 %v4999_v0  ;;  %v5313_v54 = vld [vmem:[%s5737_s11] sm:$0xff] }
 0x15c   :  { %4162 = vmatprep.subr.mxu1 %v754_v55  ;;  %4191 = vmatpush3.msra.mxu0 %v884_v6 }
 0x15d   :  { %4163 = vmatpush3.msra.mxu1 %v754_v55  ;;  %4192 = vmatprep.subr.mxu0 %v4999_v0 }
 0x15e   :  { %4164 = vmatprep.subr.mxu1 %v753_v56  ;;  %4193 = vmatpush3.msra.mxu0 %v883_v7 }
 0x15f   :  { %4165 = vmatpush3.msra.mxu1 %v753_v56  ;;  %4194 = vmatprep.subr.mxu0 %v4999_v0 }
 0x160   :  { %4166 = vmatprep.subr.mxu1 %v752_v57  ;;  %4195 = vmatpush3.msra.mxu0 %v882_v8 }
 0x161   :  { %4167 = vmatpush3.msra.mxu1 %v752_v57  ;;  %4196 = vmatprep.subr.mxu0 %v4999_v0 }
 0x162   :  { %4168 = vmatprep.subr.mxu1 %v751_v58  ;;  %4197 = vmatpush3.msra.mxu0 %v881_v9 }
 0x163   :  { %4169 = vmatpush3.msra.mxu1 %v751_v58  ;;  %4198 = vmatprep.subr.mxu0 %v4999_v0  ;;  %v1037_v58 = vlaneseq }
 0x164   :  { %4170 = vmatprep.subr.mxu1 %v750_v59  ;;  %4199 = vmatpush3.msra.mxu0 %v880_v10 }
 0x165   :  { %4171 = vmatpush3.msra.mxu1 %v750_v59  ;;  %4200 = vmatprep.subr.mxu0 %v4999_v0  ;;  %v1038_v59 = vshrl.u32 %v1037_v58, 7  ;;  %v1535_v58 = vld [vmem:[#allocation10 + $0x178] sm:$0xff] }
 0x166   :  { %4173 = vmatmul.mubr.f32.vlgmr.msra.gmra.mxu1 %v746_v60  ;;  %4218 = vmatprep.subr.mxu1 %v4999_v0 }
 0x167   :  { %4175 = vmatprep.mubr.f32.mxu1 %v747_v61  ;;  %4219 = vmatpush3.msra.mxu1 %v890_v63  ;;  %v5322_v60 = vsub.s32 0, %v1038_v59  ;;  %v1311_v59 = vld [vmem:[#allocation10 + $0x18] sm:$0xff] }
 0x168   :  { %4220 = vmatprep.subr.mxu1 %v4999_v0  ;;  %4201 = vmatpush3.msra.mxu0 %v879_v11 }
 0x169   :  { %4221 = vmatpush3.msra.mxu1 %v889_v1  ;;  %4202 = vmatprep.subr.mxu0 %v4999_v0 }
 0x16a   :  { %4176 = vmatmul.mubr.f32.gmra.mxu1 %v748_v62  ;;  %4222 = vmatprep.subr.mxu1 %v4999_v0 }
 0x16b   :  { %4223 = vmatpush3.msra.mxu1 %v888_v2  ;;  %4203 = vmatpush3.msra.mxu0 %v878_v12 }
 0x16c   :  { %4224 = vmatprep.subr.mxu1 %v4999_v0  ;;  %4204 = vmatprep.subr.mxu0 %v4999_v0 }
 0x16d   :  { %4225 = vmatpush3.msra.mxu1 %v887_v3  ;;  %4205 = vmatpush3.msra.mxu0 %v877_v13 }
 0x16e   :  { %4226 = vmatprep.subr.mxu1 %v4999_v0  ;;  %4206 = vmatprep.subr.mxu0 %v4999_v0 }
 0x16f   :  { %4227 = vmatpush3.msra.mxu1 %v886_v4  ;;  %4207 = vmatpush3.msra.mxu0 %v876_v14 }
 0x170   :  { %4228 = vmatprep.subr.mxu1 %v4999_v0  ;;  %4210 = vmatprep.mubr.msk.f32.mxu0 %vm5000_vm2, %v4999_v0 }
 0x171   :  { %4229 = vmatpush3.msra.mxu1 %v885_v5  ;;  %4208 = vmatprep.subr.mxu0 %v4999_v0 }
 0x172   :  { %4230 = vmatprep.subr.mxu1 %v4999_v0  ;;  %4209 = vmatpush3.msra.mxu0 %v875_v15 }
 0x173   :  { %4231 = vmatpush3.msra.mxu1 %v884_v6  ;;  %4213 = vmatprep.subr.mxu0 %v4999_v0 }
 0x174   :  { %4232 = vmatprep.subr.mxu1 %v4999_v0  ;;  %4250 = vmatprep.mubr.msk.f32.mxu1 %vm5000_vm2, %v4999_v0 }
 0x175   :  { %4233 = vmatpush3.msra.mxu1 %v883_v7 }
 0x176   :  { %4234 = vmatprep.subr.mxu1 %v4999_v0 }
 0x177   :  { %4235 = vmatpush3.msra.mxu1 %v882_v8 }
 0x178   :  { %4236 = vmatprep.subr.mxu1 %v4999_v0 }
 0x179   :  { %4237 = vmatpush3.msra.mxu1 %v881_v9 }
 0x17a   :  { %4238 = vmatprep.subr.mxu1 %v4999_v0 }
 0x17b   :  { %4239 = vmatpush3.msra.mxu1 %v880_v10 }
 0x17c   :  { %4240 = vmatprep.subr.mxu1 %v4999_v0 }
 0x17d   :  { %4241 = vmatpush3.msra.mxu1 %v879_v11 }
 0x17e   :  { %4242 = vmatprep.subr.mxu1 %v4999_v0 }
 0x17f   :  { %4243 = vmatpush3.msra.mxu1 %v878_v12 }
 0x180   :  { %4244 = vmatprep.subr.mxu1 %v4999_v0 }
 0x181   :  { %4245 = vmatpush3.msra.mxu1 %v877_v13 }
 0x182   :  { %4246 = vmatprep.subr.mxu1 %v4999_v0 }
 0x183   :  { %4247 = vmatpush3.msra.mxu1 %v876_v14 }
 0x184   :  { %4248 = vmatprep.subr.mxu1 %v4999_v0 }
 0x185   :  { %4249 = vmatpush3.msra.mxu1 %v875_v15 }
 0x205   :  { %v4098_v16 = vpop.f32.mrf.mxu1 }
 0x207   :  { %v641_v18 = vpop.f32.mrf.mxu1 }
 0x209   :  { %v4101_v20 = vpop.f32.mrf.mxu1 }
 0x20b   :  { %v651_v22 = vpop.f32.mrf.mxu1 }
 0x20d   :  { %v4136_v17 = vpop.f32.mrf.mxu0 }
 0x20e   :  { %v732_v24 = vadd.f32 %v4136_v17, %v4098_v16 }
 0x20f   :  { %v726_v19 = vpop.f32.mrf.mxu0 }
 0x210   :  { %v727_v25 = vadd.f32 %v726_v19, %v641_v18  ;;  %v1323_v18 = vld [vmem:[#allocation10 + $0x78] sm:$0xff]  ;;  %v1322_v19 = vld [vmem:[#allocation10 + $0x70] sm:$0xff] }
 0x211   :  { %v4139_v21 = vpop.f32.mrf.mxu0  ;;  %4301 = vmatprep.subr.mxu1 %v1323_v18 }
 0x212   :  { %v742_v34 = vadd.f32 %v4139_v21, %v4101_v20  ;;  %v1321_v20 = vld [vmem:[#allocation10 + $0x68] sm:$0xff]  ;;  %v1320_v21 = vld [vmem:[#allocation10 + $0x60] sm:$0xff] }
 0x213   :  { %v736_v27 = vpop.f32.mrf.mxu0 }
 0x214   :  { %v737_v36 = vadd.f32 %v736_v27, %v651_v22  ;;  %v1319_v22 = vld [vmem:[#allocation10 + $0x58] sm:$0xff] }
 0x226   :  { %v4174_v23 = vpop.f32.mrf.mxu1 }
 0x227   :  { %v852_v29 = vadd.f32 %v4174_v23, %v732_v24  ;;  %v1318_v23 = vld [vmem:[#allocation10 + $0x50] sm:$0xff] }
 0x228   :  { %v832_v28 = vpop.f32.mrf.mxu1 }
 0x229   :  { %v851_v30 = vadd.f32 %v832_v28, %v727_v25  ;;  %v863_v40 = vadd.f32 %v3551_v32, %v852_v29  ;;  %v1129_v29 = vld [vmem:[%s5768_s26] sm:$0x1] }
 0x22a   :  { %v4177_v33 = vpop.f32.mrf.mxu1 }
 0x22b   :  { %v862_v37 = vadd.f32 %v3551_v32, %v851_v30  ;;  %v854_v41 = vadd.f32 %v4177_v33, %v742_v34  ;;  %v1344_v33 = vld [vmem:[#allocation10 + $0xf8] sm:$0xff]  ;;  %v1206_v34 = vld [vmem:[%s5769_s0] sm:$0x1] }
 0x22c   :  { %v842_v39 = vpop.f32.mrf.mxu1 }
 0x22d   :  { %v853_v42 = vadd.f32 %v842_v39, %v737_v36  ;;  %v866_v43 = vadd.f32 %v863_v40, %v862_v37  ;;  %v865_v45 = vadd.f32 %v3551_v32, %v854_v41  ;;  %v1343_v36 = vld [vmem:[#allocation10 + $0xf0] sm:$0xff]  ;;  %v1341_v39 = vld [vmem:[#allocation10 + $0xe0] sm:$0xff] }
 0x22e   :  { %v1339_v41 = vld [vmem:[#allocation10 + $0xd0] sm:$0xff] }
 0x22f   :  { %v864_v44 = vadd.f32 %v3551_v32, %v853_v42  ;;  %v1338_v42 = vld [vmem:[#allocation10 + $0xc8] sm:$0xff] }
 0x231   :  { %v867_v46 = vadd.f32 %v866_v43, %v864_v44  ;;  %v1337_v43 = vld [vmem:[#allocation10 + $0xc0] sm:$0xff] }
 0x233   :  { %v868_v47 = vadd.f32 %v867_v46, %v865_v45  ;;  %v1334_v46 = vld [vmem:[#allocation10 + $0xa8] sm:$0xff] }
 0x235   :  { %v869_v48 = vrot.slane %v868_v47, 4 }
 0x237   :  { %v870_v49 = vadd.f32 %v869_v48, %v868_v47  ;;  %v1317_v47 = vld [vmem:[#allocation10 + $0x48] sm:$0xff]  ;;  %v1333_v48 = vld [vmem:[#allocation10 + $0xa0] sm:$0xff] }
 0x239   :  { %v871_v50 = vrot.slane %v870_v49, 2 }
 0x23b   :  { %v872_v51 = vadd.f32 %v871_v50, %v870_v49  ;;  %v1316_v49 = vld [vmem:[#allocation10 + $0x40] sm:$0xff]  ;;  %v1332_v50 = vld [vmem:[#allocation10 + $0x98] sm:$0xff] }
 0x23d   :  { %v873_v52 = vrot.slane %v872_v51, 1 }
 0x23f   :  { %v874_v53 = vadd.f32 %v873_v52, %v872_v51  ;;  %v1315_v51 = vld [vmem:[#allocation10 + $0x38] sm:$0xff]  ;;  %v1331_v52 = vld [vmem:[#allocation10 + $0x90] sm:$0xff] }
 0x241   :  { %4211 = vmatmul.mubr.f32.vlgmr.msra.gmra.mxu0 %v874_v53  ;;  %v1314_v53 = vld [vmem:[#allocation10 + $0x30] sm:$0xff] }
 0x242   :  { %4215 = vmatprep.mubr.msk.f32.mxu0 %vm5000_vm2, %v4999_v0  ;;  %4214 = vmatpush3.msra.mxu0 %v5313_v54 }
 0x243   :  { %4253 = vmatprep.subr.mxu0 %v4999_v0 }
 0x301   :  { %v957_v55 = vpop.f32.mrf.mxu0 }
 0x302   :  { %v961_v56 = vmul.f32 0.001953125, %v957_v55  ;;  %v1313_v55 = vld [vmem:[#allocation10 + $0x28] sm:$0xff] }
 0x303   :  { %v4212_v57 = vpop.f32.mrf.mxu0 }
 0x304   :  { %4216 = vmatmul.mubr.msk.f32.vlgmr.msra.gmra.mxu0 %vm963_vm3, %v961_v56  ;;  %v1329_v56 = vld [vmem:[#allocation10 + $0x80] sm:$0xff] }
 0x305   :  { %4254 = vmatpush3.msra.mxu0 %v5313_v54  ;;  %4255 = vmatprep.mubr.msk.f32.mxu0 %vm5000_vm2, %v4999_v0  ;;  %v1312_v57 = vld [vmem:[#allocation10 + $0x20] sm:$0xff] }
 0x306   :  { %4258 = vmatprep.subr.mxu0 %v4999_v0 }
 0x3c4   :  { %v1033_v61 = vpop.f32.mrf.mxu0 }
 0x3c5   :  { %v1040_v62 = vrot.slane %v1033_v61, %v5322_v60  ;;  %v1310_v61 = vld [vmem:[#allocation10 + $0x10] sm:$0xff] }
 0x3c6   :  { %v4217_v63 = vpop.f32.mrf.mxu0 }
 0x3c7   :  { %v5325_v1 = vsub.f32 %v862_v37, %v1040_v62  ;;  %v5327_v2 = vsub.f32 %v863_v40, %v1040_v62  ;;  %v5329_v3 = vsub.f32 %v864_v44, %v1040_v62  ;;  %v5331_v4 = vsub.f32 %v865_v45, %v1040_v62  ;;  %v1342_v37 = vld [vmem:[#allocation10 + $0xe8] sm:$0xff]  ;;  %v1340_v40 = vld [vmem:[#allocation10 + $0xd8] sm:$0xff]  ;;  %v1335_v45 = vld [vmem:[#allocation10 + $0xb0] sm:$0xff] }
 0x3c8   :  { %v1336_v44 = vld [vmem:[#allocation10 + $0xb8] sm:$0xff]  ;;  %v1309_v62 = vld [vmem:[#allocation10 + $0x8] sm:$0xff]  ;;  %v1308_v63 = vld [vmem:[#allocation10] sm:$0xff] }
 0x3c9   :  { %v1045_v5 = vmul.f32 %v5325_v1, %v5325_v1  ;;  %v1046_v6 = vmul.f32 %v5327_v2, %v5327_v2  ;;  %v1047_v7 = vmul.f32 %v5329_v3, %v5329_v3  ;;  %v1048_v9 = vmul.f32 %v5331_v4, %v5331_v4 }
 0x3cb   :  { %v1049_v8 = vadd.f32 %v1046_v6, %v1045_v5 }
 0x3cd   :  { %v1050_v10 = vadd.f32 %v1049_v8, %v1047_v7 }
 0x3cf   :  { %v1051_v11 = vadd.f32 %v1050_v10, %v1048_v9 }
 0x3d1   :  { %v1052_v12 = vrot.slane %v1051_v11, 4 }
 0x3d3   :  { %v1053_v13 = vadd.f32 %v1052_v12, %v1051_v11 }
 0x3d5   :  { %v1054_v14 = vrot.slane %v1053_v13, 2 }
 0x3d7   :  { %v1055_v15 = vadd.f32 %v1054_v14, %v1053_v13 }
 0x3d9   :  { %v1056_v16 = vrot.slane %v1055_v15, 1 }
 0x3db   :  { %v1057_v17 = vadd.f32 %v1056_v16, %v1055_v15 }
 0x3dd   :  { %4251 = vmatmul.mubr.f32.vlgmr.msra.gmra.mxu1 %v1057_v17 }
 0x3de   :  { %4302 = vmatpush3.msra.mxu1 %v1323_v18 }
 0x3df   :  { %4303 = vmatprep.subr.mxu1 %v1322_v19 }
 0x3e0   :  { %4304 = vmatpush3.msra.mxu1 %v1322_v19 }
 0x3e1   :  { %4305 = vmatprep.subr.mxu1 %v1321_v20 }
 0x3e2   :  { %4306 = vmatpush3.msra.mxu1 %v1321_v20 }
 0x3e3   :  { %4307 = vmatprep.subr.mxu1 %v1320_v21 }
 0x3e4   :  { %4308 = vmatpush3.msra.mxu1 %v1320_v21 }
 0x3e5   :  { %4309 = vmatprep.subr.mxu1 %v1319_v22 }
 0x3e6   :  { %4310 = vmatpush3.msra.mxu1 %v1319_v22 }
 0x3e7   :  { %4311 = vmatprep.subr.mxu1 %v1318_v23 }
 0x3e8   :  { %4312 = vmatpush3.msra.mxu1 %v1318_v23 }
 0x3e9   :  { %4313 = vmatprep.subr.mxu1 %v1317_v47 }
 0x3ea   :  { %4314 = vmatpush3.msra.mxu1 %v1317_v47  ;;  %v1675_v47 = vld [vmem:[#allocation11 + $0x78] sm:$0xff] }
 0x3eb   :  { %4315 = vmatprep.subr.mxu1 %v1316_v49 }
 0x3ec   :  { %4316 = vmatpush3.msra.mxu1 %v1316_v49  ;;  %v1674_v49 = vld [vmem:[#allocation11 + $0x70] sm:$0xff] }
 0x3ed   :  { %4317 = vmatprep.subr.mxu1 %v1315_v51 }
 0x3ee   :  { %4318 = vmatpush3.msra.mxu1 %v1315_v51  ;;  %v1673_v51 = vld [vmem:[#allocation11 + $0x68] sm:$0xff] }
 0x3ef   :  { %4319 = vmatprep.subr.mxu1 %v1314_v53 }
 0x3f0   :  { %4320 = vmatpush3.msra.mxu1 %v1314_v53  ;;  %v1672_v53 = vld [vmem:[#allocation11 + $0x60] sm:$0xff] }
 0x3f1   :  { %4321 = vmatprep.subr.mxu1 %v1313_v55 }
 0x3f2   :  { %4322 = vmatpush3.msra.mxu1 %v1313_v55  ;;  %v1671_v55 = vld [vmem:[#allocation11 + $0x58] sm:$0xff] }
 0x3f3   :  { %4323 = vmatprep.subr.mxu1 %v1312_v57 }
 0x3f4   :  { %4324 = vmatpush3.msra.mxu1 %v1312_v57  ;;  %v1690_v57 = vld [vmem:[#allocation11 + $0xc8] sm:$0xff] }
 0x3f5   :  { %4325 = vmatprep.subr.mxu1 %v1311_v59 }
 0x3f6   :  { %4326 = vmatpush3.msra.mxu1 %v1311_v59  ;;  %v1688_v59 = vld [vmem:[#allocation11 + $0xb8] sm:$0xff] }
 0x3f7   :  { %4327 = vmatprep.subr.mxu1 %v1310_v61 }
 0x3f8   :  { %4328 = vmatpush3.msra.mxu1 %v1310_v61  ;;  %v1687_v61 = vld [vmem:[#allocation11 + $0xb0] sm:$0xff] }
 0x3f9   :  { %4329 = vmatprep.subr.mxu1 %v1309_v62 }
 0x3fa   :  { %4330 = vmatpush3.msra.mxu1 %v1309_v62  ;;  %v1670_v62 = vld [vmem:[#allocation11 + $0x50] sm:$0xff] }
 0x3fb   :  { %4331 = vmatprep.subr.mxu1 %v1308_v63 }
 0x3fc   :  { %4332 = vmatpush3.msra.mxu1 %v1308_v63  ;;  %v1686_v63 = vld [vmem:[#allocation11 + $0xa8] sm:$0xff] }
 0x49d   :  { %v1124_v24 = vpop.f32.mrf.mxu1 }
 0x49e   :  { %v1128_v25 = vmul.f32 0.001953125, %v1124_v24  ;;  %v1531_v24 = vld [vmem:[#allocation10 + $0x158] sm:$0xff] }
 0x49f   :  { %v4252_v27 = vpop.f32.mrf.mxu1 }
 0x4a0   :  { %v1130_v28 = vadd.f32 1e-05, %v1128_v25 }
 0x4a2   :  { %4837 = vrsqrt.f32 %v1130_v28  ;;  %v1530_v28 = vld [vmem:[#allocation10 + $0x150] sm:$0xff] }
 0x4af   :  { %v4838_v30 = vpop.eup %4837 }
 0x4b0   :  { %v1132_v32 = vmul.f32 %v4838_v30, %v1129_v29  ;;  %v1529_v29 = vld [vmem:[#allocation10 + $0x148] sm:$0xff] }
 0x4b2   :  { %4256 = vmatmul.mubr.msk.f32.vlgmr.msra.gmra.mxu0 %vm963_vm3, %v1132_v32  ;;  %v1528_v32 = vld [vmem:[#allocation10 + $0x140] sm:$0xff] }
 0x4b3   :  { %4259 = vmatpush3.msra.mxu0 %v5313_v54  ;;  %4260 = vmatprep.mubr.msk.f32.mxu0 %vm5000_vm2, %v4999_v0  ;;  %v1330_v54 = vld [vmem:[#allocation10 + $0x88] sm:$0xff] }
 0x4b4   :  { %4263 = vmatprep.subr.mxu0 %v1344_v33 }
 0x4b6   :  { %4261 = vmatmul.mubr.msk.f32.vlgmr.msra.gmra.mxu0 %vm963_vm3, %v1206_v34  ;;  %v1526_v34 = vld [vmem:[#allocation10 + $0x130] sm:$0xff] }
 0x4b7   :  { %4264 = vmatpush3.msra.mxu0 %v1344_v33  ;;  %v1527_v33 = vld [vmem:[#allocation10 + $0x138] sm:$0xff] }
 0x4b8   :  { %4265 = vmatprep.subr.mxu0 %v1343_v36 }
 0x4b9   :  { %4266 = vmatpush3.msra.mxu0 %v1343_v36  ;;  %v1525_v36 = vld [vmem:[#allocation10 + $0x128] sm:$0xff] }
 0x4ba   :  { %4267 = vmatprep.subr.mxu0 %v1342_v37 }
 0x4bb   :  { %4268 = vmatpush3.msra.mxu0 %v1342_v37  ;;  %v1524_v37 = vld [vmem:[#allocation10 + $0x120] sm:$0xff] }
 0x4bc   :  { %4269 = vmatprep.subr.mxu0 %v1341_v39 }
 0x4bd   :  { %4270 = vmatpush3.msra.mxu0 %v1341_v39  ;;  %v1523_v39 = vld [vmem:[#allocation10 + $0x118] sm:$0xff] }
 0x4be   :  { %4271 = vmatprep.subr.mxu0 %v1340_v40 }
 0x4bf   :  { %4272 = vmatpush3.msra.mxu0 %v1340_v40  ;;  %v1522_v40 = vld [vmem:[#allocation10 + $0x110] sm:$0xff] }
 0x4c0   :  { %4273 = vmatprep.subr.mxu0 %v1339_v41 }
 0x4c1   :  { %4274 = vmatpush3.msra.mxu0 %v1339_v41  ;;  %v1521_v41 = vld [vmem:[#allocation10 + $0x108] sm:$0xff] }
 0x4c2   :  { %4275 = vmatprep.subr.mxu0 %v1338_v42 }
 0x4c3   :  { %4276 = vmatpush3.msra.mxu0 %v1338_v42  ;;  %v1520_v42 = vld [vmem:[#allocation10 + $0x100] sm:$0xff] }
 0x4c4   :  { %4277 = vmatprep.subr.mxu0 %v1337_v43 }
 0x4c5   :  { %4278 = vmatpush3.msra.mxu0 %v1337_v43 }
 0x4c6   :  { %4279 = vmatprep.subr.mxu0 %v1336_v44 }
 0x4c7   :  { %4280 = vmatpush3.msra.mxu0 %v1336_v44 }
 0x4c8   :  { %4281 = vmatprep.subr.mxu0 %v1335_v45 }
 0x4c9   :  { %4282 = vmatpush3.msra.mxu0 %v1335_v45 }
 0x4ca   :  { %4283 = vmatprep.subr.mxu0 %v1334_v46 }
 0x4cb   :  { %4284 = vmatpush3.msra.mxu0 %v1334_v46  ;;  %v1696_v46 = vld [vmem:[#allocation11 + $0xf8] sm:$0xff] }
 0x4cc   :  { %4285 = vmatprep.subr.mxu0 %v1333_v48  ;;  %4377 = vmatprep.subr.mxu1 %v1696_v46 }
 0x4cd   :  { %4286 = vmatpush3.msra.mxu0 %v1333_v48  ;;  %v1695_v48 = vld [vmem:[#allocation11 + $0xf0] sm:$0xff] }
 0x4ce   :  { %4287 = vmatprep.subr.mxu0 %v1332_v50 }
 0x4cf   :  { %4288 = vmatpush3.msra.mxu0 %v1332_v50  ;;  %v1694_v50 = vld [vmem:[#allocation11 + $0xe8] sm:$0xff] }
 0x4d0   :  { %4289 = vmatprep.subr.mxu0 %v1331_v52 }
 0x4d1   :  { %4290 = vmatpush3.msra.mxu0 %v1331_v52  ;;  %v1693_v52 = vld [vmem:[#allocation11 + $0xe0] sm:$0xff] }
 0x4d2   :  { %4291 = vmatprep.subr.mxu0 %v1330_v54 }
 0x4d3   :  { %4292 = vmatpush3.msra.mxu0 %v1330_v54  ;;  %v1692_v54 = vld [vmem:[#allocation11 + $0xd8] sm:$0xff] }
 0x4d4   :  { %4293 = vmatprep.subr.mxu0 %v1329_v56 }
 0x4d5   :  { %4294 = vmatpush3.msra.mxu0 %v1329_v56  ;;  %v1691_v56 = vld [vmem:[#allocation11 + $0xd0] sm:$0xff] }
 0x4d6   :  { %4339 = vmatprep.subr.mxu0 %v1535_v58 }
 0x572   :  { %v1202_v5 = vpop.f32.mrf.mxu0 }
 0x573   :  { %v1283_v6 = vrot.slane %v1202_v5, %v5322_v60  ;;  %v1669_v5 = vld [vmem:[#allocation11 + $0x48] sm:$0xff] }
 0x574   :  { %v4257_v7 = vpop.f32.mrf.mxu0 }
 0x575   :  { %v1284_v8 = vmul.f32 %v1283_v6, %v5325_v1  ;;  %v1285_v10 = vmul.f32 %v1283_v6, %v5327_v2  ;;  %v1286_v11 = vmul.f32 %v1283_v6, %v5329_v3  ;;  %v1287_v12 = vmul.f32 %v1283_v6, %v5331_v4  ;;  %v1534_v1 = vld [vmem:[#allocation10 + $0x170] sm:$0xff]  ;;  %v1533_v2 = vld [vmem:[#allocation10 + $0x168] sm:$0xff]  ;;  %v1532_v3 = vld [vmem:[#allocation10 + $0x160] sm:$0xff] }
 0x576   :  { %v1276_v9 = vpop.f32.mrf.mxu0  ;;  %v1685_v6 = vld [vmem:[#allocation11 + $0xa0] sm:$0xff] }
 0x577   :  { %v1291_v13 = vrot.slane %v1276_v9, %v5322_v60  ;;  %v1668_v7 = vld [vmem:[#allocation11 + $0x40] sm:$0xff]  ;;  %v1667_v9 = vld [vmem:[#allocation11 + $0x38] sm:$0xff] }
 0x578   :  { %v4262_v14 = vpop.f32.mrf.mxu0 }
 0x579   :  { %v1292_v15 = vadd.f32 %v1291_v13, %v1284_v8  ;;  %v1293_v16 = vadd.f32 %v1291_v13, %v1285_v10  ;;  %v1294_v17 = vadd.f32 %v1291_v13, %v1286_v11  ;;  %v1295_v18 = vadd.f32 %v1291_v13, %v1287_v12  ;;  %v1684_v8 = vld [vmem:[#allocation11 + $0x98] sm:$0xff]  ;;  %v1683_v10 = vld [vmem:[#allocation11 + $0x90] sm:$0xff]  ;;  %v1682_v12 = vld [vmem:[#allocation11 + $0x88] sm:$0xff] }
 0x57a   :  { %v1666_v11 = vld [vmem:[#allocation11 + $0x30] sm:$0xff]  ;;  %v1665_v13 = vld [vmem:[#allocation11 + $0x28] sm:$0xff]  ;;  %v1681_v14 = vld [vmem:[#allocation11 + $0x80] sm:$0xff] }
 0x57b   :  { %v1296_v19 = vmax.f32 %v1292_v15, 0.0  ;;  %v1297_v20 = vmax.f32 %v1293_v16, 0.0  ;;  %v1298_v21 = vmax.f32 %v1294_v17, 0.0  ;;  %v1299_v22 = vmax.f32 %v1295_v18, 0.0  ;;  %v1664_v15 = vld [vmem:[#allocation11 + $0x20] sm:$0xff]  ;;  %v1887_v16 = vld [vmem:[#allocation11 + $0x178] sm:$0xff] }
 0x57c   :  { %v1663_v17 = vld [vmem:[#allocation11 + $0x18] sm:$0xff]  ;;  %v1662_v18 = vld [vmem:[#allocation11 + $0x10] sm:$0xff] }
 0x57d   :  { %1300 = vst [vmem:[#allocation3 + $0x1] sm:$0xff] %v1296_v19  ;;  %1301 = vst [vmem:[#allocation3 + $0x9] sm:$0xff] %v1297_v20  ;;  %4295 = vmatprep.mubr.f32.mxu0 %v1296_v19  ;;  %v1661_v19 = vld [vmem:[#allocation11 + $0x8] sm:$0xff] }
 0x57e   :  { %1302 = vst [vmem:[#allocation3 + $0x19] sm:$0xff] %v1298_v21  ;;  %1303 = vst [vmem:[#allocation3 + $0x21] sm:$0xff] %v1299_v22  ;;  %4296 = vmatmul.mubr.f32.vlgmr.msra.gmra.mxu0 %v1297_v20  ;;  %v1660_v20 = vld [vmem:[#allocation11] sm:$0xff] }
 0x57f   :  { %4340 = vmatpush3.msra.mxu0 %v1535_v58  ;;  %4298 = vmatprep.mubr.f32.mxu0 %v1298_v21  ;;  %v1689_v58 = vld [vmem:[#allocation11 + $0xc0] sm:$0xff] }
 0x580   :  { %4341 = vmatprep.subr.mxu0 %v1534_v1 }
 0x581   :  { %4342 = vmatpush3.msra.mxu0 %v1534_v1 }
 0x582   :  { %4343 = vmatprep.subr.mxu0 %v1533_v2  ;;  %4299 = vmatmul.mubr.f32.gmra.mxu0 %v1299_v22 }
 0x583   :  { %4344 = vmatpush3.msra.mxu0 %v1533_v2 }
 0x584   :  { %v1304_v4 = vld [vmem:[#allocation3] sm:$0xff]  ;;  %v1305_v23 = vld [vmem:[#allocation3 + $0x8] sm:$0xff]  ;;  %4345 = vmatprep.subr.mxu0 %v1532_v3 }
 0x585   :  { %4333 = vmatprep.mubr.f32.mxu1 %v1304_v4  ;;  %v1515_v25 = vld [vmem:[#allocation3 + $0x2] sm:$0xff]  ;;  %4346 = vmatpush3.msra.mxu0 %v1532_v3  ;;  %v1306_v27 = vld [vmem:[#allocation3 + $0x18] sm:$0xff]  ;;  %v1516_v43 = vld [vmem:[#allocation3 + $0xa] sm:$0xff] }
 0x586   :  { %4334 = vmatmul.mubr.f32.vlgmr.msra.gmra.mxu1 %v1305_v23  ;;  %4371 = vmatprep.mubr.f32.mxu0 %v1515_v25  ;;  %v1307_v30 = vld [vmem:[#allocation3 + $0x20] sm:$0xff] }
 0x587   :  { %4336 = vmatprep.mubr.f32.mxu1 %v1306_v27  ;;  %4347 = vmatprep.subr.mxu0 %v1531_v24  ;;  %v1517_v44 = vld [vmem:[#allocation3 + $0x1a] sm:$0xff]  ;;  %v1518_v45 = vld [vmem:[#allocation3 + $0x22] sm:$0xff]  ;;  %v3555_v27 = vld [vmem:[%s5735_s9] ss:$0 sm:$0xff] }
 0x588   :  { %4348 = vmatpush3.msra.mxu0 %v1531_v24  ;;  %4378 = vmatpush3.msra.mxu1 %v1696_v46 }
 0x589   :  { %4349 = vmatprep.subr.mxu0 %v1530_v28  ;;  %4379 = vmatprep.subr.mxu1 %v1695_v48 }
 0x58a   :  { %4337 = vmatmul.mubr.f32.gmra.mxu1 %v1307_v30  ;;  %4350 = vmatpush3.msra.mxu0 %v1530_v28 }
 0x58b   :  { %4351 = vmatprep.subr.mxu0 %v1529_v29  ;;  %4380 = vmatpush3.msra.mxu1 %v1695_v48 }
 0x58c   :  { %4352 = vmatpush3.msra.mxu0 %v1529_v29  ;;  %4381 = vmatprep.subr.mxu1 %v1694_v50 }
 0x58d   :  { %4353 = vmatprep.subr.mxu0 %v1528_v32  ;;  %4382 = vmatpush3.msra.mxu1 %v1694_v50 }
 0x58e   :  { %4354 = vmatpush3.msra.mxu0 %v1528_v32  ;;  %4383 = vmatprep.subr.mxu1 %v1693_v52 }
 0x58f   :  { %4355 = vmatprep.subr.mxu0 %v1527_v33  ;;  %4384 = vmatpush3.msra.mxu1 %v1693_v52 }
 0x590   :  { %4356 = vmatpush3.msra.mxu0 %v1527_v33  ;;  %4385 = vmatprep.subr.mxu1 %v1692_v54 }
 0x591   :  { %4357 = vmatprep.subr.mxu0 %v1526_v34  ;;  %4386 = vmatpush3.msra.mxu1 %v1692_v54 }
 0x592   :  { %4358 = vmatpush3.msra.mxu0 %v1526_v34  ;;  %4387 = vmatprep.subr.mxu1 %v1691_v56 }
 0x593   :  { %4359 = vmatprep.subr.mxu0 %v1525_v36  ;;  %4388 = vmatpush3.msra.mxu1 %v1691_v56  ;;  %v1646_v56 = vld [vmem:[%s5770_s29 + $0x10] sm:$0xff] }
 0x594   :  { %4360 = vmatpush3.msra.mxu0 %v1525_v36  ;;  %4389 = vmatprep.subr.mxu1 %v1690_v57 }
 0x595   :  { %4361 = vmatprep.subr.mxu0 %v1524_v37  ;;  %4390 = vmatpush3.msra.mxu1 %v1690_v57 }
 0x596   :  { %4362 = vmatpush3.msra.mxu0 %v1524_v37  ;;  %4391 = vmatprep.subr.mxu1 %v1689_v58 }
 0x597   :  { %4363 = vmatprep.subr.mxu0 %v1523_v39  ;;  %4392 = vmatpush3.msra.mxu1 %v1689_v58 }
 0x598   :  { %4364 = vmatpush3.msra.mxu0 %v1523_v39  ;;  %4393 = vmatprep.subr.mxu1 %v1688_v59 }
 0x599   :  { %4365 = vmatprep.subr.mxu0 %v1522_v40  ;;  %4394 = vmatpush3.msra.mxu1 %v1688_v59  ;;  %v1886_v59 = vld [vmem:[#allocation11 + $0x170] sm:$0xff] }
 0x59a   :  { %4366 = vmatpush3.msra.mxu0 %v1522_v40  ;;  %4395 = vmatprep.subr.mxu1 %v1687_v61 }
 0x59b   :  { %4367 = vmatprep.subr.mxu0 %v1521_v41  ;;  %4396 = vmatpush3.msra.mxu1 %v1687_v61  ;;  %v1885_v61 = vld [vmem:[#allocation11 + $0x168] sm:$0xff] }
 0x59c   :  { %4368 = vmatpush3.msra.mxu0 %v1521_v41  ;;  %4397 = vmatprep.subr.mxu1 %v1686_v63 }
 0x59d   :  { %4369 = vmatprep.subr.mxu0 %v1520_v42  ;;  %4398 = vmatpush3.msra.mxu1 %v1686_v63 }
 0x59e   :  { %4370 = vmatpush3.msra.mxu0 %v1520_v42  ;;  %4399 = vmatprep.subr.mxu1 %v1685_v6 }
 0x59f   :  { %4372 = vmatmul.mubr.f32.vlgmr.msra.gmra.mxu0 %v1516_v43  ;;  %4415 = vmatprep.subr.mxu0 %v1675_v47  ;;  %v1645_v43 = vld [vmem:[%s5770_s29 + $0x8] sm:$0xff] }
 0x5a0   :  { %4374 = vmatprep.mubr.f32.mxu0 %v1517_v44  ;;  %4416 = vmatpush3.msra.mxu0 %v1675_v47 }
 0x5a1   :  { %4417 = vmatprep.subr.mxu0 %v1674_v49  ;;  %4400 = vmatpush3.msra.mxu1 %v1685_v6 }
 0x5a2   :  { %4418 = vmatpush3.msra.mxu0 %v1674_v49  ;;  %4401 = vmatprep.subr.mxu1 %v1684_v8  ;;  %v1644_v49 = vld [vmem:[%s5770_s29] sm:$0xff] }
 0x5a3   :  { %4375 = vmatmul.mubr.f32.gmra.mxu0 %v1518_v45  ;;  %4419 = vmatprep.subr.mxu0 %v1673_v51 }
 0x5a4   :  { %4420 = vmatpush3.msra.mxu0 %v1673_v51  ;;  %4402 = vmatpush3.msra.mxu1 %v1684_v8 }
 0x5a5   :  { %4421 = vmatprep.subr.mxu0 %v1672_v53  ;;  %4403 = vmatprep.subr.mxu1 %v1683_v10 }
 0x5a6   :  { %4422 = vmatpush3.msra.mxu0 %v1672_v53  ;;  %4404 = vmatpush3.msra.mxu1 %v1683_v10  ;;  %v1647_v53 = vld [vmem:[%s5770_s29 + $0x18] sm:$0xff] }
 0x5a7   :  { %4423 = vmatprep.subr.mxu0 %v1671_v55  ;;  %4405 = vmatprep.subr.mxu1 %v1682_v12  ;;  %v1881_v10 = vld [vmem:[#allocation11 + $0x148] sm:$0xff] }
 0x5a8   :  { %4424 = vmatpush3.msra.mxu0 %v1671_v55  ;;  %4406 = vmatpush3.msra.mxu1 %v1682_v12  ;;  %v1879_v12 = vld [vmem:[#allocation11 + $0x138] sm:$0xff] }
 0x5a9   :  { %4425 = vmatprep.subr.mxu0 %v1670_v62  ;;  %4407 = vmatprep.subr.mxu1 %v1681_v14 }
 0x5aa   :  { %4426 = vmatpush3.msra.mxu0 %v1670_v62  ;;  %4408 = vmatpush3.msra.mxu1 %v1681_v14  ;;  %v1884_v62 = vld [vmem:[#allocation11 + $0x160] sm:$0xff]  ;;  %v1877_v14 = vld [vmem:[#allocation11 + $0x128] sm:$0xff] }
 0x5ab   :  { %4427 = vmatprep.subr.mxu0 %v1669_v5  ;;  %4453 = vmatprep.subr.mxu1 %v1887_v16 }
 0x5ac   :  { %4428 = vmatpush3.msra.mxu0 %v1669_v5 }
 0x5ad   :  { %4429 = vmatprep.subr.mxu0 %v1668_v7 }
 0x5ae   :  { %4430 = vmatpush3.msra.mxu0 %v1668_v7  ;;  %v1882_v7 = vld [vmem:[#allocation11 + $0x150] sm:$0xff] }
 0x5af   :  { %4431 = vmatprep.subr.mxu0 %v1667_v9 }
 0x5b0   :  { %4432 = vmatpush3.msra.mxu0 %v1667_v9 }
 0x5b1   :  { %4433 = vmatprep.subr.mxu0 %v1666_v11 }
 0x5b2   :  { %4434 = vmatpush3.msra.mxu0 %v1666_v11  ;;  %v1880_v11 = vld [vmem:[#allocation11 + $0x140] sm:$0xff] }
 0x5b3   :  { %4435 = vmatprep.subr.mxu0 %v1665_v13 }
 0x5b4   :  { %4436 = vmatpush3.msra.mxu0 %v1665_v13  ;;  %v1878_v13 = vld [vmem:[#allocation11 + $0x130] sm:$0xff] }
 0x5b5   :  { %4437 = vmatprep.subr.mxu0 %v1664_v15 }
 0x5b6   :  { %4438 = vmatpush3.msra.mxu0 %v1664_v15  ;;  %v1876_v15 = vld [vmem:[#allocation11 + $0x120] sm:$0xff] }
 0x5b7   :  { %4439 = vmatprep.subr.mxu0 %v1663_v17 }
 0x5b8   :  { %4440 = vmatpush3.msra.mxu0 %v1663_v17  ;;  %v1874_v17 = vld [vmem:[#allocation11 + $0x110] sm:$0xff] }
 0x5b9   :  { %4441 = vmatprep.subr.mxu0 %v1662_v18 }
 0x5ba   :  { %4442 = vmatpush3.msra.mxu0 %v1662_v18  ;;  %v1873_v18 = vld [vmem:[#allocation11 + $0x108] sm:$0xff] }
 0x5bb   :  { %4443 = vmatprep.subr.mxu0 %v1661_v19 }
 0x5bc   :  { %4444 = vmatpush3.msra.mxu0 %v1661_v19  ;;  %v1872_v19 = vld [vmem:[#allocation11 + $0x100] sm:$0xff] }
 0x5bd   :  { %4445 = vmatprep.subr.mxu0 %v1660_v20 }
 0x5be   :  { %4446 = vmatpush3.msra.mxu0 %v1660_v20 }
 0x63e   :  { %v4297_v21 = vpop.f32.mrf.mxu0 }
 0x640   :  { %v1411_v1 = vpop.f32.mrf.mxu0 }
 0x642   :  { %v4300_v3 = vpop.f32.mrf.mxu0 }
 0x644   :  { %v1421_v23 = vpop.f32.mrf.mxu0 }
 0x646   :  { %v4335_v22 = vpop.f32.mrf.mxu1 }
 0x647   :  { %v1502_v24 = vadd.f32 %v4335_v22, %v4297_v21 }
 0x648   :  { %v1496_v2 = vpop.f32.mrf.mxu1 }
 0x649   :  { %v1497_v28 = vadd.f32 %v1496_v2, %v1411_v1  ;;  %v2036_v1 = vld [vmem:[#allocation13 + $0xf8] sm:$0xff]  ;;  %v2035_v2 = vld [vmem:[#allocation13 + $0xf0] sm:$0xff] }
 0x64a   :  { %v4338_v4 = vpop.f32.mrf.mxu1  ;;  %4491 = vmatprep.subr.mxu0 %v2036_v1 }
 0x64b   :  { %v1512_v33 = vadd.f32 %v4338_v4, %v4300_v3  ;;  %v2034_v3 = vld [vmem:[#allocation13 + $0xe8] sm:$0xff]  ;;  %v2015_v4 = vld [vmem:[#allocation13 + $0x78] sm:$0xff] }
 0x64c   :  { %v1506_v30 = vpop.f32.mrf.mxu1 }
 0x64d   :  { %v1507_v39 = vadd.f32 %v1506_v30, %v1421_v23  ;;  %v2014_v23 = vld [vmem:[#allocation13 + $0x70] sm:$0xff]  ;;  %v2030_v30 = vld [vmem:[#allocation13 + $0xc8] sm:$0xff] }
 0x65f   :  { %v4373_v25 = vpop.f32.mrf.mxu0 }
 0x660   :  { %v1622_v29 = vadd.f32 %v4373_v25, %v1502_v24  ;;  %v2033_v24 = vld [vmem:[#allocation13 + $0xe0] sm:$0xff]  ;;  %v2032_v25 = vld [vmem:[#allocation13 + $0xd8] sm:$0xff] }
 0x661   :  { %v1602_v32 = vpop.f32.mrf.mxu0 }
 0x662   :  { %v1633_v34 = vadd.f32 %v3555_v27, %v1622_v29  ;;  %v1621_v36 = vadd.f32 %v1602_v32, %v1497_v28  ;;  %v2031_v28 = vld [vmem:[#allocation13 + $0xd0] sm:$0xff]  ;;  %v2012_v29 = vld [vmem:[#allocation13 + $0x60] sm:$0xff]  ;;  %v2011_v32 = vld [vmem:[#allocation13 + $0x58] sm:$0xff] }
 0x663   :  { %v4376_v37 = vpop.f32.mrf.mxu0 }
 0x664   :  { %v1637_v40 = vadd.f32 %v1633_v34, %v5209_v26  ;;  %v1632_v41 = vadd.f32 %v3555_v27, %v1621_v36  ;;  %v1624_v42 = vadd.f32 %v4376_v37, %v1512_v33  ;;  %v2029_v33 = vld [vmem:[#allocation13 + $0xc0] sm:$0xff]  ;;  %v2010_v34 = vld [vmem:[#allocation13 + $0x50] sm:$0xff]  ;;  %v2009_v36 = vld [vmem:[#allocation13 + $0x48] sm:$0xff] }
 0x665   :  { %v1612_v44 = vpop.f32.mrf.mxu0  ;;  %v2028_v37 = vld [vmem:[#allocation13 + $0xb8] sm:$0xff] }
 0x666   :  { %v1641_v45 = vmax.f32 %v1637_v40, 0.0  ;;  %v1636_v46 = vadd.f32 %v1632_v41, %v5212_v31  ;;  %v1635_v47 = vadd.f32 %v3555_v27, %v1624_v42  ;;  %v1623_v48 = vadd.f32 %v1612_v44, %v1507_v39  ;;  %v2027_v39 = vld [vmem:[#allocation13 + $0xb0] sm:$0xff]  ;;  %v2026_v40 = vld [vmem:[#allocation13 + $0xa8] sm:$0xff]  ;;  %v2025_v41 = vld [vmem:[#allocation13 + $0xa0] sm:$0xff] }
 0x667   :  { %v2008_v42 = vld [vmem:[#allocation13 + $0x40] sm:$0xff]  ;;  %v2007_v44 = vld [vmem:[#allocation13 + $0x38] sm:$0xff] }
 0x668   :  { %v1649_v50 = vadd.f32 %v1645_v43, %v1641_v45  ;;  %v1640_v51 = vmax.f32 %v1636_v46, 0.0  ;;  %v1639_v26 = vadd.f32 %v1635_v47, %v5215_v35  ;;  %v1634_v52 = vadd.f32 %v3555_v27, %v1623_v48  ;;  %v2013_v27 = vld [vmem:[#allocation13 + $0x68] sm:$0xff]  ;;  %v2024_v43 = vld [vmem:[#allocation13 + $0x98] sm:$0xff]  ;;  %v2023_v45 = vld [vmem:[#allocation13 + $0x90] sm:$0xff] }
 0x669   :  { %v2006_v46 = vld [vmem:[#allocation13 + $0x30] sm:$0xff]  ;;  %v2022_v47 = vld [vmem:[#allocation13 + $0x88] sm:$0xff] }
 0x66a   :  { %1653 = vst [vmem:[#allocation3 + $0x9] sm:$0xff] %v1649_v50  ;;  %v1648_v54 = vadd.f32 %v1644_v49, %v1640_v51  ;;  %v1643_v55 = vmax.f32 %v1639_v26, 0.0  ;;  %v1638_v31 = vadd.f32 %v1634_v52, %v5218_v38  ;;  %v1883_v38 = vld [vmem:[#allocation11 + $0x158] sm:$0xff]  ;;  %v2005_v48 = vld [vmem:[#allocation13 + $0x28] sm:$0xff]  ;;  %v2021_v49 = vld [vmem:[#allocation13 + $0x80] sm:$0xff] }
 0x66b   :  { %v2227_v51 = vld [vmem:[#allocation13 + $0x178] sm:$0xff]  ;;  %v2002_v52 = vld [vmem:[#allocation13 + $0x10] sm:$0xff] }
 0x66c   :  { %1652 = vst [vmem:[#allocation3 + $0x1] sm:$0xff] %v1648_v54  ;;  %v1651_v57 = vadd.f32 %v1647_v53, %v1643_v55  ;;  %v1642_v58 = vmax.f32 %v1638_v31, 0.0  ;;  %4409 = vmatprep.mubr.f32.mxu1 %v1648_v54  ;;  %v2003_v26 = vld [vmem:[#allocation13 + $0x18] sm:$0xff]  ;;  %v2001_v53 = vld [vmem:[#allocation13 + $0x8] sm:$0xff]  ;;  %v2000_v54 = vld [vmem:[#allocation13] sm:$0xff] }
 0x66d   :  { %4410 = vmatmul.mubr.f32.vlgmr.msra.gmra.mxu1 %v1649_v50  ;;  %v2004_v50 = vld [vmem:[#allocation13 + $0x20] sm:$0xff] }
 0x66e   :  { %1655 = vst [vmem:[#allocation3 + $0x21] sm:$0xff] %v1651_v57  ;;  %v1650_v35 = vadd.f32 %v1646_v56, %v1642_v58  ;;  %4454 = vmatpush3.msra.mxu1 %v1887_v16  ;;  %v1875_v16 = vld [vmem:[#allocation11 + $0x118] sm:$0xff] }
 0x66f   :  { %4455 = vmatprep.subr.mxu1 %v1886_v59 }
 0x670   :  { %1654 = vst [vmem:[#allocation3 + $0x19] sm:$0xff] %v1650_v35  ;;  %4456 = vmatpush3.msra.mxu1 %v1886_v59  ;;  %4412 = vmatprep.mubr.f32.mxu1 %v1650_v35 }
 0x671   :  { %4457 = vmatprep.subr.mxu1 %v1885_v61  ;;  %4413 = vmatmul.mubr.f32.gmra.mxu1 %v1651_v57  ;;  %v1868_v20 = vld [vmem:[#allocation3 + $0xa] sm:$0xff] }
 0x672   :  { %4458 = vmatpush3.msra.mxu1 %v1885_v61 }
 0x673   :  { %v1656_v63 = vld [vmem:[#allocation3] sm:$0xff]  ;;  %v1657_v5 = vld [vmem:[#allocation3 + $0x8] sm:$0xff]  ;;  %4459 = vmatprep.subr.mxu1 %v1884_v62 }
 0x674   :  { %v1867_v6 = vld [vmem:[#allocation3 + $0x2] sm:$0xff]  ;;  %4447 = vmatprep.mubr.f32.mxu0 %v1656_v63  ;;  %4460 = vmatpush3.msra.mxu1 %v1884_v62 }
 0x675   :  { %4485 = vmatprep.mubr.f32.mxu1 %v1867_v6  ;;  %4448 = vmatmul.mubr.f32.vlgmr.msra.gmra.mxu0 %v1657_v5  ;;  %v1870_v22 = vld [vmem:[#allocation3 + $0x22] sm:$0xff] }
 0x676   :  { %4461 = vmatprep.subr.mxu1 %v1883_v38  ;;  %4492 = vmatpush3.msra.mxu0 %v2036_v1 }
 0x677   :  { %v1658_v8 = vld [vmem:[#allocation3 + $0x18] sm:$0xff]  ;;  %v1659_v9 = vld [vmem:[#allocation3 + $0x20] sm:$0xff]  ;;  %4462 = vmatpush3.msra.mxu1 %v1883_v38  ;;  %4493 = vmatprep.subr.mxu0 %v2035_v2  ;;  %v3556_v38 = vld [vmem:[%s5739_s13] ss:$0 sm:$0xff] }
 0x678   :  { %4450 = vmatprep.mubr.f32.mxu0 %v1658_v8  ;;  %4463 = vmatprep.subr.mxu1 %v1882_v7  ;;  %v1869_v21 = vld [vmem:[#allocation3 + $0x1a] sm:$0xff] }
 0x679   :  { %4451 = vmatmul.mubr.f32.gmra.mxu0 %v1659_v9  ;;  %4464 = vmatpush3.msra.mxu1 %v1882_v7 }
 0x67a   :  { %4465 = vmatprep.subr.mxu1 %v1881_v10  ;;  %4494 = vmatpush3.msra.mxu0 %v2035_v2  ;;  %v2225_v2 = vld [vmem:[#allocation13 + $0x168] sm:$0xff] }
 0x67b   :  { %4466 = vmatpush3.msra.mxu1 %v1881_v10  ;;  %4495 = vmatprep.subr.mxu0 %v2034_v3 }
 0x67c   :  { %4467 = vmatprep.subr.mxu1 %v1880_v11  ;;  %4496 = vmatpush3.msra.mxu0 %v2034_v3  ;;  %v2224_v3 = vld [vmem:[#allocation13 + $0x160] sm:$0xff] }
 0x67d   :  { %4468 = vmatpush3.msra.mxu1 %v1880_v11  ;;  %4497 = vmatprep.subr.mxu0 %v2033_v24 }
 0x67e   :  { %4469 = vmatprep.subr.mxu1 %v1879_v12  ;;  %4498 = vmatpush3.msra.mxu0 %v2033_v24 }
 0x67f   :  { %4470 = vmatpush3.msra.mxu1 %v1879_v12  ;;  %4499 = vmatprep.subr.mxu0 %v2032_v25 }
 0x680   :  { %4471 = vmatprep.subr.mxu1 %v1878_v13  ;;  %4500 = vmatpush3.msra.mxu0 %v2032_v25 }
 0x681   :  { %4472 = vmatpush3.msra.mxu1 %v1878_v13  ;;  %4501 = vmatprep.subr.mxu0 %v2031_v28 }
 0x682   :  { %4473 = vmatprep.subr.mxu1 %v1877_v14  ;;  %4502 = vmatpush3.msra.mxu0 %v2031_v28 }
 0x683   :  { %4474 = vmatpush3.msra.mxu1 %v1877_v14  ;;  %4503 = vmatprep.subr.mxu0 %v2030_v30 }
 0x684   :  { %4475 = vmatprep.subr.mxu1 %v1876_v15  ;;  %4504 = vmatpush3.msra.mxu0 %v2030_v30  ;;  %v2221_v30 = vld [vmem:[#allocation13 + $0x148] sm:$0xff] }
 0x685   :  { %4476 = vmatpush3.msra.mxu1 %v1876_v15  ;;  %4505 = vmatprep.subr.mxu0 %v2029_v33 }
 0x686   :  { %4477 = vmatprep.subr.mxu1 %v1875_v16  ;;  %4506 = vmatpush3.msra.mxu0 %v2029_v33  ;;  %v2219_v33 = vld [vmem:[#allocation13 + $0x138] sm:$0xff] }
 0x687   :  { %4478 = vmatpush3.msra.mxu1 %v1875_v16  ;;  %4507 = vmatprep.subr.mxu0 %v2028_v37 }
 0x688   :  { %4479 = vmatprep.subr.mxu1 %v1874_v17  ;;  %4508 = vmatpush3.msra.mxu0 %v2028_v37  ;;  %v2216_v37 = vld [vmem:[#allocation13 + $0x120] sm:$0xff] }
 0x689   :  { %4480 = vmatpush3.msra.mxu1 %v1874_v17  ;;  %4509 = vmatprep.subr.mxu0 %v2027_v39 }
 0x68a   :  { %4481 = vmatprep.subr.mxu1 %v1873_v18  ;;  %4510 = vmatpush3.msra.mxu0 %v2027_v39  ;;  %v2215_v39 = vld [vmem:[#allocation13 + $0x118] sm:$0xff] }
 0x68b   :  { %4482 = vmatpush3.msra.mxu1 %v1873_v18  ;;  %4511 = vmatprep.subr.mxu0 %v2026_v40 }
 0x68c   :  { %4483 = vmatprep.subr.mxu1 %v1872_v19  ;;  %4512 = vmatpush3.msra.mxu0 %v2026_v40  ;;  %v2214_v40 = vld [vmem:[#allocation13 + $0x110] sm:$0xff] }
 0x68d   :  { %4484 = vmatpush3.msra.mxu1 %v1872_v19  ;;  %4513 = vmatprep.subr.mxu0 %v2025_v41 }
 0x68e   :  { %4486 = vmatmul.mubr.f32.vlgmr.msra.gmra.mxu1 %v1868_v20  ;;  %4529 = vmatprep.subr.mxu1 %v2015_v4 }
 0x68f   :  { %4488 = vmatprep.mubr.f32.mxu1 %v1869_v21  ;;  %4530 = vmatpush3.msra.mxu1 %v2015_v4  ;;  %v2223_v4 = vld [vmem:[#allocation13 + $0x158] sm:$0xff] }
 0x690   :  { %4531 = vmatprep.subr.mxu1 %v2014_v23  ;;  %4514 = vmatpush3.msra.mxu0 %v2025_v41  ;;  %v2213_v41 = vld [vmem:[#allocation13 + $0x108] sm:$0xff] }
 0x691   :  { %4532 = vmatpush3.msra.mxu1 %v2014_v23  ;;  %4515 = vmatprep.subr.mxu0 %v2024_v43 }
 0x692   :  { %4489 = vmatmul.mubr.f32.gmra.mxu1 %v1870_v22  ;;  %4533 = vmatprep.subr.mxu1 %v2013_v27  ;;  %v2226_v22 = vld [vmem:[#allocation13 + $0x170] sm:$0xff] }
 0x693   :  { %4534 = vmatpush3.msra.mxu1 %v2013_v27  ;;  %4516 = vmatpush3.msra.mxu0 %v2024_v43  ;;  %v2222_v27 = vld [vmem:[#allocation13 + $0x150] sm:$0xff] }
 0x694   :  { %4535 = vmatprep.subr.mxu1 %v2012_v29  ;;  %4517 = vmatprep.subr.mxu0 %v2023_v45 }
 0x695   :  { %4536 = vmatpush3.msra.mxu1 %v2012_v29  ;;  %4518 = vmatpush3.msra.mxu0 %v2023_v45 }
 0x696   :  { %4537 = vmatprep.subr.mxu1 %v2011_v32  ;;  %4519 = vmatprep.subr.mxu0 %v2022_v47 }
 0x697   :  { %4538 = vmatpush3.msra.mxu1 %v2011_v32  ;;  %4520 = vmatpush3.msra.mxu0 %v2022_v47  ;;  %v2220_v32 = vld [vmem:[#allocation13 + $0x140] sm:$0xff] }
 0x698   :  { %4539 = vmatprep.subr.mxu1 %v2010_v34  ;;  %4521 = vmatprep.subr.mxu0 %v2021_v49  ;;  %v5406_v47 = vld [vmem:[%s5746_s20 + $0x70] sm:$0xff] }
 0x699   :  { %4540 = vmatpush3.msra.mxu1 %v2010_v34  ;;  %4522 = vmatpush3.msra.mxu0 %v2021_v49  ;;  %v2218_v34 = vld [vmem:[#allocation13 + $0x130] sm:$0xff] }
 0x69a   :  { %4541 = vmatprep.subr.mxu1 %v2009_v36  ;;  %4567 = vmatprep.subr.mxu0 %v2227_v51  ;;  %v5422_v49 = vld [vmem:[%s5746_s20 + $0x60] sm:$0xff] }
 0x69b   :  { %4542 = vmatpush3.msra.mxu1 %v2009_v36  ;;  %v2217_v36 = vld [vmem:[#allocation13 + $0x128] sm:$0xff] }
 0x69c   :  { %4543 = vmatprep.subr.mxu1 %v2008_v42 }
 0x69d   :  { %4544 = vmatpush3.msra.mxu1 %v2008_v42  ;;  %v2212_v42 = vld [vmem:[#allocation13 + $0x100] sm:$0xff] }
 0x69e   :  { %4545 = vmatprep.subr.mxu1 %v2007_v44 }
 0x69f   :  { %4546 = vmatpush3.msra.mxu1 %v2007_v44 }
 0x6a0   :  { %4547 = vmatprep.subr.mxu1 %v2006_v46 }
 0x6a1   :  { %4548 = vmatpush3.msra.mxu1 %v2006_v46  ;;  %v5401_v46 = vld [vmem:[%s5746_s20 + $0x78] sm:$0xff] }
 0x6a2   :  { %4549 = vmatprep.subr.mxu1 %v2005_v48 }
 0x6a3   :  { %4550 = vmatpush3.msra.mxu1 %v2005_v48  ;;  %v5415_v48 = vld [vmem:[%s5746_s20 + $0x68] sm:$0xff] }
 0x6a4   :  { %4551 = vmatprep.subr.mxu1 %v2004_v50 }
 0x6a5   :  { %4552 = vmatpush3.msra.mxu1 %v2004_v50  ;;  %v5429_v50 = vld [vmem:[%s5746_s20 + $0x58] sm:$0xff] }
 0x6a6   :  { %4553 = vmatprep.subr.mxu1 %v2003_v26 }
 0x6a7   :  { %4554 = vmatpush3.msra.mxu1 %v2003_v26  ;;  %v5443_v26 = vld [vmem:[%s5746_s20 + $0x48] sm:$0xff] }
 0x6a8   :  { %4555 = vmatprep.subr.mxu1 %v2002_v52 }
 0x6a9   :  { %4556 = vmatpush3.msra.mxu1 %v2002_v52  ;;  %v5450_v52 = vld [vmem:[%s5746_s20 + $0x40] sm:$0xff] }
 0x6aa   :  { %4557 = vmatprep.subr.mxu1 %v2001_v53 }
 0x6ab   :  { %4558 = vmatpush3.msra.mxu1 %v2001_v53  ;;  %v5457_v53 = vld [vmem:[%s5746_s20 + $0x38] sm:$0xff] }
 0x6ac   :  { %4559 = vmatprep.subr.mxu1 %v2000_v54 }
 0x6ad   :  { %4560 = vmatpush3.msra.mxu1 %v2000_v54  ;;  %v5464_v54 = vld [vmem:[%s5746_s20 + $0x30] sm:$0xff] }
 0x6ae   :  { %4605 = vmatprep.subr.mxu1 %v4999_v0 }
 0x72d   :  { %v4411_v55 = vpop.f32.mrf.mxu1 }
 0x72f   :  { %v1763_v56 = vpop.f32.mrf.mxu1 }
 0x731   :  { %v4414_v58 = vpop.f32.mrf.mxu1 }
 0x733   :  { %v1773_v35 = vpop.f32.mrf.mxu1 }
 0x735   :  { %v4449_v31 = vpop.f32.mrf.mxu0 }
 0x736   :  { %v1854_v61 = vadd.f32 %v4449_v31, %v4411_v55  ;;  %v5471_v55 = vld [vmem:[%s5746_s20 + $0x28] sm:$0xff]  ;;  %v5478_v31 = vld [vmem:[%s5746_s20 + $0x20] sm:$0xff] }
 0x737   :  { %v1848_v57 = vpop.f32.mrf.mxu0 }
 0x738   :  { %v1849_v63 = vadd.f32 %v1848_v57, %v1763_v56  ;;  %v5485_v56 = vld [vmem:[%s5746_s20 + $0x18] sm:$0xff]  ;;  %v5492_v57 = vld [vmem:[%s5746_s20 + $0x10] sm:$0xff] }
 0x739   :  { %v4452_v59 = vpop.f32.mrf.mxu0 }
 0x73a   :  { %v1864_v8 = vadd.f32 %v4452_v59, %v4414_v58  ;;  %v5499_v58 = vld [vmem:[%s5746_s20 + $0x8] sm:$0xff]  ;;  %v5504_v59 = vld [vmem:[%s5746_s20] sm:$0xff] }
 0x73b   :  { %v1858_v6 = vpop.f32.mrf.mxu0 }
 0x73c   :  { %v1859_v12 = vadd.f32 %v1858_v6, %v1773_v35 }
 0x74e   :  { %v4487_v62 = vpop.f32.mrf.mxu1 }
 0x74f   :  { %v1974_v5 = vadd.f32 %v4487_v62, %v1854_v61 }
 0x750   :  { %v1954_v7 = vpop.f32.mrf.mxu1 }
 0x751   :  { %v5381_v9 = vadd.f32 %v3556_v38, %v1974_v5  ;;  %v1973_v10 = vadd.f32 %v1954_v7, %v1849_v63 }
 0x752   :  { %v4490_v11 = vpop.f32.mrf.mxu1 }
 0x753   :  { %v1989_v13 = vmax.f32 %v5381_v9, 0.0  ;;  %v5384_v14 = vadd.f32 %v3556_v38, %v1973_v10  ;;  %v1976_v15 = vadd.f32 %v4490_v11, %v1864_v8 }
 0x754   :  { %v1964_v16 = vpop.f32.mrf.mxu1 }
 0x755   :  { %1993 = vst [vmem:[#allocation4 + $0x9] sm:$0xff] %v1989_v13  ;;  %v1988_v17 = vmax.f32 %v5384_v14, 0.0  ;;  %v5387_v18 = vadd.f32 %v3556_v38, %v1976_v15  ;;  %v1975_v19 = vadd.f32 %v1964_v16, %v1859_v12  ;;  %v3557_v16 = vld [vmem:[%s5741_s15] ss:$0 sm:$0xff] }
 0x757   :  { %1992 = vst [vmem:[#allocation4 + $0x1] sm:$0xff] %v1988_v17  ;;  %v1991_v20 = vmax.f32 %v5387_v18, 0.0  ;;  %v5390_v21 = vadd.f32 %v3556_v38, %v1975_v19  ;;  %4523 = vmatprep.mubr.f32.mxu0 %v1988_v17 }
 0x758   :  { %4524 = vmatmul.mubr.f32.vlgmr.msra.gmra.mxu0 %v1989_v13 }
 0x759   :  { %1995 = vst [vmem:[#allocation4 + $0x21] sm:$0xff] %v1991_v20  ;;  %v1990_v1 = vmax.f32 %v5390_v21, 0.0  ;;  %4568 = vmatpush3.msra.mxu0 %v2227_v51  ;;  %v5436_v51 = vld [vmem:[%s5746_s20 + $0x50] sm:$0xff] }
 0x75a   :  { %4569 = vmatprep.subr.mxu0 %v2226_v22 }
 0x75b   :  { %1994 = vst [vmem:[#allocation4 + $0x19] sm:$0xff] %v1990_v1  ;;  %4570 = vmatpush3.msra.mxu0 %v2226_v22  ;;  %4526 = vmatprep.mubr.f32.mxu0 %v1990_v1 }
 0x75c   :  { %4571 = vmatprep.subr.mxu0 %v2225_v2  ;;  %4527 = vmatmul.mubr.f32.gmra.mxu0 %v1991_v20  ;;  %v2208_v43 = vld [vmem:[#allocation4 + $0xa] sm:$0xff] }
 0x75d   :  { %4572 = vmatpush3.msra.mxu0 %v2225_v2 }
 0x75e   :  { %v1996_v23 = vld [vmem:[#allocation4] sm:$0xff]  ;;  %v1997_v24 = vld [vmem:[#allocation4 + $0x8] sm:$0xff]  ;;  %4573 = vmatprep.subr.mxu0 %v2224_v3 }
 0x75f   :  { %v2207_v25 = vld [vmem:[#allocation4 + $0x2] sm:$0xff]  ;;  %4561 = vmatprep.mubr.f32.mxu1 %v1996_v23  ;;  %4574 = vmatpush3.msra.mxu0 %v2224_v3 }
 0x760   :  { %4599 = vmatprep.mubr.f32.mxu0 %v2207_v25  ;;  %4562 = vmatmul.mubr.f32.vlgmr.msra.gmra.mxu1 %v1997_v24  ;;  %v2210_v45 = vld [vmem:[#allocation4 + $0x22] sm:$0xff] }
 0x761   :  { %4575 = vmatprep.subr.mxu0 %v2223_v4  ;;  %4606 = vmatpush3.msra.mxu1 %v5401_v46 }
 0x762   :  { %v1998_v28 = vld [vmem:[#allocation4 + $0x18] sm:$0xff]  ;;  %v1999_v29 = vld [vmem:[#allocation4 + $0x20] sm:$0xff]  ;;  %4576 = vmatpush3.msra.mxu0 %v2223_v4  ;;  %4607 = vmatprep.subr.mxu1 %v4999_v0 }
 0x763   :  { %4564 = vmatprep.mubr.f32.mxu1 %v1998_v28  ;;  %4577 = vmatprep.subr.mxu0 %v2222_v27  ;;  %v2209_v44 = vld [vmem:[#allocation4 + $0x1a] sm:$0xff] }
 0x764   :  { %4565 = vmatmul.mubr.f32.gmra.mxu1 %v1999_v29  ;;  %4578 = vmatpush3.msra.mxu0 %v2222_v27 }
 0x765   :  { %4579 = vmatprep.subr.mxu0 %v2221_v30  ;;  %4637 = vmatprep.mubr.msk.f32.mxu1 %vm5000_vm2, %v4999_v0 }
 0x766   :  { %4580 = vmatpush3.msra.mxu0 %v2221_v30  ;;  %4608 = vmatpush3.msra.mxu1 %v5406_v47 }
 0x767   :  { %4581 = vmatprep.subr.mxu0 %v2220_v32  ;;  %4609 = vmatprep.subr.mxu1 %v4999_v0 }
 0x768   :  { %4582 = vmatpush3.msra.mxu0 %v2220_v32  ;;  %4610 = vmatpush3.msra.mxu1 %v5415_v48 }
 0x769   :  { %4583 = vmatprep.subr.mxu0 %v2219_v33  ;;  %4611 = vmatprep.subr.mxu1 %v4999_v0 }
 0x76a   :  { %4584 = vmatpush3.msra.mxu0 %v2219_v33  ;;  %4612 = vmatpush3.msra.mxu1 %v5422_v49 }
 0x76b   :  { %4585 = vmatprep.subr.mxu0 %v2218_v34  ;;  %4613 = vmatprep.subr.mxu1 %v4999_v0 }
 0x76c   :  { %4586 = vmatpush3.msra.mxu0 %v2218_v34  ;;  %4614 = vmatpush3.msra.mxu1 %v5429_v50 }
 0x76d   :  { %4587 = vmatprep.subr.mxu0 %v2217_v36  ;;  %4615 = vmatprep.subr.mxu1 %v4999_v0 }
 0x76e   :  { %4588 = vmatpush3.msra.mxu0 %v2217_v36  ;;  %4616 = vmatpush3.msra.mxu1 %v5436_v51 }
 0x76f   :  { %4589 = vmatprep.subr.mxu0 %v2216_v37  ;;  %4617 = vmatprep.subr.mxu1 %v4999_v0 }
 0x770   :  { %4590 = vmatpush3.msra.mxu0 %v2216_v37  ;;  %4618 = vmatpush3.msra.mxu1 %v5443_v26  ;;  %v5518_v37 = vld [vmem:[%s5747_s21] sm:$0xff] }
 0x771   :  { %4591 = vmatprep.subr.mxu0 %v2215_v39  ;;  %4619 = vmatprep.subr.mxu1 %v4999_v0 }
 0x772   :  { %4592 = vmatpush3.msra.mxu0 %v2215_v39  ;;  %4620 = vmatpush3.msra.mxu1 %v5450_v52 }
 0x773   :  { %4593 = vmatprep.subr.mxu0 %v2214_v40  ;;  %4621 = vmatprep.subr.mxu1 %v4999_v0 }
 0x774   :  { %4594 = vmatpush3.msra.mxu0 %v2214_v40  ;;  %4622 = vmatpush3.msra.mxu1 %v5457_v53 }
 0x775   :  { %4595 = vmatprep.subr.mxu0 %v2213_v41  ;;  %4623 = vmatprep.subr.mxu1 %v4999_v0 }
 0x776   :  { %4596 = vmatpush3.msra.mxu0 %v2213_v41  ;;  %4624 = vmatpush3.msra.mxu1 %v5464_v54 }
 0x777   :  { %4597 = vmatprep.subr.mxu0 %v2212_v42  ;;  %4625 = vmatprep.subr.mxu1 %v4999_v0 }
 0x778   :  { %4598 = vmatpush3.msra.mxu0 %v2212_v42  ;;  %4626 = vmatpush3.msra.mxu1 %v5471_v55 }
 0x779   :  { %4600 = vmatmul.mubr.f32.vlgmr.msra.gmra.mxu0 %v2208_v43  ;;  %4640 = vmatprep.subr.mxu0 %v4999_v0 }
 0x77a   :  { %4602 = vmatprep.mubr.f32.mxu0 %v2209_v44  ;;  %4627 = vmatprep.subr.mxu1 %v4999_v0 }
 0x77b   :  { %4628 = vmatpush3.msra.mxu1 %v5478_v31  ;;  %4641 = vmatpush3.msra.mxu0 %v5518_v37 }
 0x77c   :  { %4629 = vmatprep.subr.mxu1 %v4999_v0  ;;  %4645 = vmatprep.subr.mxu0 %v4999_v0 }
 0x77d   :  { %4603 = vmatmul.mubr.f32.gmra.mxu0 %v2210_v45  ;;  %4630 = vmatpush3.msra.mxu1 %v5485_v56 }
 0x77e   :  { %4642 = vmatprep.mubr.msk.f32.mxu0 %vm5000_vm2, %v4999_v0  ;;  %4631 = vmatprep.subr.mxu1 %v4999_v0 }
 0x77f   :  { %4632 = vmatpush3.msra.mxu1 %v5492_v57 }
 0x780   :  { %4633 = vmatprep.subr.mxu1 %v4999_v0 }
 0x781   :  { %4634 = vmatpush3.msra.mxu1 %v5499_v58 }
 0x782   :  { %4635 = vmatprep.subr.mxu1 %v4999_v0 }
 0x783   :  { %4636 = vmatpush3.msra.mxu1 %v5504_v59 }
 0x784   :  { %4680 = vmatprep.subr.mxu1 %v4999_v0 }
 0x818   :  { %v4525_v35 = vpop.f32.mrf.mxu0 }
 0x81a   :  { %v2103_v62 = vpop.f32.mrf.mxu0 }
 0x81c   :  { %v4528_v63 = vpop.f32.mrf.mxu0 }
 0x81e   :  { %v2113_v6 = vpop.f32.mrf.mxu0 }
 0x820   :  { %v4563_v61 = vpop.f32.mrf.mxu1 }
 0x821   :  { %v2194_v8 = vadd.f32 %v4563_v61, %v4525_v35  ;;  %v2784_v35 = vld [vmem:[#allocation14 + $0x78] sm:$0xff]  ;;  %v2783_v61 = vld [vmem:[#allocation14 + $0x70] sm:$0xff] }
 0x822   :  { %v2188_v38 = vpop.f32.mrf.mxu1 }
 0x823   :  { %v2189_v10 = vadd.f32 %v2188_v38, %v2103_v62  ;;  %v2782_v62 = vld [vmem:[#allocation14 + $0x68] sm:$0xff]  ;;  %v2781_v38 = vld [vmem:[#allocation14 + $0x60] sm:$0xff] }
 0x824   :  { %v4566_v5 = vpop.f32.mrf.mxu1 }
 0x825   :  { %v2204_v19 = vadd.f32 %v4566_v5, %v4528_v63  ;;  %v2780_v63 = vld [vmem:[#allocation14 + $0x58] sm:$0xff]  ;;  %v2779_v5 = vld [vmem:[#allocation14 + $0x50] sm:$0xff] }
 0x826   :  { %v2198_v11 = vpop.f32.mrf.mxu1 }
 0x827   :  { %v2199_v20 = vadd.f32 %v2198_v11, %v2113_v6  ;;  %v2590_v11 = vld [vmem:[%s5742_s16] sm:$0x1] }
 0x839   :  { %v4601_v7 = vpop.f32.mrf.mxu0 }
 0x83a   :  { %v2314_v13 = vadd.f32 %v4601_v7, %v2194_v8 }
 0x83b   :  { %v2294_v12 = vpop.f32.mrf.mxu0 }
 0x83c   :  { %v2313_v15 = vadd.f32 %v2294_v12, %v2189_v10  ;;  %v2325_v2 = vadd.f32 %v3557_v16, %v2314_v13 }
 0x83d   :  { %v4604_v17 = vpop.f32.mrf.mxu0 }
 0x83e   :  { %v2324_v22 = vadd.f32 %v3557_v16, %v2313_v15  ;;  %v2316_v3 = vadd.f32 %v4604_v17, %v2204_v19  ;;  %v2805_v15 = vld [vmem:[#allocation14 + $0xf8] sm:$0xff]  ;;  %v2804_v17 = vld [vmem:[#allocation14 + $0xf0] sm:$0xff]  ;;  %v2803_v19 = vld [vmem:[#allocation14 + $0xe8] sm:$0xff] }
 0x83f   :  { %v2304_v1 = vpop.f32.mrf.mxu0 }
 0x840   :  { %v2315_v4 = vadd.f32 %v2304_v1, %v2199_v20  ;;  %v2328_v23 = vadd.f32 %v2325_v2, %v2324_v22  ;;  %v2327_v25 = vadd.f32 %v3557_v16, %v2316_v3  ;;  %v2802_v20 = vld [vmem:[#allocation14 + $0xe0] sm:$0xff]  ;;  %v2800_v1 = vld [vmem:[#allocation14 + $0xd0] sm:$0xff] }
 0x841   :  { %v2798_v3 = vld [vmem:[#allocation14 + $0xc0] sm:$0xff] }
 0x842   :  { %v2326_v24 = vadd.f32 %v3557_v16, %v2315_v4  ;;  %v2667_v16 = vld [vmem:[%s5743_s17] sm:$0x1]  ;;  %v2797_v4 = vld [vmem:[#allocation14 + $0xb8] sm:$0xff] }
 0x844   :  { %v2329_v27 = vadd.f32 %v2328_v23, %v2326_v24  ;;  %v2796_v23 = vld [vmem:[#allocation14 + $0xb0] sm:$0xff] }
 0x846   :  { %v2330_v28 = vadd.f32 %v2329_v27, %v2327_v25  ;;  %v2794_v27 = vld [vmem:[#allocation14 + $0xa0] sm:$0xff] }
 0x848   :  { %v2331_v29 = vrot.slane %v2330_v28, 4 }
 0x84a   :  { %v2332_v30 = vadd.f32 %v2331_v29, %v2330_v28  ;;  %v2777_v28 = vld [vmem:[#allocation14 + $0x40] sm:$0xff]  ;;  %v2793_v29 = vld [vmem:[#allocation14 + $0x98] sm:$0xff] }
 0x84c   :  { %v2333_v32 = vrot.slane %v2332_v30, 2 }
 0x84e   :  { %v2334_v33 = vadd.f32 %v2333_v32, %v2332_v30  ;;  %v2776_v30 = vld [vmem:[#allocation14 + $0x38] sm:$0xff]  ;;  %v2792_v32 = vld [vmem:[#allocation14 + $0x90] sm:$0xff] }
 0x850   :  { %v2335_v34 = vrot.slane %v2334_v33, 1 }
 0x852   :  { %v2336_v36 = vadd.f32 %v2335_v34, %v2334_v33  ;;  %v2775_v33 = vld [vmem:[#allocation14 + $0x30] sm:$0xff]  ;;  %v2791_v34 = vld [vmem:[#allocation14 + $0x88] sm:$0xff] }
 0x854   :  { %4638 = vmatmul.mubr.f32.vlgmr.msra.gmra.mxu1 %v2336_v36  ;;  %v2774_v36 = vld [vmem:[#allocation14 + $0x28] sm:$0xff] }
 0x855   :  { %4682 = vmatprep.mubr.msk.f32.mxu1 %vm5000_vm2, %v4999_v0  ;;  %4681 = vmatpush3.msra.mxu1 %v5518_v37 }
 0x856   :  { %4685 = vmatprep.subr.mxu1 %v4999_v0 }
 0x914   :  { %v2419_v39 = vpop.f32.mrf.mxu1 }
 0x915   :  { %v2423_v40 = vmul.f32 0.001953125, %v2419_v39  ;;  %v2773_v39 = vld [vmem:[#allocation14 + $0x20] sm:$0xff] }
 0x916   :  { %v4639_v41 = vpop.f32.mrf.mxu1 }
 0x917   :  { %4643 = vmatmul.mubr.msk.f32.vlgmr.msra.gmra.mxu0 %vm963_vm3, %v2423_v40  ;;  %v2996_v40 = vld [vmem:[#allocation14 + $0x178] sm:$0xff] }
 0x918   :  { %4646 = vmatpush3.msra.mxu0 %v5401_v46  ;;  %4677 = vmatprep.mubr.msk.f32.mxu0 %vm5000_vm2, %v4999_v0  ;;  %v2772_v41 = vld [vmem:[#allocation14 + $0x18] sm:$0xff] }
 0x919   :  { %4647 = vmatprep.subr.mxu0 %v4999_v0 }
 0x91a   :  { %4648 = vmatpush3.msra.mxu0 %v5406_v47 }
 0x91b   :  { %4649 = vmatprep.subr.mxu0 %v4999_v0 }
 0x91c   :  { %4650 = vmatpush3.msra.mxu0 %v5415_v48 }
 0x91d   :  { %4651 = vmatprep.subr.mxu0 %v4999_v0 }
 0x91e   :  { %4652 = vmatpush3.msra.mxu0 %v5422_v49 }
 0x91f   :  { %4653 = vmatprep.subr.mxu0 %v4999_v0 }
 0x920   :  { %4654 = vmatpush3.msra.mxu0 %v5429_v50 }
 0x921   :  { %4655 = vmatprep.subr.mxu0 %v4999_v0 }
 0x922   :  { %4656 = vmatpush3.msra.mxu0 %v5436_v51 }
 0x923   :  { %4657 = vmatprep.subr.mxu0 %v4999_v0 }
 0x924   :  { %4658 = vmatpush3.msra.mxu0 %v5443_v26 }
 0x925   :  { %4659 = vmatprep.subr.mxu0 %v4999_v0 }
 0x926   :  { %4660 = vmatpush3.msra.mxu0 %v5450_v52 }
 0x927   :  { %4661 = vmatprep.subr.mxu0 %v4999_v0 }
 0x928   :  { %4662 = vmatpush3.msra.mxu0 %v5457_v53 }
 0x929   :  { %4663 = vmatprep.subr.mxu0 %v4999_v0 }
 0x92a   :  { %4664 = vmatpush3.msra.mxu0 %v5464_v54 }
 0x92b   :  { %4665 = vmatprep.subr.mxu0 %v4999_v0 }
 0x92c   :  { %4666 = vmatpush3.msra.mxu0 %v5471_v55 }
 0x92d   :  { %4667 = vmatprep.subr.mxu0 %v4999_v0 }
 0x92e   :  { %4668 = vmatpush3.msra.mxu0 %v5478_v31 }
 0x92f   :  { %4669 = vmatprep.subr.mxu0 %v4999_v0 }
 0x930   :  { %4670 = vmatpush3.msra.mxu0 %v5485_v56 }
 0x931   :  { %4671 = vmatprep.subr.mxu0 %v4999_v0 }
 0x932   :  { %4672 = vmatpush3.msra.mxu0 %v5492_v57 }
 0x933   :  { %4673 = vmatprep.subr.mxu0 %v4999_v0 }
 0x934   :  { %4674 = vmatpush3.msra.mxu0 %v5499_v58 }
 0x935   :  { %4675 = vmatprep.subr.mxu0 %v4999_v0 }
 0x936   :  { %4676 = vmatpush3.msra.mxu0 %v5504_v59 }
 0x937   :  { %4728 = vmatprep.subr.mxu0 %v2784_v35 }
 0x9d7   :  { %v2494_v42 = vpop.f32.mrf.mxu0 }
 0x9d8   :  { %v2501_v43 = vrot.slane %v2494_v42, %v5322_v60  ;;  %v2771_v42 = vld [vmem:[#allocation14 + $0x10] sm:$0xff] }
 0x9d9   :  { %v4644_v44 = vpop.f32.mrf.mxu0 }
 0x9da   :  { %v5559_v45 = vsub.f32 %v2324_v22, %v2501_v43  ;;  %v5561_v46 = vsub.f32 %v2325_v2, %v2501_v43  ;;  %v5563_v47 = vsub.f32 %v2326_v24, %v2501_v43  ;;  %v5565_v48 = vsub.f32 %v2327_v25, %v2501_v43  ;;  %v2801_v22 = vld [vmem:[#allocation14 + $0xd8] sm:$0xff]  ;;  %v2799_v2 = vld [vmem:[#allocation14 + $0xc8] sm:$0xff]  ;;  %v2769_v44 = vld [vmem:[#allocation14] sm:$0xff] }
 0x9db   :  { %v2795_v24 = vld [vmem:[#allocation14 + $0xa8] sm:$0xff] }
 0x9dc   :  { %v2506_v49 = vmul.f32 %v5559_v45, %v5559_v45  ;;  %v2507_v50 = vmul.f32 %v5561_v46, %v5561_v46  ;;  %v2508_v51 = vmul.f32 %v5563_v47, %v5563_v47  ;;  %v2509_v52 = vmul.f32 %v5565_v48, %v5565_v48  ;;  %v2778_v25 = vld [vmem:[#allocation14 + $0x48] sm:$0xff] }
 0x9dd   :  { %v2770_v43 = vld [vmem:[#allocation14 + $0x8] sm:$0xff] }
 0x9de   :  { %v2510_v26 = vadd.f32 %v2507_v50, %v2506_v49 }
 0x9e0   :  { %v2511_v53 = vadd.f32 %v2510_v26, %v2508_v51 }
 0x9e2   :  { %v2512_v54 = vadd.f32 %v2511_v53, %v2509_v52 }
 0x9e4   :  { %v2513_v55 = vrot.slane %v2512_v54, 4 }
 0x9e6   :  { %v2514_v31 = vadd.f32 %v2513_v55, %v2512_v54 }
 0x9e8   :  { %v2515_v56 = vrot.slane %v2514_v31, 2 }
 0x9ea   :  { %v2516_v57 = vadd.f32 %v2515_v56, %v2514_v31 }
 0x9ec   :  { %v2517_v58 = vrot.slane %v2516_v57, 1 }
 0x9ee   :  { %v2518_v59 = vadd.f32 %v2517_v58, %v2516_v57 }
 0x9f0   :  { %4678 = vmatmul.mubr.f32.vlgmr.msra.gmra.mxu0 %v2518_v59 }
 0x9f1   :  { %4729 = vmatpush3.msra.mxu0 %v2784_v35 }
 0x9f2   :  { %4730 = vmatprep.subr.mxu0 %v2783_v61 }
 0x9f3   :  { %4731 = vmatpush3.msra.mxu0 %v2783_v61 }
 0x9f4   :  { %4732 = vmatprep.subr.mxu0 %v2782_v62 }
 0x9f5   :  { %4733 = vmatpush3.msra.mxu0 %v2782_v62 }
 0x9f6   :  { %4734 = vmatprep.subr.mxu0 %v2781_v38 }
 0x9f7   :  { %4735 = vmatpush3.msra.mxu0 %v2781_v38 }
 0x9f8   :  { %4736 = vmatprep.subr.mxu0 %v2780_v63 }
 0x9f9   :  { %4737 = vmatpush3.msra.mxu0 %v2780_v63 }
 0x9fa   :  { %4738 = vmatprep.subr.mxu0 %v2779_v5 }
 0x9fb   :  { %4739 = vmatpush3.msra.mxu0 %v2779_v5  ;;  %v2992_v5 = vld [vmem:[#allocation14 + $0x158] sm:$0xff] }
 0x9fc   :  { %4740 = vmatprep.subr.mxu0 %v2778_v25 }
 0x9fd   :  { %4741 = vmatpush3.msra.mxu0 %v2778_v25 }
 0x9fe   :  { %4742 = vmatprep.subr.mxu0 %v2777_v28 }
 0x9ff   :  { %4743 = vmatpush3.msra.mxu0 %v2777_v28 }
 0xa00   :  { %4744 = vmatprep.subr.mxu0 %v2776_v30 }
 0xa01   :  { %4745 = vmatpush3.msra.mxu0 %v2776_v30 }
 0xa02   :  { %4746 = vmatprep.subr.mxu0 %v2775_v33 }
 0xa03   :  { %4747 = vmatpush3.msra.mxu0 %v2775_v33 }
 0xa04   :  { %4748 = vmatprep.subr.mxu0 %v2774_v36 }
 0xa05   :  { %4749 = vmatpush3.msra.mxu0 %v2774_v36  ;;  %v3561_v36 = vld [vmem:[%s5745_s19] ss:$0 sm:$0xff] }
 0xa06   :  { %4750 = vmatprep.subr.mxu0 %v2773_v39 }
 0xa07   :  { %4751 = vmatpush3.msra.mxu0 %v2773_v39 }
 0xa08   :  { %4752 = vmatprep.subr.mxu0 %v2772_v41 }
 0xa09   :  { %4753 = vmatpush3.msra.mxu0 %v2772_v41 }
 0xa0a   :  { %4754 = vmatprep.subr.mxu0 %v2771_v42 }
 0xa0b   :  { %4755 = vmatpush3.msra.mxu0 %v2771_v42 }
 0xa0c   :  { %4756 = vmatprep.subr.mxu0 %v2770_v43 }
 0xa0d   :  { %4757 = vmatpush3.msra.mxu0 %v2770_v43 }
 0xa0e   :  { %4758 = vmatprep.subr.mxu0 %v2769_v44 }
 0xa0f   :  { %4759 = vmatpush3.msra.mxu0 %v2769_v44 }
 0xab0   :  { %v2585_v6 = vpop.f32.mrf.mxu0 }
 0xab1   :  { %v2589_v7 = vmul.f32 0.001953125, %v2585_v6 }
 0xab2   :  { %v4679_v8 = vpop.f32.mrf.mxu0 }
 0xab3   :  { %v2591_v10 = vadd.f32 1e-05, %v2589_v7  ;;  %v2991_v8 = vld [vmem:[#allocation14 + $0x150] sm:$0xff] }
 0xab5   :  { %4839 = vrsqrt.f32 %v2591_v10  ;;  %v2990_v10 = vld [vmem:[#allocation14 + $0x148] sm:$0xff] }
 0xac2   :  { %v4840_v12 = vpop.eup %4839 }
 0xac3   :  { %v2593_v13 = vmul.f32 %v4840_v12, %v2590_v11  ;;  %v2989_v12 = vld [vmem:[#allocation14 + $0x140] sm:$0xff] }
 0xac5   :  { %4683 = vmatmul.mubr.msk.f32.vlgmr.msra.gmra.mxu1 %vm963_vm3, %v2593_v13  ;;  %v2988_v13 = vld [vmem:[#allocation14 + $0x138] sm:$0xff] }
 0xac6   :  { %4686 = vmatpush3.msra.mxu1 %v5518_v37  ;;  %4687 = vmatprep.mubr.msk.f32.mxu1 %vm5000_vm2, %v4999_v0  ;;  %v2790_v37 = vld [vmem:[#allocation14 + $0x80] sm:$0xff] }
 0xac7   :  { %4690 = vmatprep.subr.mxu1 %v2805_v15 }
 0xac9   :  { %4688 = vmatmul.mubr.msk.f32.vlgmr.msra.gmra.mxu1 %vm963_vm3, %v2667_v16  ;;  %v2986_v16 = vld [vmem:[#allocation14 + $0x128] sm:$0xff] }
 0xaca   :  { %4691 = vmatpush3.msra.mxu1 %v2805_v15  ;;  %v2987_v15 = vld [vmem:[#allocation14 + $0x130] sm:$0xff] }
 0xacb   :  { %4692 = vmatprep.subr.mxu1 %v2804_v17 }
 0xacc   :  { %4693 = vmatpush3.msra.mxu1 %v2804_v17  ;;  %v2985_v17 = vld [vmem:[#allocation14 + $0x120] sm:$0xff] }
 0xacd   :  { %4694 = vmatprep.subr.mxu1 %v2803_v19 }
 0xace   :  { %4695 = vmatpush3.msra.mxu1 %v2803_v19  ;;  %v2984_v19 = vld [vmem:[#allocation14 + $0x118] sm:$0xff] }
 0xacf   :  { %4696 = vmatprep.subr.mxu1 %v2802_v20 }
 0xad0   :  { %4697 = vmatpush3.msra.mxu1 %v2802_v20  ;;  %v2983_v20 = vld [vmem:[#allocation14 + $0x110] sm:$0xff] }
 0xad1   :  { %4698 = vmatprep.subr.mxu1 %v2801_v22 }
 0xad2   :  { %4699 = vmatpush3.msra.mxu1 %v2801_v22  ;;  %v2982_v22 = vld [vmem:[#allocation14 + $0x108] sm:$0xff] }
 0xad3   :  { %4700 = vmatprep.subr.mxu1 %v2800_v1 }
 0xad4   :  { %4701 = vmatpush3.msra.mxu1 %v2800_v1  ;;  %v2981_v1 = vld [vmem:[#allocation14 + $0x100] sm:$0xff] }
 0xad5   :  { %4702 = vmatprep.subr.mxu1 %v2799_v2 }
 0xad6   :  { %4703 = vmatpush3.msra.mxu1 %v2799_v2 }
 0xad7   :  { %4704 = vmatprep.subr.mxu1 %v2798_v3 }
 0xad8   :  { %4705 = vmatpush3.msra.mxu1 %v2798_v3 }
 0xad9   :  { %4706 = vmatprep.subr.mxu1 %v2797_v4 }
 0xada   :  { %4707 = vmatpush3.msra.mxu1 %v2797_v4 }
 0xadb   :  { %4708 = vmatprep.subr.mxu1 %v2796_v23 }
 0xadc   :  { %4709 = vmatpush3.msra.mxu1 %v2796_v23  ;;  %v3105_v23 = vld [vmem:[%s5748_s22] sm:$0xff] }
 0xadd   :  { %4710 = vmatprep.subr.mxu1 %v2795_v24 }
 0xade   :  { %4711 = vmatpush3.msra.mxu1 %v2795_v24 }
 0xadf   :  { %4712 = vmatprep.subr.mxu1 %v2794_v27 }
 0xae0   :  { %4713 = vmatpush3.msra.mxu1 %v2794_v27 }
 0xae1   :  { %4714 = vmatprep.subr.mxu1 %v2793_v29 }
 0xae2   :  { %4715 = vmatpush3.msra.mxu1 %v2793_v29 }
 0xae3   :  { %4716 = vmatprep.subr.mxu1 %v2792_v32 }
 0xae4   :  { %4717 = vmatpush3.msra.mxu1 %v2792_v32 }
 0xae5   :  { %4718 = vmatprep.subr.mxu1 %v2791_v34 }
 0xae6   :  { %4719 = vmatpush3.msra.mxu1 %v2791_v34 }
 0xae7   :  { %4720 = vmatprep.subr.mxu1 %v2790_v37 }
 0xae8   :  { %4721 = vmatpush3.msra.mxu1 %v2790_v37 }
 0xae9   :  { %4766 = vmatprep.subr.mxu1 %v2996_v40 }
 0xb85   :  { %v2663_v49 = vpop.f32.mrf.mxu1 }
 0xb86   :  { %v2744_v50 = vrot.slane %v2663_v49, %v5322_v60 }
 0xb87   :  { %v4684_v51 = vpop.f32.mrf.mxu1 }
 0xb88   :  { %v2745_v26 = vmul.f32 %v2744_v50, %v5559_v45  ;;  %v2746_v53 = vmul.f32 %v2744_v50, %v5561_v46  ;;  %v2747_v54 = vmul.f32 %v2744_v50, %v5563_v47  ;;  %v2748_v55 = vmul.f32 %v2744_v50, %v5565_v48  ;;  %v2995_v45 = vld [vmem:[#allocation14 + $0x170] sm:$0xff]  ;;  %v2994_v46 = vld [vmem:[#allocation14 + $0x168] sm:$0xff] }
 0xb89   :  { %v2737_v52 = vpop.f32.mrf.mxu1 }
 0xb8a   :  { %v2752_v31 = vrot.slane %v2737_v52, %v5322_v60  ;;  %v2993_v60 = vld [vmem:[#allocation14 + $0x160] sm:$0xff] }
 0xb8b   :  { %v4689_v56 = vpop.f32.mrf.mxu1 }
 0xb8c   :  { %v2753_v57 = vadd.f32 %v2752_v31, %v2745_v26  ;;  %v2754_v58 = vadd.f32 %v2752_v31, %v2746_v53  ;;  %v2755_v59 = vadd.f32 %v2752_v31, %v2747_v54  ;;  %v2756_v35 = vadd.f32 %v2752_v31, %v2748_v55 }
 0xb8e   :  { %v2757_v61 = vmax.f32 %v2753_v57, 0.0  ;;  %v2758_v62 = vmax.f32 %v2754_v58, 0.0  ;;  %v2759_v38 = vmax.f32 %v2755_v59, 0.0  ;;  %v2760_v63 = vmax.f32 %v2756_v35, 0.0  ;;  %v3106_v35 = vld [vmem:[%s5748_s22 + $0x8] sm:$0xff] }
 0xb90   :  { %2761 = vst [vmem:[#allocation4 + $0x1] sm:$0xff] %v2757_v61  ;;  %2762 = vst [vmem:[#allocation4 + $0x9] sm:$0xff] %v2758_v62  ;;  %4722 = vmatprep.mubr.f32.mxu1 %v2757_v61 }
 0xb91   :  { %2763 = vst [vmem:[#allocation4 + $0x19] sm:$0xff] %v2759_v38  ;;  %2764 = vst [vmem:[#allocation4 + $0x21] sm:$0xff] %v2760_v63  ;;  %4723 = vmatmul.mubr.f32.vlgmr.msra.gmra.mxu1 %v2758_v62  ;;  %v3107_v62 = vld [vmem:[%s5748_s22 + $0x10] sm:$0xff] }
 0xb92   :  { %4767 = vmatpush3.msra.mxu1 %v2996_v40  ;;  %4725 = vmatprep.mubr.f32.mxu1 %v2759_v38  ;;  %v3139_v38 = vld [vmem:[%s5749_s23 + $0xf0] sm:$0xff] }
 0xb93   :  { %4768 = vmatprep.subr.mxu1 %v2995_v45 }
 0xb94   :  { %4769 = vmatpush3.msra.mxu1 %v2995_v45  ;;  %v3137_v45 = vld [vmem:[%s5749_s23 + $0xe0] sm:$0xff] }
 0xb95   :  { %4770 = vmatprep.subr.mxu1 %v2994_v46  ;;  %4726 = vmatmul.mubr.f32.gmra.mxu1 %v2760_v63  ;;  %v3138_v63 = vld [vmem:[%s5749_s23 + $0xe8] sm:$0xff] }
 0xb96   :  { %4771 = vmatpush3.msra.mxu1 %v2994_v46  ;;  %v3136_v46 = vld [vmem:[%s5749_s23 + $0xd8] sm:$0xff] }
 0xb97   :  { %v2765_v47 = vld [vmem:[#allocation4] sm:$0xff]  ;;  %v2766_v48 = vld [vmem:[#allocation4 + $0x8] sm:$0xff]  ;;  %4772 = vmatprep.subr.mxu1 %v2993_v60 }
 0xb98   :  { %4760 = vmatprep.mubr.f32.mxu0 %v2765_v47  ;;  %v2976_v6 = vld [vmem:[#allocation4 + $0x2] sm:$0xff]  ;;  %4773 = vmatpush3.msra.mxu1 %v2993_v60  ;;  %v2767_v7 = vld [vmem:[#allocation4 + $0x18] sm:$0xff]  ;;  %v2977_v2 = vld [vmem:[#allocation4 + $0xa] sm:$0xff] }
 0xb99   :  { %4761 = vmatmul.mubr.f32.vlgmr.msra.gmra.mxu0 %v2766_v48  ;;  %4798 = vmatprep.mubr.f32.mxu1 %v2976_v6  ;;  %v2768_v11 = vld [vmem:[#allocation4 + $0x20] sm:$0xff]  ;;  %v3135_v60 = vld [vmem:[%s5749_s23 + $0xd0] sm:$0xff]  ;;  %v3134_v47 = vld [vmem:[%s5749_s23 + $0xc8] sm:$0xff] }
 0xb9a   :  { %4763 = vmatprep.mubr.f32.mxu0 %v2767_v7  ;;  %4774 = vmatprep.subr.mxu1 %v2992_v5  ;;  %v2978_v3 = vld [vmem:[#allocation4 + $0x1a] sm:$0xff]  ;;  %v2979_v4 = vld [vmem:[#allocation4 + $0x22] sm:$0xff]  ;;  %v3131_v6 = vld [vmem:[%s5749_s23 + $0xb0] sm:$0xff] }
 0xb9b   :  { %4775 = vmatpush3.msra.mxu1 %v2992_v5  ;;  %v3133_v48 = vld [vmem:[%s5749_s23 + $0xc0] sm:$0xff]  ;;  %v3132_v5 = vld [vmem:[%s5749_s23 + $0xb8] sm:$0xff]  ;;  %v3130_v7 = vld [vmem:[%s5749_s23 + $0xa8] sm:$0xff] }
 0xb9c   :  { %4776 = vmatprep.subr.mxu1 %v2991_v8 }
 0xb9d   :  { %4764 = vmatmul.mubr.f32.gmra.mxu0 %v2768_v11  ;;  %4777 = vmatpush3.msra.mxu1 %v2991_v8  ;;  %v3129_v8 = vld [vmem:[%s5749_s23 + $0xa0] sm:$0xff]  ;;  %v3127_v11 = vld [vmem:[%s5749_s23 + $0x90] sm:$0xff] }
 0xb9e   :  { %4778 = vmatprep.subr.mxu1 %v2990_v10  ;;  %4808 = vmatprep.mubr.msk.f32.mxu0 %vm3141_vm4, %v3105_v23 }
 0xb9f   :  { %4779 = vmatpush3.msra.mxu1 %v2990_v10  ;;  %v3128_v10 = vld [vmem:[%s5749_s23 + $0x98] sm:$0xff] }
 0xba0   :  { %4780 = vmatprep.subr.mxu1 %v2989_v12 }
 0xba1   :  { %4781 = vmatpush3.msra.mxu1 %v2989_v12  ;;  %v3126_v12 = vld [vmem:[%s5749_s23 + $0x88] sm:$0xff] }
 0xba2   :  { %4782 = vmatprep.subr.mxu1 %v2988_v13 }
 0xba3   :  { %4783 = vmatpush3.msra.mxu1 %v2988_v13  ;;  %v3125_v13 = vld [vmem:[%s5749_s23 + $0x80] sm:$0xff] }
 0xba4   :  { %4784 = vmatprep.subr.mxu1 %v2987_v15 }
 0xba5   :  { %4785 = vmatpush3.msra.mxu1 %v2987_v15  ;;  %v3124_v15 = vld [vmem:[%s5749_s23 + $0x78] sm:$0xff] }
 0xba6   :  { %4786 = vmatprep.subr.mxu1 %v2986_v16 }
 0xba7   :  { %4787 = vmatpush3.msra.mxu1 %v2986_v16  ;;  %v3123_v16 = vld [vmem:[%s5749_s23 + $0x70] sm:$0xff] }
 0xba8   :  { %4788 = vmatprep.subr.mxu1 %v2985_v17 }
 0xba9   :  { %4789 = vmatpush3.msra.mxu1 %v2985_v17  ;;  %v3122_v17 = vld [vmem:[%s5749_s23 + $0x68] sm:$0xff] }
 0xbaa   :  { %4790 = vmatprep.subr.mxu1 %v2984_v19 }
 0xbab   :  { %4791 = vmatpush3.msra.mxu1 %v2984_v19  ;;  %v3121_v19 = vld [vmem:[%s5749_s23 + $0x60] sm:$0xff] }
 0xbac   :  { %4792 = vmatprep.subr.mxu1 %v2983_v20 }
 0xbad   :  { %4793 = vmatpush3.msra.mxu1 %v2983_v20  ;;  %v3120_v20 = vld [vmem:[%s5749_s23 + $0x58] sm:$0xff] }
 0xbae   :  { %4794 = vmatprep.subr.mxu1 %v2982_v22 }
 0xbaf   :  { %4795 = vmatpush3.msra.mxu1 %v2982_v22  ;;  %v3119_v22 = vld [vmem:[%s5749_s23 + $0x50] sm:$0xff] }
 0xbb0   :  { %4796 = vmatprep.subr.mxu1 %v2981_v1 }
 0xbb1   :  { %4797 = vmatpush3.msra.mxu1 %v2981_v1  ;;  %v3118_v1 = vld [vmem:[%s5749_s23 + $0x48] sm:$0xff] }
 0xbb2   :  { %4799 = vmatmul.mubr.f32.vlgmr.msra.gmra.mxu1 %v2977_v2  ;;  %v3117_v2 = vld [vmem:[%s5749_s23 + $0x40] sm:$0xff] }
 0xbb3   :  { %4801 = vmatprep.mubr.f32.mxu1 %v2978_v3  ;;  %v3116_v3 = vld [vmem:[%s5749_s23 + $0x38] sm:$0xff] }
 0xbb6   :  { %4802 = vmatmul.mubr.f32.gmra.mxu1 %v2979_v4  ;;  %v3115_v4 = vld [vmem:[%s5749_s23 + $0x30] sm:$0xff] }
 0xbb7   :  { %4818 = vmatprep.mubr.msk.f32.mxu1 %vm3141_vm4, %v3105_v23  ;;  %v3114_v23 = vld [vmem:[%s5749_s23 + $0x28] sm:$0xff] }
 0xc51   :  { %v4724_v24 = vpop.f32.mrf.mxu1 }
 0xc53   :  { %v2872_v27 = vpop.f32.mrf.mxu1 }
 0xc55   :  { %v4727_v29 = vpop.f32.mrf.mxu1 }
 0xc57   :  { %v2882_v32 = vpop.f32.mrf.mxu1 }
 0xc59   :  { %v4762_v25 = vpop.f32.mrf.mxu0 }
 0xc5a   :  { %v2963_v33 = vadd.f32 %v4762_v25, %v4724_v24  ;;  %v3113_v24 = vld [vmem:[%s5749_s23 + $0x20] sm:$0xff]  ;;  %v3112_v25 = vld [vmem:[%s5749_s23 + $0x18] sm:$0xff] }
 0xc5b   :  { %v2957_v28 = vpop.f32.mrf.mxu0 }
 0xc5c   :  { %v2958_v37 = vadd.f32 %v2957_v28, %v2872_v27  ;;  %v3111_v27 = vld [vmem:[%s5749_s23 + $0x10] sm:$0xff]  ;;  %v3110_v28 = vld [vmem:[%s5749_s23 + $0x8] sm:$0xff] }
 0xc5d   :  { %v4765_v30 = vpop.f32.mrf.mxu0 }
 0xc5e   :  { %v2973_v42 = vadd.f32 %v4765_v30, %v4727_v29  ;;  %v3109_v29 = vld [vmem:[%s5749_s23] sm:$0xff] }
 0xc5f   :  { %v2967_v40 = vpop.f32.mrf.mxu0 }
 0xc60   :  { %v2968_v50 = vadd.f32 %v2967_v40, %v2882_v32 }
 0xc72   :  { %v4800_v34 = vpop.f32.mrf.mxu1 }
 0xc73   :  { %v3083_v39 = vadd.f32 %v4800_v34, %v2963_v33 }
 0xc74   :  { %v3063_v41 = vpop.f32.mrf.mxu1 }
 0xc75   :  { %v3094_v43 = vadd.f32 %v3561_v36, %v3083_v39  ;;  %v3082_v44 = vadd.f32 %v3063_v41, %v2958_v37 }
 0xc76   :  { %v4803_v49 = vpop.f32.mrf.mxu1 }
 0xc77   :  { %v3093_v51 = vadd.f32 %v3561_v36, %v3082_v44  ;;  %v3085_v26 = vadd.f32 %v4803_v49, %v2973_v42  ;;  %v3098_v52 = vadd.f32 %v3094_v43, %v5381_v9 }
 0xc78   :  { %v3073_v53 = vpop.f32.mrf.mxu1 }
 0xc79   :  { %v3096_v54 = vadd.f32 %v3561_v36, %v3085_v26  ;;  %v3084_v55 = vadd.f32 %v3073_v53, %v2968_v50  ;;  %v3102_v31 = vmax.f32 %v3098_v52, 0.0  ;;  %v3097_v56 = vadd.f32 %v3093_v51, %v5384_v14  ;;  %v3140_v14 = vld [vmem:[%s5749_s23 + $0xf8] sm:$0xff]  ;;  %s5001_s23 = smov [#allocation16]  }
 0xc7a   :  { %s3523_s6 = sshll.u32 %s5001_s23, 4  ;;  %s3524_s6 = int_to_ptr.vmem [resolvable:$true] %s3523_s6 }
 0xc7b   :  { %v3095_v57 = vadd.f32 %v3561_v36, %v3084_v55  ;;  %4804 = vmatprep.subr.mxu0 %v3102_v31  ;;  %v3101_v58 = vmax.f32 %v3097_v56, 0.0  ;;  %v3100_v59 = vadd.f32 %v3096_v54, %v5387_v18  ;;  %s4961_s27 = scalar_lea.vmem %s3524_s6, 2048  ;;  %p4966_p3 = scmp.lt.s32.totalorder %s3524_s6, %s3524_s6 }
 0xc7c   :  { %4805 = vmatpush3.msra.mxu0 %v3102_v31  ;;  %p4962_p2 = scmp.ne.s32.totalorder %s3524_s6, %s4961_s27  ;;  %p4967_p4 = scmp.lt.s32.totalorder %s4961_s27, %s4961_s27 }
 0xc7d   :  { %4806 = vmatprep.subr.mxu0 %v3101_v58  ;;  %v3104_v61 = vmax.f32 %v3100_v59, 0.0  ;;  %v3099_v9 = vadd.f32 %v3095_v57, %v5390_v21  ;;  %v3108_v21 = vld [vmem:[%s5748_s22 + $0x18] sm:$0xff] }
 0xc7e   :  { %4807 = vmatpush3.msra.mxu0 %v3101_v58  ;;  %p4968_p5 = por %p4967_p4, %p4966_p3 }
 0xc7f   :  { %4814 = vmatprep.subr.mxu1 %v3104_v61  ;;  %4809 = vmatmul.mubr.msk.f32.vlgmr.msra.gmra.mxu0 %vm3141_vm4, %v3106_v35  ;;  %v3103_v18 = vmax.f32 %v3099_v9, 0.0 }
 0xc80   :  { %4815 = vmatpush3.msra.mxu1 %v3104_v61  ;;  %4811 = vmatprep.mubr.msk.f32.mxu0 %vm3141_vm4, %v3107_v62  ;;  %p4969_p6 = pnand %p4968_p5, %p4962_p2 }
 0xc81   :  { %4816 = vmatprep.subr.mxu1 %v3103_v18  ;;  %3239 = vmatprep.subr.mxu0 %v3140_v14 }
 0xc82   :  { %4817 = vmatpush3.msra.mxu1 %v3103_v18  ;;  %3240 = vmatpush1.msra.mxu0 %v3139_v38 }
 0xc83   :  { %4819 = vmatmul.mubr.msk.f32.vlgmr.msra.gmra.mxu1 %vm3141_vm4, %v3106_v35  ;;  %4812 = vmatmul.mubr.msk.f32.gmra.mxu0 %vm3141_vm4, %v3108_v21 }
 0xc84   :  { %4821 = vmatprep.mubr.msk.f32.mxu1 %vm3141_vm4, %v3107_v62  ;;  %3241 = vmatprep.subr.mxu0 %v3138_v63 }
 0xc85   :  { %3242 = vmatpush1.msra.mxu0 %v3137_v45  ;;  %3421 = vmatprep.subr.mxu1 %v3140_v14 }
 0xc86   :  { %3243 = vmatprep.subr.mxu0 %v3136_v46  ;;  %3422 = vmatpush1.msra.mxu1 %v3139_v38 }
 0xc87   :  { %4822 = vmatmul.mubr.msk.f32.gmra.mxu1 %vm3141_vm4, %v3108_v21  ;;  %3244 = vmatpush1.msra.mxu0 %v3135_v60 }
 0xc88   :  { %3423 = vmatprep.subr.mxu1 %v3138_v63  ;;  %3245 = vmatprep.subr.mxu0 %v3134_v47 }
 0xc89   :  { %3424 = vmatpush1.msra.mxu1 %v3137_v45  ;;  %3246 = vmatpush1.msra.mxu0 %v3133_v48 }
 0xc8a   :  { %3425 = vmatprep.subr.mxu1 %v3136_v46  ;;  %3247 = vmatprep.subr.mxu0 %v3132_v5 }
 0xc8b   :  { %3426 = vmatpush1.msra.mxu1 %v3135_v60  ;;  %3248 = vmatpush1.msra.mxu0 %v3131_v6 }
 0xc8c   :  { %3427 = vmatprep.subr.mxu1 %v3134_v47  ;;  %3249 = vmatprep.subr.mxu0 %v3130_v7 }
 0xc8d   :  { %3428 = vmatpush1.msra.mxu1 %v3133_v48  ;;  %3250 = vmatpush1.msra.mxu0 %v3129_v8 }
 0xc8e   :  { %3429 = vmatprep.subr.mxu1 %v3132_v5  ;;  %3251 = vmatprep.subr.mxu0 %v3128_v10 }
 0xc8f   :  { %3430 = vmatpush1.msra.mxu1 %v3131_v6  ;;  %3252 = vmatpush1.msra.mxu0 %v3127_v11 }
 0xc90   :  { %3431 = vmatprep.subr.mxu1 %v3130_v7  ;;  %3253 = vmatprep.subr.mxu0 %v3126_v12 }
 0xc91   :  { %3432 = vmatpush1.msra.mxu1 %v3129_v8  ;;  %3254 = vmatpush1.msra.mxu0 %v3125_v13 }
 0xc92   :  { %3433 = vmatprep.subr.mxu1 %v3128_v10  ;;  %3255 = vmatprep.subr.mxu0 %v3124_v15 }
 0xc93   :  { %3434 = vmatpush1.msra.mxu1 %v3127_v11  ;;  %3256 = vmatpush1.msra.mxu0 %v3123_v16 }
 0xc94   :  { %3435 = vmatprep.subr.mxu1 %v3126_v12  ;;  %3257 = vmatprep.subr.mxu0 %v3122_v17 }
 0xc95   :  { %3436 = vmatpush1.msra.mxu1 %v3125_v13  ;;  %3258 = vmatpush1.msra.mxu0 %v3121_v19 }
 0xc96   :  { %3437 = vmatprep.subr.mxu1 %v3124_v15  ;;  %3259 = vmatprep.subr.mxu0 %v3120_v20 }
 0xc97   :  { %3438 = vmatpush1.msra.mxu1 %v3123_v16  ;;  %3260 = vmatpush1.msra.mxu0 %v3119_v22 }
 0xc98   :  { %3439 = vmatprep.subr.mxu1 %v3122_v17  ;;  %3261 = vmatprep.subr.mxu0 %v3118_v1 }
 0xc99   :  { %3440 = vmatpush1.msra.mxu1 %v3121_v19  ;;  %3262 = vmatpush1.msra.mxu0 %v3117_v2 }
 0xc9a   :  { %3441 = vmatprep.subr.mxu1 %v3120_v20  ;;  %3263 = vmatprep.subr.mxu0 %v3116_v3 }
 0xc9b   :  { %3442 = vmatpush1.msra.mxu1 %v3119_v22  ;;  %3264 = vmatpush1.msra.mxu0 %v3115_v4 }
 0xc9c   :  { %3443 = vmatprep.subr.mxu1 %v3118_v1  ;;  %3265 = vmatprep.subr.mxu0 %v3114_v23 }
 0xc9d   :  { %3444 = vmatpush1.msra.mxu1 %v3117_v2  ;;  %3266 = vmatpush1.msra.mxu0 %v3113_v24 }
 0xc9e   :  { %3445 = vmatprep.subr.mxu1 %v3116_v3  ;;  %3267 = vmatprep.subr.mxu0 %v3112_v25 }
 0xc9f   :  { %3446 = vmatpush1.msra.mxu1 %v3115_v4  ;;  %3303 = vmatprep.mubr.f32.mxu0 %v4999_v0 }
 0xca0   :  { %3447 = vmatprep.subr.mxu1 %v3114_v23  ;;  %3485 = vmatprep.mubr.f32.mxu1 %v4999_v0 }
 0xca1   :  { %3448 = vmatpush1.msra.mxu1 %v3113_v24  ;;  %3268 = vmatpush1.msra.mxu0 %v3111_v27 }
 0xca2   :  { %3449 = vmatprep.subr.mxu1 %v3112_v25  ;;  %3269 = vmatprep.subr.mxu0 %v3110_v28 }
 0xca3   :  { %3450 = vmatpush1.msra.mxu1 %v3111_v27  ;;  %3270 = vmatpush1.msra.mxu0 %v3109_v29 }
 0xca4   :  { %3451 = vmatprep.subr.mxu1 %v3110_v28 }
 0xca5   :  { %3452 = vmatpush1.msra.mxu1 %v3109_v29 }
 0xd3f   :  { %v4810_v30 = vpop.f32.mrf.mxu0 }
 0xd41   :  { %v3220_v32 = vpop.f32.mrf.mxu0 }
 0xd42   :  { %3304 = vmatmul.mubr.f32.vlgmr.msra.gmra.mxu0 %v3220_v32 }
 0xd43   :  { %v4820_v33 = vpop.f32.mrf.mxu1  ;;  %3309 = vmatprep.mubr.f32.mxu0 %v4999_v0  ;;  %v4813_v34 = vpop.f32.mrf.mxu0 }
 0xd45   :  { %v3402_v36 = vpop.f32.mrf.mxu1  ;;  %v3230_v37 = vpop.f32.mrf.mxu0 }
 0xd46   :  { %3486 = vmatmul.mubr.f32.vlgmr.msra.gmra.mxu1 %v3402_v36  ;;  %3310 = vmatmul.mubr.f32.gmra.mxu0 %v4810_v30 }
 0xd47   :  { %3491 = vmatprep.mubr.f32.mxu1 %v4999_v0  ;;  %3315 = vmatprep.mubr.f32.mxu0 %v4999_v0  ;;  %v4823_v39 = vpop.f32.mrf.mxu1 }
 0xd49   :  { %v3412_v40 = vpop.f32.mrf.mxu1 }
 0xd4a   :  { %3492 = vmatmul.mubr.f32.gmra.mxu1 %v4820_v33  ;;  %3316 = vmatmul.mubr.f32.gmra.mxu0 %v3230_v37 }
 0xd4b   :  { %3497 = vmatprep.mubr.f32.mxu1 %v4999_v0  ;;  %3321 = vmatprep.mubr.f32.mxu0 %v4999_v0 }
 0xd4e   :  { %3498 = vmatmul.mubr.f32.gmra.mxu1 %v3412_v40  ;;  %3322 = vmatmul.mubr.f32.gmra.mxu0 %v4813_v34 }
 0xd4f   :  { %3503 = vmatprep.mubr.f32.mxu1 %v4999_v0 }
 0xd52   :  { %3504 = vmatmul.mubr.f32.gmra.mxu1 %v4823_v39 }
 0xe02   :  { %v3305_v41 = vpop.f32.mrf.mxu0 }
 0xe03   :  { %3328 = vst [vmem:[#allocation16] sm:$0xff] %v3305_v41 }
 0xe04   :  { %v3307_v42 = vpop.f32.mrf.mxu0 }
 0xe05   :  { %3329 = vst [vmem:[#allocation16 + $0x8] sm:$0xff] %v3307_v42 }
 0xe06   :  { %v3487_v43 = vpop.f32.mrf.mxu1  ;;  %v3311_v44 = vpop.f32.mrf.mxu0 }
 0xe07   :  { %3510 = vst [vmem:[#allocation16 + $0x40] sm:$0xff] %v3487_v43  ;;  %3330 = vst [vmem:[#allocation16 + $0x10] sm:$0xff] %v3311_v44 }
 0xe08   :  { %v3489_v49 = vpop.f32.mrf.mxu1  ;;  %v3313_v50 = vpop.f32.mrf.mxu0 }
 0xe09   :  { %3511 = vst [vmem:[#allocation16 + $0x48] sm:$0xff] %v3489_v49  ;;  %3331 = vst [vmem:[#allocation16 + $0x18] sm:$0xff] %v3313_v50 }
 0xe0a   :  { %v3493_v51 = vpop.f32.mrf.mxu1  ;;  %v3317_v26 = vpop.f32.mrf.mxu0 }
 0xe0b   :  { %3512 = vst [vmem:[#allocation16 + $0x50] sm:$0xff] %v3493_v51  ;;  %3332 = vst [vmem:[#allocation16 + $0x20] sm:$0xff] %v3317_v26 }
 0xe0c   :  { %v3495_v52 = vpop.f32.mrf.mxu1  ;;  %v3319_v53 = vpop.f32.mrf.mxu0 }
 0xe0d   :  { %3513 = vst [vmem:[#allocation16 + $0x58] sm:$0xff] %v3495_v52  ;;  %3333 = vst [vmem:[#allocation16 + $0x28] sm:$0xff] %v3319_v53 }
 0xe0e   :  { %v3499_v0 = vpop.f32.mrf.mxu1  ;;  %v3323_v54 = vpop.f32.mrf.mxu0 }
 0xe0f   :  { %3514 = vst [vmem:[#allocation16 + $0x60] sm:$0xff] %v3499_v0  ;;  %3334 = vst [vmem:[#allocation16 + $0x30] sm:$0xff] %v3323_v54 }
 0xe10   :  { %v3501_v55 = vpop.f32.mrf.mxu1  ;;  %v3325_v31 = vpop.f32.mrf.mxu0 }
 0xe11   :  { %3515 = vst [vmem:[#allocation16 + $0x68] sm:$0xff] %v3501_v55  ;;  %3335 = vst [vmem:[#allocation16 + $0x38] sm:$0xff] %v3325_v31 }
 0xe12   :  { %v3505_v56 = vpop.f32.mrf.mxu1 }
 0xe13   :  { %3516 = vst [vmem:[#allocation16 + $0x70] sm:$0xff] %v3505_v56 }
 0xe14   :  { %v3507_v57 = vpop.f32.mrf.mxu1 }
 0xe15   :  { %3517 = vst [vmem:[#allocation16 + $0x78] sm:$0xff] %v3507_v57 }
 0xe16   :  { %4972 = shalt.err (!%p4969_p6)
}
 0xe17   :  { %s5002_s0 = smov 256   ;;  %s5003_s7 = smov 16  }
 0xe18   :  { %3529 = dma.vmem_to_hbm [thread:$0]  %s3524_s6, 2048, %s5750_s24, [#allocation7], %s5002_s0, %s5002_s0, %s5003_s7  }
 0xe19   :  { %4989 = dma.done.wait [#allocation7], 2048  }
 0xe1a   :  { %4990 = vsyncadd [#allocation7], 4294965248 }
 0xe1b   :  { %3533 = vsyncpa [#allocation6], 1 }
 0xe1c   :  { %3534 = vsyncpa [#allocation9], 1 }
 0xe1d   :  { %3535 = vsyncpa [#allocation12], 1 }
 0xe1e   :  { %3536 = vsyncpa [#allocation15], 1 }
 0xe1f   :  { %3537 = vsyncpa [#allocation7], 1 }

</bundles_post_ra>
